<compile_context>
chip_gen: v7x
topology: tpu7x:2x2x1
jax: 0.10.0
libtpu: 0.0.40
codegen_flags: <defaults>
</compile_context>

<pallas_src>
import numpy as np
import jax
import jax.numpy as jnp
from jax.experimental import pallas as pl
from jax.experimental.pallas import tpu as pltpu


def _bilinear_matrix(out_size, in_size):
    """1-D interpolation matrix matching F.interpolate(mode='bilinear', align_corners=False)."""
    scale = in_size / out_size
    i = np.arange(out_size, dtype=np.float64)
    src = (i + 0.5) * scale - 0.5
    src = np.maximum(src, 0.0)  # PyTorch clamps negative source indices
    i0 = np.minimum(np.floor(src).astype(np.int64), in_size - 1)
    i1 = np.minimum(i0 + 1, in_size - 1)
    w_hi = src - i0
    w_lo = 1.0 - w_hi
    A = np.zeros((out_size, in_size), dtype=np.float64)
    A[np.arange(out_size), i0] += w_lo
    A[np.arange(out_size), i1] += w_hi
    return A


def aux_head_forward(x_nhwc, params, h, w):
    N, H, W, C = x_nhwc.shape
    NC = params["w1"].shape[1]
    NH = N * H

    # ---- wrapper-side prep (plain XLA; tiny shapes) ------------------------------
    # Zero-pad + im2col (tap-major columns) + bf16 cast: (N*H*W, 9C) bf16 slab.
    x_pad = jnp.pad(x_nhwc, ((0, 0), (1, 1), (1, 1), (0, 0)))
    taps = [x_pad[:, ky:ky + H, kx:kx + W, :] for ky in range(3) for kx in range(3)]
    xcol = jnp.concatenate(taps, axis=-1).reshape(N * H * W, 9 * C).astype(jnp.bfloat16)

    # Fold BN scale into the 3x3 weights (tap-major rows, matching xcol columns).
    w3p = (params["w3"] * params["scale"][0][None, None, :]).reshape(9 * C, C)
    w3p = w3p.astype(jnp.bfloat16)
    bias = params["bias"]                                            # (1, C) f32

    Ah = _bilinear_matrix(h, H)                                      # (h, H)
    Aw = _bilinear_matrix(w, W)                                      # (w, W)
    # Batched (block-diagonal) height-upsample operator: (N*h, N*H), exact in bf16.
    ahb = jnp.asarray(np.kron(np.eye(N), Ah), jnp.bfloat16)
    # Fused [1x1 conv (x) width-upsample] operator: kron(Aw^T, w1) -> (W*C, w*NC).
    g = jnp.kron(jnp.asarray(Aw.T, jnp.float32), params["w1"]).astype(jnp.bfloat16)

    def kernel(xcol_ref, w3_ref, bias_ref, g_ref, ahb_ref, out_ref, y2_ref):
        # ---- 3x3 "same" conv (bias=False), BN scale folded: ONE K=9C matmul.
        acc = jnp.dot(xcol_ref[...], w3_ref[...],
                      preferred_element_type=jnp.float32)            # (N*H*W, C)
        # ---- BatchNorm bias + ReLU6.
        y = jnp.clip(acc + bias_ref[...], 0.0, 6.0)                  # (N*H*W, C) f32
        # ---- Dropout(0.1): identity in eval/inference forward.
        # ---- Single relayout (N*H*W, C) -> (N*H, W*C) via explicit VMEM scratch bounce.
        y3 = y.reshape(NH, W, C)
        for q in range(W):
            y2_ref[:, q * C:(q + 1) * C] = y3[:, q, :]
        # ---- 1x1 conv fused with width-axis bilinear upsample: ONE K=W*C matmul.
        z = jnp.dot(y2_ref[...].astype(jnp.bfloat16), g_ref[...],
                    preferred_element_type=jnp.float32)              # (N*H, w*NC)
        # ---- Height-axis bilinear upsample for the whole batch: ONE matmul.
        out_ref[...] = jnp.dot(ahb_ref[...], z.astype(jnp.bfloat16),
                               preferred_element_type=jnp.float32)   # (N*h, w*NC)

    out = pl.pallas_call(
        kernel,
        out_shape=jax.ShapeDtypeStruct((N * h, w * NC), jnp.float32),
        grid_spec=pltpu.PrefetchScalarGridSpec(
            num_scalar_prefetch=0,
            grid=(1,),
            in_specs=[
                pl.BlockSpec((N * H * W, 9 * C), lambda i: (0, 0)),
                pl.BlockSpec((9 * C, C), lambda i: (0, 0)),
                pl.BlockSpec((1, C), lambda i: (0, 0)),
                pl.BlockSpec((W * C, w * NC), lambda i: (0, 0)),
                pl.BlockSpec((N * h, N * H), lambda i: (0, 0)),
            ],
            out_specs=pl.BlockSpec((N * h, w * NC), lambda i: (0, 0)),
            scratch_shapes=[pltpu.VMEM((NH, W * C), jnp.float32)],
        ),
        compiler_params=pltpu.CompilerParams(
            dimension_semantics=("arbitrary",)),
    )(xcol, w3p, bias, g, ahb)

    # Lane-dense (N*h, w*NC) slab -> NHWC (N, h, w, NC).
    return out.reshape(N, h, w, NC)


def init_params(key, C, NC):
    k1, k2 = jax.random.split(key)
    w3 = jax.random.normal(k1, (9, C, C), jnp.float32) * 0.05
    w1 = jax.random.normal(k2, (C, NC), jnp.float32) * 0.05
    # Deterministic BatchNorm2d(C) state (inference), folded to scale/bias.
    gamma = 1.0 + 0.01 * jnp.arange(C, dtype=jnp.float32)
    beta = 0.02 * jnp.arange(C, dtype=jnp.float32)
    mean = 0.01 * jnp.arange(C, dtype=jnp.float32)
    var = 1.0 + 0.005 * jnp.arange(C, dtype=jnp.float32)
    eps = 1e-5
    scale = gamma / jnp.sqrt(var + eps)
    bias = beta - mean * scale
    return {"w3": w3, "w1": w1,
            "scale": scale.reshape(1, C), "bias": bias.reshape(1, C)}


def reference_forward(x_nhwc, params, h, w):
    """Plain-JAX f32 reference for a numerical check of the Pallas kernel."""
    N, H, W, C = x_nhwc.shape
    x_pad = jnp.pad(x_nhwc, ((0, 0), (1, 1), (1, 1), (0, 0)))
    acc = jnp.zeros((N, H, W, C), jnp.float32)
    for ky in range(3):
        for kx in range(3):
            acc = acc + jnp.einsum('nhwc,cd->nhwd',
                                   x_pad[:, ky:ky + H, kx:kx + W, :],
                                   params["w3"][ky * 3 + kx])
    y = jnp.clip(acc * params["scale"][0] + params["bias"][0], 0.0, 6.0)
    logits = jnp.einsum('nhwc,ck->nhwk', y, params["w1"])
    Ah = jnp.asarray(_bilinear_matrix(h, H), jnp.float32)
    Aw = jnp.asarray(_bilinear_matrix(w, W), jnp.float32)
    up = jnp.einsum('hH,nHWk->nhWk', Ah, logits)
    up = jnp.einsum('wW,nhWk->nhwk', Aw, up)
    return up


if __name__ == "__main__":
    N, C, H, W, NC = 2, 64, 16, 16, 8        # module defaults: in_channels=64, num_classes=8
    h_out, w_out = 32, 32                     # forward(x, h, w)

    key = jax.random.PRNGKey(0)
    kx, kp = jax.random.split(key)
    x_nchw = jax.random.normal(kx, (N, C, H, W), jnp.float32)   # PyTorch-style NCHW input
    x_nhwc = jnp.transpose(x_nchw, (0, 2, 3, 1))                # kernel layout: NHWC

    params = init_params(kp, C, NC)

    out = aux_head_forward(x_nhwc, params, h_out, w_out)        # (N, h, w, NC)
    out = jax.block_until_ready(out)

    # Kernel uses bf16 MXU operands (f32 accumulation), so compare against the f32
    # reference with a relaxed tolerance.
    ref = reference_forward(x_nhwc, params, h_out, w_out)
    np.testing.assert_allclose(np.asarray(out), np.asarray(ref), rtol=5e-2, atol=5e-2)

    print("KERNEL_OK")
</pallas_src>

<mosaic_0001>
module attributes {stable_mosaic.version = 11 : i64} {
  func.func @kernel(%arg0: i32, %arg1: memref<512x576xbf16, #tpu.memory_space<vmem>>, %arg2: memref<576x64xbf16, #tpu.memory_space<vmem>>, %arg3: memref<1x64xf32, #tpu.memory_space<vmem>>, %arg4: memref<1024x256xbf16, #tpu.memory_space<vmem>>, %arg5: memref<64x32xbf16, #tpu.memory_space<vmem>>, %arg6: memref<64x256xf32, #tpu.memory_space<vmem>>, %arg7: memref<32x1024xf32, #tpu.memory_space<vmem>>) attributes {dimension_semantics = [#tpu.dimension_semantics<arbitrary>], iteration_bounds = array<i64: 1>, scalar_prefetch = 0 : i64, scratch_operands = 1 : i64, tpu.core_type = #tpu.core_type<tc>, window_params = [{pipeline_mode = #tpu.pipeline_mode<synchronous>, transform_indices = @transform_0, window_bounds = array<i64: 512, 576>}, {pipeline_mode = #tpu.pipeline_mode<synchronous>, transform_indices = @transform_1, window_bounds = array<i64: 576, 64>}, {pipeline_mode = #tpu.pipeline_mode<synchronous>, transform_indices = @transform_2, window_bounds = array<i64: 1, 64>}, {pipeline_mode = #tpu.pipeline_mode<synchronous>, transform_indices = @transform_3, window_bounds = array<i64: 1024, 256>}, {pipeline_mode = #tpu.pipeline_mode<synchronous>, transform_indices = @transform_4, window_bounds = array<i64: 64, 32>}, {pipeline_mode = #tpu.pipeline_mode<synchronous>, transform_indices = @transform_5, window_bounds = array<i64: 64, 256>}]} {
    %c0 = arith.constant 0 : index
    %c0_0 = arith.constant 0 : index
    %0 = vector.load %arg1[%c0, %c0_0] : memref<512x576xbf16, #tpu.memory_space<vmem>>, vector<512x576xbf16>
    %c0_1 = arith.constant 0 : index
    %c0_2 = arith.constant 0 : index
    %1 = vector.load %arg2[%c0_1, %c0_2] : memref<576x64xbf16, #tpu.memory_space<vmem>>, vector<576x64xbf16>
    %cst = arith.constant dense<0.000000e+00> : vector<512x64xf32>
    %2 = tpu.matmul %0, %1, %cst {dimension_numbers = #tpu.dot_dimension_numbers<[1], [0], [0], [1], [0, 0, 1, 1], [], []>} : vector<512x576xbf16>, vector<576x64xbf16>, vector<512x64xf32> -> vector<512x64xf32>
    %c0_3 = arith.constant 0 : index
    %c0_4 = arith.constant 0 : index
    %3 = vector.load %arg3[%c0_3, %c0_4] : memref<1x64xf32, #tpu.memory_space<vmem>>, vector<1x64xf32>
    %4 = vector.broadcast %3 : vector<1x64xf32> to vector<512x64xf32>
    %5 = arith.addf %2, %4 : vector<512x64xf32>
    %cst_5 = arith.constant 0.000000e+00 : f32
    %cst_6 = arith.constant 6.000000e+00 : f32
    %6 = vector.broadcast %cst_5 : f32 to vector<512x64xf32>
    %7 = arith.maximumf %6, %5 : vector<512x64xf32>
    %8 = vector.broadcast %cst_6 : f32 to vector<512x64xf32>
    %9 = arith.minimumf %8, %7 : vector<512x64xf32>
    %10 = vector.shape_cast %9 : vector<512x64xf32> to vector<32x16x64xf32>
    %11 = vector.extract_strided_slice %10 {offsets = [0, 0, 0], sizes = [32, 1, 64], strides = [1, 1, 1]} : vector<32x16x64xf32> to vector<32x1x64xf32>
    %12 = vector.shape_cast %11 : vector<32x1x64xf32> to vector<32x64xf32>
    %c0_7 = arith.constant 0 : index
    %c0_8 = arith.constant 0 : index
    %13 = vector.load %arg7[%c0_7, %c0_8] : memref<32x1024xf32, #tpu.memory_space<vmem>>, vector<32x64xf32>
    tpu.vector_store %arg7[%c0_7, %c0_8], %12 {strides = array<i32>} : memref<32x1024xf32, #tpu.memory_space<vmem>>, vector<32x64xf32>,
    %14 = vector.extract_strided_slice %10 {offsets = [0, 1, 0], sizes = [32, 1, 64], strides = [1, 1, 1]} : vector<32x16x64xf32> to vector<32x1x64xf32>
    %15 = vector.shape_cast %14 : vector<32x1x64xf32> to vector<32x64xf32>
    %c0_9 = arith.constant 0 : index
    %c64 = arith.constant 64 : index
    %16 = vector.load %arg7[%c0_9, %c64] : memref<32x1024xf32, #tpu.memory_space<vmem>>, vector<32x64xf32>
    tpu.vector_store %arg7[%c0_9, %c64], %15 {strides = array<i32>} : memref<32x1024xf32, #tpu.memory_space<vmem>>, vector<32x64xf32>,
    %17 = vector.extract_strided_slice %10 {offsets = [0, 2, 0], sizes = [32, 1, 64], strides = [1, 1, 1]} : vector<32x16x64xf32> to vector<32x1x64xf32>
    %18 = vector.shape_cast %17 : vector<32x1x64xf32> to vector<32x64xf32>
    %c0_10 = arith.constant 0 : index
    %c128 = arith.constant 128 : index
    %19 = vector.load %arg7[%c0_10, %c128] : memref<32x1024xf32, #tpu.memory_space<vmem>>, vector<32x64xf32>
    tpu.vector_store %arg7[%c0_10, %c128], %18 {strides = array<i32>} : memref<32x1024xf32, #tpu.memory_space<vmem>>, vector<32x64xf32>,
    %20 = vector.extract_strided_slice %10 {offsets = [0, 3, 0], sizes = [32, 1, 64], strides = [1, 1, 1]} : vector<32x16x64xf32> to vector<32x1x64xf32>
    %21 = vector.shape_cast %20 : vector<32x1x64xf32> to vector<32x64xf32>
    %c0_11 = arith.constant 0 : index
    %c192 = arith.constant 192 : index
    %22 = vector.load %arg7[%c0_11, %c192] : memref<32x1024xf32, #tpu.memory_space<vmem>>, vector<32x64xf32>
    tpu.vector_store %arg7[%c0_11, %c192], %21 {strides = array<i32>} : memref<32x1024xf32, #tpu.memory_space<vmem>>, vector<32x64xf32>,
    %23 = vector.extract_strided_slice %10 {offsets = [0, 4, 0], sizes = [32, 1, 64], strides = [1, 1, 1]} : vector<32x16x64xf32> to vector<32x1x64xf32>
    %24 = vector.shape_cast %23 : vector<32x1x64xf32> to vector<32x64xf32>
    %c0_12 = arith.constant 0 : index
    %c256 = arith.constant 256 : index
    %25 = vector.load %arg7[%c0_12, %c256] : memref<32x1024xf32, #tpu.memory_space<vmem>>, vector<32x64xf32>
    tpu.vector_store %arg7[%c0_12, %c256], %24 {strides = array<i32>} : memref<32x1024xf32, #tpu.memory_space<vmem>>, vector<32x64xf32>,
    %26 = vector.extract_strided_slice %10 {offsets = [0, 5, 0], sizes = [32, 1, 64], strides = [1, 1, 1]} : vector<32x16x64xf32> to vector<32x1x64xf32>
    %27 = vector.shape_cast %26 : vector<32x1x64xf32> to vector<32x64xf32>
    %c0_13 = arith.constant 0 : index
    %c320 = arith.constant 320 : index
    %28 = vector.load %arg7[%c0_13, %c320] : memref<32x1024xf32, #tpu.memory_space<vmem>>, vector<32x64xf32>
    tpu.vector_store %arg7[%c0_13, %c320], %27 {strides = array<i32>} : memref<32x1024xf32, #tpu.memory_space<vmem>>, vector<32x64xf32>,
    %29 = vector.extract_strided_slice %10 {offsets = [0, 6, 0], sizes = [32, 1, 64], strides = [1, 1, 1]} : vector<32x16x64xf32> to vector<32x1x64xf32>
    %30 = vector.shape_cast %29 : vector<32x1x64xf32> to vector<32x64xf32>
    %c0_14 = arith.constant 0 : index
    %c384 = arith.constant 384 : index
    %31 = vector.load %arg7[%c0_14, %c384] : memref<32x1024xf32, #tpu.memory_space<vmem>>, vector<32x64xf32>
    tpu.vector_store %arg7[%c0_14, %c384], %30 {strides = array<i32>} : memref<32x1024xf32, #tpu.memory_space<vmem>>, vector<32x64xf32>,
    %32 = vector.extract_strided_slice %10 {offsets = [0, 7, 0], sizes = [32, 1, 64], strides = [1, 1, 1]} : vector<32x16x64xf32> to vector<32x1x64xf32>
    %33 = vector.shape_cast %32 : vector<32x1x64xf32> to vector<32x64xf32>
    %c0_15 = arith.constant 0 : index
    %c448 = arith.constant 448 : index
    %34 = vector.load %arg7[%c0_15, %c448] : memref<32x1024xf32, #tpu.memory_space<vmem>>, vector<32x64xf32>
    tpu.vector_store %arg7[%c0_15, %c448], %33 {strides = array<i32>} : memref<32x1024xf32, #tpu.memory_space<vmem>>, vector<32x64xf32>,
    %35 = vector.extract_strided_slice %10 {offsets = [0, 8, 0], sizes = [32, 1, 64], strides = [1, 1, 1]} : vector<32x16x64xf32> to vector<32x1x64xf32>
    %36 = vector.shape_cast %35 : vector<32x1x64xf32> to vector<32x64xf32>
    %c0_16 = arith.constant 0 : index
    %c512 = arith.constant 512 : index
    %37 = vector.load %arg7[%c0_16, %c512] : memref<32x1024xf32, #tpu.memory_space<vmem>>, vector<32x64xf32>
    tpu.vector_store %arg7[%c0_16, %c512], %36 {strides = array<i32>} : memref<32x1024xf32, #tpu.memory_space<vmem>>, vector<32x64xf32>,
    %38 = vector.extract_strided_slice %10 {offsets = [0, 9, 0], sizes = [32, 1, 64], strides = [1, 1, 1]} : vector<32x16x64xf32> to vector<32x1x64xf32>
    %39 = vector.shape_cast %38 : vector<32x1x64xf32> to vector<32x64xf32>
    %c0_17 = arith.constant 0 : index
    %c576 = arith.constant 576 : index
    %40 = vector.load %arg7[%c0_17, %c576] : memref<32x1024xf32, #tpu.memory_space<vmem>>, vector<32x64xf32>
    tpu.vector_store %arg7[%c0_17, %c576], %39 {strides = array<i32>} : memref<32x1024xf32, #tpu.memory_space<vmem>>, vector<32x64xf32>,
    %41 = vector.extract_strided_slice %10 {offsets = [0, 10, 0], sizes = [32, 1, 64], strides = [1, 1, 1]} : vector<32x16x64xf32> to vector<32x1x64xf32>
    %42 = vector.shape_cast %41 : vector<32x1x64xf32> to vector<32x64xf32>
    %c0_18 = arith.constant 0 : index
    %c640 = arith.constant 640 : index
    %43 = vector.load %arg7[%c0_18, %c640] : memref<32x1024xf32, #tpu.memory_space<vmem>>, vector<32x64xf32>
    tpu.vector_store %arg7[%c0_18, %c640], %42 {strides = array<i32>} : memref<32x1024xf32, #tpu.memory_space<vmem>>, vector<32x64xf32>,
    %44 = vector.extract_strided_slice %10 {offsets = [0, 11, 0], sizes = [32, 1, 64], strides = [1, 1, 1]} : vector<32x16x64xf32> to vector<32x1x64xf32>
    %45 = vector.shape_cast %44 : vector<32x1x64xf32> to vector<32x64xf32>
    %c0_19 = arith.constant 0 : index
    %c704 = arith.constant 704 : index
    %46 = vector.load %arg7[%c0_19, %c704] : memref<32x1024xf32, #tpu.memory_space<vmem>>, vector<32x64xf32>
    tpu.vector_store %arg7[%c0_19, %c704], %45 {strides = array<i32>} : memref<32x1024xf32, #tpu.memory_space<vmem>>, vector<32x64xf32>,
    %47 = vector.extract_strided_slice %10 {offsets = [0, 12, 0], sizes = [32, 1, 64], strides = [1, 1, 1]} : vector<32x16x64xf32> to vector<32x1x64xf32>
    %48 = vector.shape_cast %47 : vector<32x1x64xf32> to vector<32x64xf32>
    %c0_20 = arith.constant 0 : index
    %c768 = arith.constant 768 : index
    %49 = vector.load %arg7[%c0_20, %c768] : memref<32x1024xf32, #tpu.memory_space<vmem>>, vector<32x64xf32>
    tpu.vector_store %arg7[%c0_20, %c768], %48 {strides = array<i32>} : memref<32x1024xf32, #tpu.memory_space<vmem>>, vector<32x64xf32>,
    %50 = vector.extract_strided_slice %10 {offsets = [0, 13, 0], sizes = [32, 1, 64], strides = [1, 1, 1]} : vector<32x16x64xf32> to vector<32x1x64xf32>
    %51 = vector.shape_cast %50 : vector<32x1x64xf32> to vector<32x64xf32>
    %c0_21 = arith.constant 0 : index
    %c832 = arith.constant 832 : index
    %52 = vector.load %arg7[%c0_21, %c832] : memref<32x1024xf32, #tpu.memory_space<vmem>>, vector<32x64xf32>
    tpu.vector_store %arg7[%c0_21, %c832], %51 {strides = array<i32>} : memref<32x1024xf32, #tpu.memory_space<vmem>>, vector<32x64xf32>,
    %53 = vector.extract_strided_slice %10 {offsets = [0, 14, 0], sizes = [32, 1, 64], strides = [1, 1, 1]} : vector<32x16x64xf32> to vector<32x1x64xf32>
    %54 = vector.shape_cast %53 : vector<32x1x64xf32> to vector<32x64xf32>
    %c0_22 = arith.constant 0 : index
    %c896 = arith.constant 896 : index
    %55 = vector.load %arg7[%c0_22, %c896] : memref<32x1024xf32, #tpu.memory_space<vmem>>, vector<32x64xf32>
    tpu.vector_store %arg7[%c0_22, %c896], %54 {strides = array<i32>} : memref<32x1024xf32, #tpu.memory_space<vmem>>, vector<32x64xf32>,
    %56 = vector.extract_strided_slice %10 {offsets = [0, 15, 0], sizes = [32, 1, 64], strides = [1, 1, 1]} : vector<32x16x64xf32> to vector<32x1x64xf32>
    %57 = vector.shape_cast %56 : vector<32x1x64xf32> to vector<32x64xf32>
    %c0_23 = arith.constant 0 : index
    %c960 = arith.constant 960 : index
    %58 = vector.load %arg7[%c0_23, %c960] : memref<32x1024xf32, #tpu.memory_space<vmem>>, vector<32x64xf32>
    tpu.vector_store %arg7[%c0_23, %c960], %57 {strides = array<i32>} : memref<32x1024xf32, #tpu.memory_space<vmem>>, vector<32x64xf32>,
    %c0_24 = arith.constant 0 : index
    %c0_25 = arith.constant 0 : index
    %59 = vector.load %arg7[%c0_24, %c0_25] : memref<32x1024xf32, #tpu.memory_space<vmem>>, vector<32x1024xf32>
    %60 = arith.truncf %59 : vector<32x1024xf32> to vector<32x1024xbf16>
    %c0_26 = arith.constant 0 : index
    %c0_27 = arith.constant 0 : index
    %61 = vector.load %arg4[%c0_26, %c0_27] : memref<1024x256xbf16, #tpu.memory_space<vmem>>, vector<1024x256xbf16>
    %cst_28 = arith.constant dense<0.000000e+00> : vector<32x256xf32>
    %62 = tpu.matmul %60, %61, %cst_28 {dimension_numbers = #tpu.dot_dimension_numbers<[1], [0], [0], [1], [0, 0, 1, 1], [], []>} : vector<32x1024xbf16>, vector<1024x256xbf16>, vector<32x256xf32> -> vector<32x256xf32>
    %c0_29 = arith.constant 0 : index
    %c0_30 = arith.constant 0 : index
    %63 = vector.load %arg5[%c0_29, %c0_30] : memref<64x32xbf16, #tpu.memory_space<vmem>>, vector<64x32xbf16>
    %64 = arith.truncf %62 : vector<32x256xf32> to vector<32x256xbf16>
    %cst_31 = arith.constant dense<0.000000e+00> : vector<64x256xf32>
    %65 = tpu.matmul %63, %64, %cst_31 {dimension_numbers = #tpu.dot_dimension_numbers<[1], [0], [0], [1], [0, 0, 1, 1], [], []>} : vector<64x32xbf16>, vector<32x256xbf16>, vector<64x256xf32> -> vector<64x256xf32>
    %c0_32 = arith.constant 0 : index
    %c0_33 = arith.constant 0 : index
    %66 = vector.load %arg6[%c0_32, %c0_33] : memref<64x256xf32, #tpu.memory_space<vmem>>, vector<64x256xf32>
    tpu.vector_store %arg6[%c0_32, %c0_33], %65 {strides = array<i32>} : memref<64x256xf32, #tpu.memory_space<vmem>>, vector<64x256xf32>,
    return
  }
  func.func @transform_0(%arg0: i32) -> (i32, i32) {
    %c0_i32 = arith.constant 0 : i32
    %c0_i32_0 = arith.constant 0 : i32
    %c0_i32_1 = arith.constant 0 : i32
    return %c0_i32, %c0_i32_0 : i32, i32
  }
  func.func @transform_1(%arg0: i32) -> (i32, i32) {
    %c0_i32 = arith.constant 0 : i32
    %c0_i32_0 = arith.constant 0 : i32
    %c0_i32_1 = arith.constant 0 : i32
    return %c0_i32, %c0_i32_0 : i32, i32
  }
  func.func @transform_2(%arg0: i32) -> (i32, i32) {
    %c0_i32 = arith.constant 0 : i32
    %c0_i32_0 = arith.constant 0 : i32
    %c0_i32_1 = arith.constant 0 : i32
    return %c0_i32, %c0_i32_0 : i32, i32
  }
  func.func @transform_3(%arg0: i32) -> (i32, i32) {
    %c0_i32 = arith.constant 0 : i32
    %c0_i32_0 = arith.constant 0 : i32
    %c0_i32_1 = arith.constant 0 : i32
    return %c0_i32, %c0_i32_0 : i32, i32
  }
  func.func @transform_4(%arg0: i32) -> (i32, i32) {
    %c0_i32 = arith.constant 0 : i32
    %c0_i32_0 = arith.constant 0 : i32
    %c0_i32_1 = arith.constant 0 : i32
    return %c0_i32, %c0_i32_0 : i32, i32
  }
  func.func @transform_5(%arg0: i32) -> (i32, i32) {
    %c0_i32 = arith.constant 0 : i32
    %c0_i32_0 = arith.constant 0 : i32
    %c0_i32_1 = arith.constant 0 : i32
    return %c0_i32, %c0_i32_0 : i32, i32
  }
}

</mosaic_0001>

<bundles_post_ra>
// kernel: tpu_custom_call.1
= control target key start
LH: loop header
LB: loop body
LE: loop exit
PB: predicated region body
PF: predicated region fallthrough
CT: control target
= control target key end

     0   :  { %v8695_v1 = vmov 0   ;;  %vm1309_vm0 = vcmask 523264   ;;  %s8689_s0 = inlined_call_operand.vmem [shape: bf16[512,576], index: 0, kind: input, shape index: {}]   ;;  %s8690_s1 = inlined_call_operand.vmem [shape: bf16[576,64], index: 1, kind: input, shape index: {}]   ;;  %s8691_s2 = inlined_call_operand.vmem [shape: f32[1,64], index: 2, kind: input, shape index: {}]   ;;  %s8692_s3 = inlined_call_operand.vmem [shape: bf16[1024,256], index: 3, kind: input, shape index: {}]   ;;  %s8693_s4 = inlined_call_operand.vmem [shape: bf16[64,32], index: 4, kind: input, shape index: {}]   ;;  %s8694_s5 = inlined_call_operand.hbm [shape: f32[64,256], index: 5, kind: output, shape index: {}]  }
   0x1   :  { %v5447_v0 = vld [vmem:[%s8690_s1] sm:$0xff]   ;;  %1406 = vmatprep.subr.bf16.mxu0 %v8695_v1  ;;  %5212 = vmatprep.subr.bf16.mxu1 %v8695_v1  ;;  %v5448_v2 = vld [vmem:[%s8690_s1 + $0x8] sm:$0xff]   ;;  %v5449_v3 = vld [vmem:[%s8690_s1 + $0x10] sm:$0xff]  }
   0x2   :  { %1407 = vmatpush1.bf16.msra.mxu0 %v5447_v0  ;;  %5228 = vmatpush1.bf16.msra.mxu1 %v5447_v0  ;;  %v5450_v4 = vld [vmem:[%s8690_s1 + $0x18] sm:$0xff]   ;;  %v5451_v5 = vld [vmem:[%s8690_s1 + $0x20] sm:$0xff]   ;;  %v5452_v7 = vld [vmem:[%s8690_s1 + $0x28] sm:$0xff]  }
   0x3   :  { %1408 = vmatprep.subr.bf16.mxu0 %v8695_v1  ;;  %5213 = vmatprep.subr.bf16.mxu1 %v8695_v1  ;;  %v5465_v6 = vld [vmem:[%s8689_s0 + $0x4] ss:$20 sps:$4 sm:$0xff]   ;;  %v5453_v8 = vld [vmem:[%s8690_s1 + $0x30] sm:$0xff]   ;;  %v5456_v11 = vld [vmem:[%s8690_s1 + $0x48] sm:$0xff]  }
   0x4   :  { %1438 = vmatprep.mubr.bf16.mxu0 %v5465_v6  ;;  %v5454_v9 = vld [vmem:[%s8690_s1 + $0x38] sm:$0xff]   ;;  %v5455_v10 = vld [vmem:[%s8690_s1 + $0x40] sm:$0xff]   ;;  %v5457_v12 = vld [vmem:[%s8690_s1 + $0x50] sm:$0xff]  }
   0x5   :  { %v5458_v13 = vld [vmem:[%s8690_s1 + $0x58] sm:$0xff]   ;;  %v5459_v14 = vld [vmem:[%s8690_s1 + $0x60] sm:$0xff]   ;;  %v5460_v16 = vld [vmem:[%s8690_s1 + $0x68] sm:$0xff]  }
   0x6   :  { %1409 = vmatpush1.bf16.msra.mxu0 %v5448_v2  ;;  %5229 = vmatpush1.bf16.msra.mxu1 %v5448_v2  ;;  %v5520_v15 = vld [vmem:[%s8689_s0 + $0x39c] ss:$20 sps:$4 sm:$0xff]   ;;  %v5463_v19 = vld [vmem:[%s8689_s0] ss:$20 sps:$4 sm:$0xff]   ;;  %v5518_v20 = vld [vmem:[%s8689_s0 + $0x398] ss:$20 sps:$4 sm:$0xff]  }
   0x7   :  { %1410 = vmatprep.subr.bf16.mxu0 %v8695_v1  ;;  %5214 = vmatprep.subr.bf16.mxu1 %v8695_v1  ;;  %v5461_v17 = vld [vmem:[%s8690_s1 + $0x70] sm:$0xff]   ;;  %v5462_v18 = vld [vmem:[%s8690_s1 + $0x78] sm:$0xff]   ;;  %v5466_v21 = vld [vmem:[%s8690_s1 + $0x80] sm:$0xff]  }
   0x8   :  { %1622 = vmatprep.mubr.bf16.mxu1 %v5520_v15  ;;  %v5467_v22 = vld [vmem:[%s8689_s0 + $0x2c] ss:$20 sps:$4 sm:$0xff]   ;;  %v5524_v23 = vld [vmem:[%s8689_s0 + $0x3c4] ss:$20 sps:$4 sm:$0xff]   ;;  %v5469_v25 = vld [vmem:[%s8689_s0 + $0x28] ss:$20 sps:$4 sm:$0xff]  }
   0x9   :  { %v5473_v24 = vld [vmem:[%s8690_s1 + $0x88] sm:$0xff]   ;;  %v5527_v26 = vld [vmem:[%s8689_s0 + $0x3c0] ss:$20 sps:$4 sm:$0xff]   ;;  %v5484_v30 = vld [vmem:[%s8690_s1 + $0x98] sm:$0xff]  }
   0xa   :  { %1411 = vmatpush1.bf16.msra.mxu0 %v5449_v3  ;;  %5230 = vmatpush1.bf16.msra.mxu1 %v5449_v3  ;;  %v5470_v27 = vld [vmem:[%s8689_s0 + $0x54] ss:$20 sps:$4 sm:$0xff]   ;;  %v5531_v29 = vld [vmem:[%s8689_s0 + $0x3ec] ss:$20 sps:$4 sm:$0xff]   ;;  %v5472_v31 = vld [vmem:[%s8689_s0 + $0x50] ss:$20 sps:$4 sm:$0xff]  }
   0xb   :  { %1412 = vmatprep.subr.bf16.mxu0 %v8695_v1  ;;  %5215 = vmatprep.subr.bf16.mxu1 %v8695_v1  ;;  %v5477_v28 = vld [vmem:[%s8690_s1 + $0x90] sm:$0xff]   ;;  %v5533_v32 = vld [vmem:[%s8689_s0 + $0x3e8] ss:$20 sps:$4 sm:$0xff]   ;;  %v5488_v34 = vld [vmem:[%s8690_s1 + $0xa0] sm:$0xff]  }
   0xc   :  { %v5474_v33 = vld [vmem:[%s8689_s0 + $0x7c] ss:$20 sps:$4 sm:$0xff]   ;;  %v5538_v35 = vld [vmem:[%s8689_s0 + $0x414] ss:$20 sps:$4 sm:$0xff]   ;;  %v5476_v37 = vld [vmem:[%s8689_s0 + $0x78] ss:$20 sps:$4 sm:$0xff]  }
   0xd   :  { %v5494_v36 = vld [vmem:[%s8690_s1 + $0xa8] sm:$0xff]   ;;  %v5540_v38 = vld [vmem:[%s8689_s0 + $0x410] ss:$20 sps:$4 sm:$0xff]   ;;  %v5503_v42 = vld [vmem:[%s8690_s1 + $0xb8] sm:$0xff]  }
   0xe   :  { %1413 = vmatpush1.bf16.msra.mxu0 %v5450_v4  ;;  %5231 = vmatpush1.bf16.msra.mxu1 %v5450_v4  ;;  %v5478_v39 = vld [vmem:[%s8689_s0 + $0xa4] ss:$20 sps:$4 sm:$0xff]   ;;  %v5499_v40 = vld [vmem:[%s8690_s1 + $0xb0] sm:$0xff]   ;;  %v5481_v45 = vld [vmem:[%s8689_s0 + $0xcc] ss:$20 sps:$4 sm:$0xff]  }
   0xf   :  { %1414 = vmatprep.subr.bf16.mxu0 %v8695_v1  ;;  %5216 = vmatprep.subr.bf16.mxu1 %v8695_v1  ;;  %v5545_v41 = vld [vmem:[%s8689_s0 + $0x43c] ss:$20 sps:$4 sm:$0xff]   ;;  %v5480_v43 = vld [vmem:[%s8689_s0 + $0xa0] ss:$20 sps:$4 sm:$0xff]   ;;  %v5547_v44 = vld [vmem:[%s8689_s0 + $0x438] ss:$20 sps:$4 sm:$0xff]  }
  0x10   :  { %v5510_v46 = vld [vmem:[%s8690_s1 + $0xc0] sm:$0xff]   ;;  %v5514_v48 = vld [vmem:[%s8690_s1 + $0xc8] sm:$0xff]   ;;  %v5526_v52 = vld [vmem:[%s8690_s1 + $0xd0] sm:$0xff]  }
  0x11   :  { %v5551_v47 = vld [vmem:[%s8689_s0 + $0x464] ss:$20 sps:$4 sm:$0xff]   ;;  %v5483_v49 = vld [vmem:[%s8689_s0 + $0xc8] ss:$20 sps:$4 sm:$0xff]   ;;  %v5553_v50 = vld [vmem:[%s8689_s0 + $0x460] ss:$20 sps:$4 sm:$0xff]  }
  0x12   :  { %1415 = vmatpush1.bf16.msra.mxu0 %v5451_v5  ;;  %5232 = vmatpush1.bf16.msra.mxu1 %v5451_v5  ;;  %v5485_v51 = vld [vmem:[%s8689_s0 + $0xf4] ss:$20 sps:$4 sm:$0xff]   ;;  %v5558_v53 = vld [vmem:[%s8689_s0 + $0x48c] ss:$20 sps:$4 sm:$0xff]   ;;  %v5534_v55 = vld [vmem:[%s8690_s1 + $0xd8] sm:$0xff]  }
  0x13   :  { %1416 = vmatprep.subr.bf16.mxu0 %v8695_v1  ;;  %5217 = vmatprep.subr.bf16.mxu1 %v8695_v1  ;;  %v5568_v54 = vld [vmem:[%s8690_s1 + $0x100] sm:$0xff]   ;;  %v5569_v56 = vld [vmem:[%s8690_s1 + $0x108] sm:$0xff]   ;;  %v5489_v59 = vld [vmem:[%s8689_s0 + $0x11c] ss:$20 sps:$4 sm:$0xff]  }
  0x14   :  { %v5487_v57 = vld [vmem:[%s8689_s0 + $0xf0] ss:$20 sps:$4 sm:$0xff]   ;;  %v5560_v58 = vld [vmem:[%s8689_s0 + $0x488] ss:$20 sps:$4 sm:$0xff]   ;;  %v5491_v0 = vld [vmem:[%s8689_s0 + $0x118] ss:$20 sps:$4 sm:$0xff]  }
  0x15   :  { %v5543_v60 = vld [vmem:[%s8690_s1 + $0xe0] sm:$0xff]   ;;  %v5565_v61 = vld [vmem:[%s8689_s0 + $0x4b4] ss:$20 sps:$4 sm:$0xff]   ;;  %v5573_v5 = vld [vmem:[%s8689_s0 + $0x4dc] ss:$20 sps:$4 sm:$0xff]  }
  0x16   :  { %1417 = vmatpush1.bf16.msra.mxu0 %v5452_v7  ;;  %5233 = vmatpush1.bf16.msra.mxu1 %v5452_v7  ;;  %v5576_v62 = vld [vmem:[%s8690_s1 + $0x110] sm:$0xff]   ;;  %v5554_v63 = vld [vmem:[%s8690_s1 + $0xe8] sm:$0xff]   ;;  %v5492_v3 = vld [vmem:[%s8689_s0 + $0x144] ss:$20 sps:$4 sm:$0xff]  }
  0x17   :  { %1418 = vmatprep.subr.bf16.mxu0 %v8695_v1  ;;  %5218 = vmatprep.subr.bf16.mxu1 %v8695_v1  ;;  %v5567_v2 = vld [vmem:[%s8689_s0 + $0x4b0] ss:$20 sps:$4 sm:$0xff]   ;;  %v5578_v6 = vld [vmem:[%s8690_s1 + $0x118] sm:$0xff]   ;;  %v5590_v15 = vld [vmem:[%s8689_s0 + $0x60] ss:$20 sps:$4 sm:$0xff]  }
  0x18   :  { %v5561_v4 = vld [vmem:[%s8690_s1 + $0xf0] sm:$0xff]   ;;  %v5577_v7 = vld [vmem:[%s8690_s1 + $0xf8] sm:$0xff]  }
  0x1a   :  { %1419 = vmatpush1.bf16.msra.mxu0 %v5453_v8  ;;  %5234 = vmatpush1.bf16.msra.mxu1 %v5453_v8  ;;  %v5495_v8 = vld [vmem:[%s8689_s0 + $0x140] ss:$20 sps:$4 sm:$0xff]  }
  0x1b   :  { %1420 = vmatprep.subr.bf16.mxu0 %v8695_v1  ;;  %5219 = vmatprep.subr.bf16.mxu1 %v8695_v1 }
  0x1e   :  { %1421 = vmatpush1.bf16.msra.mxu0 %v5454_v9  ;;  %5235 = vmatpush1.bf16.msra.mxu1 %v5454_v9  ;;  %v5575_v9 = vld [vmem:[%s8689_s0 + $0x4d8] ss:$20 sps:$4 sm:$0xff]  }
  0x1f   :  { %1422 = vmatprep.subr.bf16.mxu0 %v8695_v1  ;;  %5220 = vmatprep.subr.bf16.mxu1 %v8695_v1 }
  0x22   :  { %1423 = vmatpush1.bf16.msra.mxu0 %v5455_v10  ;;  %5236 = vmatpush1.bf16.msra.mxu1 %v5455_v10  ;;  %v5496_v10 = vld [vmem:[%s8689_s0 + $0x16c] ss:$20 sps:$4 sm:$0xff]  }
  0x23   :  { %1424 = vmatprep.subr.bf16.mxu0 %v8695_v1  ;;  %5221 = vmatprep.subr.bf16.mxu1 %v8695_v1 }
  0x26   :  { %1425 = vmatpush1.bf16.msra.mxu0 %v5456_v11  ;;  %5237 = vmatpush1.bf16.msra.mxu1 %v5456_v11  ;;  %v5582_v11 = vld [vmem:[%s8689_s0 + $0x10] ss:$20 sps:$4 sm:$0xff]  }
  0x27   :  { %1426 = vmatprep.subr.bf16.mxu0 %v8695_v1  ;;  %5222 = vmatprep.subr.bf16.mxu1 %v8695_v1 }
  0x2a   :  { %1427 = vmatpush1.bf16.msra.mxu0 %v5457_v12  ;;  %5238 = vmatpush1.bf16.msra.mxu1 %v5457_v12  ;;  %v5498_v12 = vld [vmem:[%s8689_s0 + $0x168] ss:$20 sps:$4 sm:$0xff]  }
  0x2b   :  { %1428 = vmatprep.subr.bf16.mxu0 %v8695_v1  ;;  %5223 = vmatprep.subr.bf16.mxu1 %v8695_v1 }
  0x2e   :  { %1429 = vmatpush1.bf16.msra.mxu0 %v5458_v13  ;;  %5239 = vmatpush1.bf16.msra.mxu1 %v5458_v13  ;;  %v5583_v13 = vld [vmem:[%s8689_s0 + $0x38] ss:$20 sps:$4 sm:$0xff]  }
  0x2f   :  { %1430 = vmatprep.subr.bf16.mxu0 %v8695_v1  ;;  %5224 = vmatprep.subr.bf16.mxu1 %v8695_v1 }
  0x32   :  { %1431 = vmatpush1.bf16.msra.mxu0 %v5459_v14  ;;  %5240 = vmatpush1.bf16.msra.mxu1 %v5459_v14  ;;  %v5500_v14 = vld [vmem:[%s8689_s0 + $0x194] ss:$20 sps:$4 sm:$0xff]  }
  0x33   :  { %1432 = vmatprep.subr.bf16.mxu0 %v8695_v1  ;;  %5225 = vmatprep.subr.bf16.mxu1 %v8695_v1 }
  0x36   :  { %1433 = vmatpush1.bf16.msra.mxu0 %v5460_v16  ;;  %5241 = vmatpush1.bf16.msra.mxu1 %v5460_v16  ;;  %v5502_v16 = vld [vmem:[%s8689_s0 + $0x190] ss:$20 sps:$4 sm:$0xff]  }
  0x37   :  { %1434 = vmatprep.subr.bf16.mxu0 %v8695_v1  ;;  %5226 = vmatprep.subr.bf16.mxu1 %v8695_v1 }
  0x3a   :  { %1435 = vmatpush1.bf16.msra.mxu0 %v5461_v17  ;;  %5242 = vmatpush1.bf16.msra.mxu1 %v5461_v17  ;;  %v5591_v17 = vld [vmem:[%s8689_s0 + $0x88] ss:$20 sps:$4 sm:$0xff]  }
  0x3b   :  { %1436 = vmatprep.subr.bf16.mxu0 %v8695_v1  ;;  %5227 = vmatprep.subr.bf16.mxu1 %v8695_v1 }
  0x3e   :  { %1437 = vmatpush1.bf16.msra.mxu0 %v5462_v18  ;;  %5243 = vmatpush1.bf16.msra.mxu1 %v5462_v18  ;;  %v5504_v18 = vld [vmem:[%s8689_s0 + $0x1bc] ss:$20 sps:$4 sm:$0xff]  }
  0x3f   :  { %1695 = vmatprep.subr.bf16.mxu0 %v8695_v1  ;;  %5140 = vmatprep.subr.bf16.mxu1 %v5568_v54 }
  0x41   :  { %1439 = vmatmul.mubr.bf16.vlgmr.msra.gmra.mrb[0].mxu0 %v5463_v19  ;;  %1623 = vmatmul.mubr.bf16.vlgmr.msra.gmra.mrb[0].mxu1 %v5518_v20  ;;  %v5506_v19 = vld [vmem:[%s8689_s0 + $0x1b8] ss:$20 sps:$4 sm:$0xff]  }
  0x42   :  { %1696 = vmatpush1.bf16.msra.mxu0 %v5466_v21  ;;  %1446 = vmatprep.mubr.bf16.mxu0 %v5467_v22  ;;  %v5507_v20 = vld [vmem:[%s8689_s0 + $0x1e4] ss:$20 sps:$4 sm:$0xff]  }
  0x43   :  { %1697 = vmatprep.subr.bf16.mxu0 %v8695_v1  ;;  %1630 = vmatprep.mubr.bf16.mxu1 %v5524_v23  ;;  %v5598_v21 = vld [vmem:[%s8689_s0 + $0xb0] ss:$20 sps:$4 sm:$0xff]   ;;  %v5599_v22 = vld [vmem:[%s8689_s0 + $0xd8] ss:$20 sps:$4 sm:$0xff]   ;;  %v5509_v23 = vld [vmem:[%s8689_s0 + $0x1e0] ss:$20 sps:$4 sm:$0xff]  }
  0x44   :  { %5141 = vmatpush3.bf16.msra.mxu1 %v5568_v54 }
  0x45   :  { %5142 = vmatprep.subr.bf16.mxu1 %v5569_v56 }
  0x46   :  { %1698 = vmatpush1.bf16.msra.mxu0 %v5473_v24  ;;  %v5511_v24 = vld [vmem:[%s8689_s0 + $0x20c] ss:$20 sps:$4 sm:$0xff]  }
  0x47   :  { %1699 = vmatprep.subr.bf16.mxu0 %v8695_v1 }
  0x48   :  { %5143 = vmatpush3.bf16.msra.mxu1 %v5569_v56 }
  0x49   :  { %1447 = vmatmul.mubr.bf16.gmra.mrb[4].mxu0 %v5469_v25  ;;  %1631 = vmatmul.mubr.bf16.gmra.mrb[4].mxu1 %v5527_v26  ;;  %v5513_v25 = vld [vmem:[%s8689_s0 + $0x208] ss:$20 sps:$4 sm:$0xff]  }
  0x4a   :  { %1454 = vmatprep.mubr.bf16.mxu0 %v5470_v27  ;;  %1700 = vmatpush1.bf16.msra.mxu0 %v5477_v28  ;;  %v5515_v26 = vld [vmem:[%s8689_s0 + $0x234] ss:$20 sps:$4 sm:$0xff]  }
  0x4b   :  { %1701 = vmatprep.subr.bf16.mxu0 %v8695_v1  ;;  %1638 = vmatprep.mubr.bf16.mxu1 %v5531_v29  ;;  %v5606_v27 = vld [vmem:[%s8689_s0 + $0x100] ss:$20 sps:$4 sm:$0xff]   ;;  %v5607_v28 = vld [vmem:[%s8689_s0 + $0x128] ss:$20 sps:$4 sm:$0xff]   ;;  %v5517_v29 = vld [vmem:[%s8689_s0 + $0x230] ss:$20 sps:$4 sm:$0xff]  }
  0x4c   :  { %5144 = vmatprep.subr.bf16.mxu1 %v5576_v62 }
  0x4d   :  { %5145 = vmatpush3.bf16.msra.mxu1 %v5576_v62 }
  0x4e   :  { %1702 = vmatpush1.bf16.msra.mxu0 %v5484_v30  ;;  %5146 = vmatprep.subr.bf16.mxu1 %v5578_v6  ;;  %v5521_v30 = vld [vmem:[%s8689_s0 + $0x25c] ss:$20 sps:$4 sm:$0xff]  }
  0x4f   :  { %1703 = vmatprep.subr.bf16.mxu0 %v8695_v1 }
  0x51   :  { %1455 = vmatmul.mubr.bf16.gmra.mrb[8].mxu0 %v5472_v31  ;;  %1639 = vmatmul.mubr.bf16.gmra.mrb[8].mxu1 %v5533_v32 }
  0x52   :  { %1462 = vmatprep.mubr.bf16.mxu0 %v5474_v33  ;;  %1704 = vmatpush1.bf16.msra.mxu0 %v5488_v34 }
  0x53   :  { %1705 = vmatprep.subr.bf16.mxu0 %v8695_v1  ;;  %1646 = vmatprep.mubr.bf16.mxu1 %v5538_v35 }
  0x54   :  { %5147 = vmatpush3.bf16.msra.mxu1 %v5578_v6 }
  0x56   :  { %1706 = vmatpush1.bf16.msra.mxu0 %v5494_v36 }
  0x57   :  { %1707 = vmatprep.subr.bf16.mxu0 %v8695_v1 }
  0x59   :  { %1463 = vmatmul.mubr.bf16.gmra.mrb[12].mxu0 %v5476_v37  ;;  %1647 = vmatmul.mubr.bf16.gmra.mrb[12].mxu1 %v5540_v38 }
  0x5a   :  { %1470 = vmatprep.mubr.bf16.mxu0 %v5478_v39  ;;  %1708 = vmatpush1.bf16.msra.mxu0 %v5499_v40 }
  0x5b   :  { %1709 = vmatprep.subr.bf16.mxu0 %v8695_v1  ;;  %1654 = vmatprep.mubr.bf16.mxu1 %v5545_v41 }
  0x5e   :  { %1710 = vmatpush1.bf16.msra.mxu0 %v5503_v42 }
  0x5f   :  { %1711 = vmatprep.subr.bf16.mxu0 %v8695_v1 }
  0x61   :  { %1471 = vmatmul.mubr.bf16.gmra.mrb[16].mxu0 %v5480_v43  ;;  %1655 = vmatmul.mubr.bf16.gmra.mrb[16].mxu1 %v5547_v44 }
  0x62   :  { %1478 = vmatprep.mubr.bf16.mxu0 %v5481_v45  ;;  %1712 = vmatpush1.bf16.msra.mxu0 %v5510_v46 }
  0x63   :  { %1713 = vmatprep.subr.bf16.mxu0 %v8695_v1  ;;  %1662 = vmatprep.mubr.bf16.mxu1 %v5551_v47 }
  0x66   :  { %1714 = vmatpush1.bf16.msra.mxu0 %v5514_v48 }
  0x67   :  { %1715 = vmatprep.subr.bf16.mxu0 %v8695_v1 }
  0x69   :  { %1479 = vmatmul.mubr.bf16.gmra.mrb[20].mxu0 %v5483_v49  ;;  %1663 = vmatmul.mubr.bf16.gmra.mrb[20].mxu1 %v5553_v50 }
  0x6a   :  { %1486 = vmatprep.mubr.bf16.mxu0 %v5485_v51  ;;  %1716 = vmatpush1.bf16.msra.mxu0 %v5526_v52 }
  0x6b   :  { %1717 = vmatprep.subr.bf16.mxu0 %v8695_v1  ;;  %1670 = vmatprep.mubr.bf16.mxu1 %v5558_v53 }
  0x6e   :  { %1718 = vmatpush1.bf16.msra.mxu0 %v5534_v55 }
  0x6f   :  { %1719 = vmatprep.subr.bf16.mxu0 %v8695_v1 }
  0x71   :  { %1487 = vmatmul.mubr.bf16.gmra.mrb[24].mxu0 %v5487_v57  ;;  %1671 = vmatmul.mubr.bf16.gmra.mrb[24].mxu1 %v5560_v58 }
  0x72   :  { %1494 = vmatprep.mubr.bf16.mxu0 %v5489_v59  ;;  %1720 = vmatpush1.bf16.msra.mxu0 %v5543_v60 }
  0x73   :  { %1721 = vmatprep.subr.bf16.mxu0 %v8695_v1  ;;  %1678 = vmatprep.mubr.bf16.mxu1 %v5565_v61 }
  0x76   :  { %1722 = vmatpush1.bf16.msra.mxu0 %v5554_v63 }
  0x77   :  { %1723 = vmatprep.subr.bf16.mxu0 %v8695_v1 }
  0x79   :  { %1495 = vmatmul.mubr.bf16.gmra.mrb[28].mxu0 %v5491_v0  ;;  %1679 = vmatmul.mubr.bf16.gmra.mrb[28].mxu1 %v5567_v2 }
  0x7a   :  { %1502 = vmatprep.mubr.bf16.mxu0 %v5492_v3  ;;  %1724 = vmatpush1.bf16.msra.mxu0 %v5561_v4 }
  0x7b   :  { %1686 = vmatprep.mubr.bf16.mxu1 %v5573_v5  ;;  %1725 = vmatprep.subr.bf16.mxu0 %v8695_v1 }
  0x7e   :  { %1726 = vmatpush1.bf16.msra.mxu0 %v5577_v7 }
  0x81   :  { %1503 = vmatmul.mubr.bf16.gmra.mrb[32].mxu0 %v5495_v8  ;;  %1687 = vmatmul.mubr.bf16.gmra.mrb[32].mxu1 %v5575_v9 }
  0x82   :  { %1510 = vmatprep.mubr.bf16.mxu0 %v5496_v10  ;;  %5148 = vmatprep.mubr.msk.bf16.mxu1 %vm1309_vm0, %v5582_v11 }
  0x89   :  { %1511 = vmatmul.mubr.bf16.gmra.mrb[36].mxu0 %v5498_v12  ;;  %5149 = vmatmul.mubr.msk.bf16.vlgmr.msra.gmra.mrb[36].mxu1 %vm1309_vm0, %v5583_v13 }
  0x8a   :  { %1518 = vmatprep.mubr.bf16.mxu0 %v5500_v14  ;;  %5152 = vmatprep.mubr.msk.bf16.mxu1 %vm1309_vm0, %v5590_v15 }
  0x91   :  { %1519 = vmatmul.mubr.bf16.gmra.mrb[40].mxu0 %v5502_v16  ;;  %5153 = vmatmul.mubr.msk.bf16.gmra.mrb[40].mxu1 %vm1309_vm0, %v5591_v17 }
  0x92   :  { %1526 = vmatprep.mubr.bf16.mxu0 %v5504_v18  ;;  %5156 = vmatprep.mubr.msk.bf16.mxu1 %vm1309_vm0, %v5598_v21 }
  0x99   :  { %1527 = vmatmul.mubr.bf16.gmra.mrb[44].mxu0 %v5506_v19  ;;  %5157 = vmatmul.mubr.msk.bf16.gmra.mrb[44].mxu1 %vm1309_vm0, %v5599_v22 }
  0x9a   :  { %1534 = vmatprep.mubr.bf16.mxu0 %v5507_v20  ;;  %5160 = vmatprep.mubr.msk.bf16.mxu1 %vm1309_vm0, %v5606_v27 }
  0xa1   :  { %1535 = vmatmul.mubr.bf16.gmra.mrb[48].mxu0 %v5509_v23  ;;  %5161 = vmatmul.mubr.msk.bf16.gmra.mrb[48].mxu1 %vm1309_vm0, %v5607_v28 }
  0xa2   :  { %1542 = vmatprep.mubr.bf16.mxu0 %v5511_v24 }
  0xa9   :  { %1543 = vmatmul.mubr.bf16.gmra.mrb[52].mxu0 %v5513_v25 }
  0xaa   :  { %1550 = vmatprep.mubr.bf16.mxu0 %v5515_v26 }
  0xab   :  { %10 = vsyncpa [#allocation4], 0  ;;  %v5523_v31 = vld [vmem:[%s8689_s0 + $0x258] ss:$20 sps:$4 sm:$0xff]   ;;  %v5614_v33 = vld [vmem:[%s8689_s0 + $0x150] ss:$20 sps:$4 sm:$0xff]  }
  0xac   :  { %v5528_v32 = vld [vmem:[%s8689_s0 + $0x284] ss:$20 sps:$4 sm:$0xff]   ;;  %5164 = vmatprep.mubr.msk.bf16.mxu1 %vm1309_vm0, %v5614_v33  ;;  %v5530_v35 = vld [vmem:[%s8689_s0 + $0x280] ss:$20 sps:$4 sm:$0xff]   ;;  %v5537_v37 = vld [vmem:[%s8689_s0 + $0x2a8] ss:$20 sps:$4 sm:$0xff]  }
  0xad   :  { %v5615_v34 = vld [vmem:[%s8689_s0 + $0x178] ss:$20 sps:$4 sm:$0xff]   ;;  %v5541_v38 = vld [vmem:[%s8689_s0 + $0x2d4] ss:$20 sps:$4 sm:$0xff]   ;;  %v5544_v41 = vld [vmem:[%s8689_s0 + $0x2d0] ss:$20 sps:$4 sm:$0xff]  }
  0xae   :  { %5165 = vmatmul.mubr.msk.bf16.gmra.mrb[52].mxu1 %vm1309_vm0, %v5615_v34  ;;  %v5535_v36 = vld [vmem:[%s8689_s0 + $0x2ac] ss:$20 sps:$4 sm:$0xff]   ;;  %v5623_v40 = vld [vmem:[%s8689_s0 + $0x1c8] ss:$20 sps:$4 sm:$0xff]   ;;  %v5555_v44 = vld [vmem:[%s8689_s0 + $0x324] ss:$20 sps:$4 sm:$0xff]  }
  0xaf   :  { %v5622_v39 = vld [vmem:[%s8689_s0 + $0x1a0] ss:$20 sps:$4 sm:$0xff]   ;;  %v5548_v42 = vld [vmem:[%s8689_s0 + $0x2fc] ss:$20 sps:$4 sm:$0xff]   ;;  %v5550_v43 = vld [vmem:[%s8689_s0 + $0x2f8] ss:$20 sps:$4 sm:$0xff]  }
  0xb0   :  { %5168 = vmatprep.mubr.msk.bf16.mxu1 %vm1309_vm0, %v5622_v39  ;;  %v5630_v45 = vld [vmem:[%s8689_s0 + $0x1f0] ss:$20 sps:$4 sm:$0xff]   ;;  %v5631_v46 = vld [vmem:[%s8689_s0 + $0x218] ss:$20 sps:$4 sm:$0xff]   ;;  %v5557_v47 = vld [vmem:[%s8689_s0 + $0x320] ss:$20 sps:$4 sm:$0xff]  }
  0xb1   :  { %1551 = vmatmul.mubr.bf16.gmra.mrb[56].mxu0 %v5517_v29  ;;  %v5562_v48 = vld [vmem:[%s8689_s0 + $0x34c] ss:$20 sps:$4 sm:$0xff]   ;;  %v5564_v49 = vld [vmem:[%s8689_s0 + $0x348] ss:$20 sps:$4 sm:$0xff]   ;;  %v5572_v53 = vld [vmem:[%s8689_s0 + $0x370] ss:$20 sps:$4 sm:$0xff]  }
  0xb2   :  { %1558 = vmatprep.mubr.bf16.mxu0 %v5521_v30  ;;  %v5570_v50 = vld [vmem:[%s8689_s0 + $0x374] ss:$20 sps:$4 sm:$0xff]   ;;  %v5581_v54 = vld [vmem:[%s8689_s0 + $0xc] ss:$20 sps:$4 sm:$0xff]   ;;  %v5646_v57 = vld [vmem:[%s8689_s0 + $0x290] ss:$20 sps:$4 sm:$0xff]  }
  0xb3   :  { %v5638_v51 = vld [vmem:[%s8689_s0 + $0x240] ss:$20 sps:$4 sm:$0xff]   ;;  %v5639_v52 = vld [vmem:[%s8689_s0 + $0x268] ss:$20 sps:$4 sm:$0xff]   ;;  %v5647_v58 = vld [vmem:[%s8689_s0 + $0x2b8] ss:$20 sps:$4 sm:$0xff]  }
  0xb4   :  { %v5579_v55 = vld [vmem:[%s8689_s0 + $0x8] ss:$20 sps:$4 sm:$0xff]   ;;  %v5586_v59 = vld [vmem:[%s8689_s0 + $0x30] ss:$20 sps:$4 sm:$0xff]   ;;  %v5589_v61 = vld [vmem:[%s8689_s0 + $0x58] ss:$20 sps:$4 sm:$0xff]  }
  0xb5   :  { %v5584_v56 = vld [vmem:[%s8689_s0 + $0x34] ss:$20 sps:$4 sm:$0xff]   ;;  %v5587_v60 = vld [vmem:[%s8689_s0 + $0x5c] ss:$20 sps:$4 sm:$0xff]   ;;  %v5592_v62 = vld [vmem:[%s8689_s0 + $0x84] ss:$20 sps:$4 sm:$0xff]  }
  0xb6   :  { %5169 = vmatmul.mubr.msk.bf16.gmra.mrb[56].mxu1 %vm1309_vm0, %v5623_v40  ;;  %v5654_v63 = vld [vmem:[%s8689_s0 + $0x2e0] ss:$20 sps:$4 sm:$0xff]   ;;  %v5655_v0 = vld [vmem:[%s8689_s0 + $0x308] ss:$20 sps:$4 sm:$0xff]   ;;  %v5662_v6 = vld [vmem:[%s8689_s0 + $0x330] ss:$20 sps:$4 sm:$0xff]  }
  0xb7   :  { %5172 = vmatprep.mubr.msk.bf16.mxu1 %vm1309_vm0, %v5630_v45  ;;  %v5594_v2 = vld [vmem:[%s8689_s0 + $0x80] ss:$20 sps:$4 sm:$0xff]   ;;  %v5597_v4 = vld [vmem:[%s8689_s0 + $0xa8] ss:$20 sps:$4 sm:$0xff]   ;;  %v5663_v7 = vld [vmem:[%s8689_s0 + $0x358] ss:$20 sps:$4 sm:$0xff]  }
  0xb8   :  { %v5595_v3 = vld [vmem:[%s8689_s0 + $0xac] ss:$20 sps:$4 sm:$0xff]   ;;  %v5600_v5 = vld [vmem:[%s8689_s0 + $0xd4] ss:$20 sps:$4 sm:$0xff]   ;;  %v5602_v8 = vld [vmem:[%s8689_s0 + $0xd0] ss:$20 sps:$4 sm:$0xff]  }
  0xb9   :  { %1559 = vmatmul.mubr.bf16.gmra.mrb[60].mxu0 %v5523_v31  ;;  %v5603_v9 = vld [vmem:[%s8689_s0 + $0xfc] ss:$20 sps:$4 sm:$0xff]   ;;  %v5605_v12 = vld [vmem:[%s8689_s0 + $0xf8] ss:$20 sps:$4 sm:$0xff]   ;;  %v5670_v14 = vld [vmem:[%s8689_s0 + $0x380] ss:$20 sps:$4 sm:$0xff]  }
  0xba   :  { %1566 = vmatprep.mubr.bf16.mxu0 %v5528_v32  ;;  %v5608_v13 = vld [vmem:[%s8689_s0 + $0x124] ss:$20 sps:$4 sm:$0xff]   ;;  %v5671_v15 = vld [vmem:[%s8689_s0 + $0x3a8] ss:$20 sps:$4 sm:$0xff]   ;;  %v5610_v20 = vld [vmem:[%s8689_s0 + $0x120] ss:$20 sps:$4 sm:$0xff]  }
  0xbb   :  { %v5611_v22 = vld [vmem:[%s8689_s0 + $0x14c] ss:$20 sps:$4 sm:$0xff]   ;;  %v5613_v30 = vld [vmem:[%s8689_s0 + $0x148] ss:$20 sps:$4 sm:$0xff]   ;;  %vm2434_vm1 = vcmask 1041409   ;;  %vm2437_vm2 = vcmask 1042434  }
  0xbc   :  { %v5616_v32 = vld [vmem:[%s8689_s0 + $0x174] ss:$20 sps:$4 sm:$0xff]   ;;  %vm2440_vm3 = vcmask 1043459   ;;  %vm2443_vm4 = vcmask 1044484   ;;  %vm2446_vm5 = vcmask 1045509   ;;  %vm2449_vm6 = vcmask 1046534  }
  0xbd   :  { %vm2452_vm7 = vcmask 1047559   ;;  %s5929_s30 = smov 64   ;;  %vm2572_vm8 = vcmask 1048064   ;;  %vm4621_vm9 = vcmask 261120  }
  0xbe   :  { %5173 = vmatmul.mubr.msk.bf16.gmra.mrb[60].mxu1 %vm1309_vm0, %v5631_v46 }
  0xbf   :  { %5176 = vmatprep.mubr.msk.bf16.mxu1 %vm1309_vm0, %v5638_v51 }
  0xc1   :  { %1567 = vmatmul.mubr.bf16.gmra.mrb[64].mxu0 %v5530_v35  ;;  %v5678_v35 = vld [vmem:[%s8689_s0 + $0x3d0] ss:$20 sps:$4 sm:$0xff]  }
  0xc2   :  { %1574 = vmatprep.mubr.bf16.mxu0 %v5535_v36 }
  0xc6   :  { %5177 = vmatmul.mubr.msk.bf16.gmra.mrb[64].mxu1 %vm1309_vm0, %v5639_v52  ;;  %v5686_v52 = vld [vmem:[%s8689_s0 + $0x420] ss:$20 sps:$4 sm:$0xff]  }
  0xc7   :  { %5180 = vmatprep.mubr.msk.bf16.mxu1 %vm1309_vm0, %v5646_v57  ;;  %v5627_v57 = vld [vmem:[%s8689_s0 + $0x1ec] ss:$20 sps:$4 sm:$0xff]  }
  0xc9   :  { %1575 = vmatmul.mubr.bf16.gmra.mrb[68].mxu0 %v5537_v37  ;;  %v5679_v37 = vld [vmem:[%s8689_s0 + $0x3f8] ss:$20 sps:$4 sm:$0xff]  }
  0xca   :  { %1582 = vmatprep.mubr.bf16.mxu0 %v5541_v38 }
  0xce   :  { %5181 = vmatmul.mubr.msk.bf16.gmra.mrb[68].mxu1 %vm1309_vm0, %v5647_v58 }
  0xcf   :  { %5184 = vmatprep.mubr.msk.bf16.mxu1 %vm1309_vm0, %v5654_v63  ;;  %v5632_v63 = vld [vmem:[%s8689_s0 + $0x214] ss:$20 sps:$4 sm:$0xff]  }
  0xd1   :  { %1583 = vmatmul.mubr.bf16.gmra.mrb[72].mxu0 %v5544_v41  ;;  %v5618_v41 = vld [vmem:[%s8689_s0 + $0x170] ss:$20 sps:$4 sm:$0xff]  }
  0xd2   :  { %1590 = vmatprep.mubr.bf16.mxu0 %v5548_v42 }
  0xd6   :  { %5185 = vmatmul.mubr.msk.bf16.gmra.mrb[72].mxu1 %vm1309_vm0, %v5655_v0 }
  0xd7   :  { %5188 = vmatprep.mubr.msk.bf16.mxu1 %vm1309_vm0, %v5662_v6  ;;  %v5634_v6 = vld [vmem:[%s8689_s0 + $0x210] ss:$20 sps:$4 sm:$0xff]  }
  0xd9   :  { %1591 = vmatmul.mubr.bf16.gmra.mrb[76].mxu0 %v5550_v43  ;;  %v5619_v43 = vld [vmem:[%s8689_s0 + $0x19c] ss:$20 sps:$4 sm:$0xff]  }
  0xda   :  { %1598 = vmatprep.mubr.bf16.mxu0 %v5555_v44 }
  0xde   :  { %5189 = vmatmul.mubr.msk.bf16.gmra.mrb[76].mxu1 %vm1309_vm0, %v5663_v7 }
  0xdf   :  { %5192 = vmatprep.mubr.msk.bf16.mxu1 %vm1309_vm0, %v5670_v14 }
  0xe1   :  { %1599 = vmatmul.mubr.bf16.gmra.mrb[80].mxu0 %v5557_v47  ;;  %v5621_v47 = vld [vmem:[%s8689_s0 + $0x198] ss:$20 sps:$4 sm:$0xff]  }
  0xe2   :  { %1606 = vmatprep.mubr.bf16.mxu0 %v5562_v48 }
  0xe6   :  { %5193 = vmatmul.mubr.msk.bf16.gmra.mrb[80].mxu1 %vm1309_vm0, %v5671_v15  ;;  %v5640_v15 = vld [vmem:[%s8689_s0 + $0x264] ss:$20 sps:$4 sm:$0xff]  }
  0xe7   :  { %5196 = vmatprep.mubr.msk.bf16.mxu1 %vm1309_vm0, %v5678_v35  ;;  %v5648_v35 = vld [vmem:[%s8689_s0 + $0x2b4] ss:$20 sps:$4 sm:$0xff]  }
  0xe9   :  { %1607 = vmatmul.mubr.bf16.gmra.mrb[84].mxu0 %v5564_v49  ;;  %v5624_v49 = vld [vmem:[%s8689_s0 + $0x1c4] ss:$20 sps:$4 sm:$0xff]  }
  0xea   :  { %1614 = vmatprep.mubr.bf16.mxu0 %v5570_v50 }
  0xee   :  { %5197 = vmatmul.mubr.msk.bf16.gmra.mrb[84].mxu1 %vm1309_vm0, %v5679_v37 }
  0xef   :  { %5200 = vmatprep.mubr.msk.bf16.mxu1 %vm1309_vm0, %v5686_v52 }
  0xf1   :  { %1615 = vmatmul.mubr.bf16.gmra.mrb[88].mxu0 %v5572_v53  ;;  %v5687_v53 = vld [vmem:[%s8689_s0 + $0x448] ss:$20 sps:$4 sm:$0xff]  }
  0xf2   :  { %1727 = vmatprep.mubr.bf16.mxu0 %v5581_v54 }
  0xf6   :  { %5201 = vmatmul.mubr.msk.bf16.gmra.mrb[88].mxu1 %vm1309_vm0, %v5687_v53 }
  0xf9   :  { %1728 = vmatmul.mubr.bf16.vlgmr.msra.gmra.mrb[0].mxu0 %v5579_v55  ;;  %v5626_v55 = vld [vmem:[%s8689_s0 + $0x1c0] ss:$20 sps:$4 sm:$0xff]  }
  0xfa   :  { %1735 = vmatprep.mubr.bf16.mxu0 %v5584_v56 }
 0x101   :  { %1736 = vmatmul.mubr.bf16.gmra.mrb[4].mxu0 %v5586_v59 }
 0x102   :  { %1743 = vmatprep.mubr.bf16.mxu0 %v5587_v60 }
 0x109   :  { %1744 = vmatmul.mubr.bf16.gmra.mrb[8].mxu0 %v5589_v61  ;;  %v5629_v61 = vld [vmem:[%s8689_s0 + $0x1e8] ss:$20 sps:$4 sm:$0xff]  }
 0x10a   :  { %1751 = vmatprep.mubr.bf16.mxu0 %v5592_v62 }
 0x111   :  { %1752 = vmatmul.mubr.bf16.gmra.mrb[12].mxu0 %v5594_v2 }
 0x112   :  { %1759 = vmatprep.mubr.bf16.mxu0 %v5595_v3  ;;  %v5694_v3 = vld [vmem:[%s8689_s0 + $0x470] ss:$20 sps:$4 sm:$0xff]  }
 0x113   :  { %5204 = vmatprep.mubr.msk.bf16.mxu1 %vm1309_vm0, %v5694_v3 }
 0x114   :  { %v6438_v10 = vpop.f32.mrb[0].mxu1 }
 0x115   :  { %v1626_v11 = vpop.f32.mrb[1].mxu1 }
 0x116   :  { %v6453_v16 = vpop.f32.mrb[2].mxu1 }
 0x117   :  { %v1629_v17 = vpop.f32.mrb[3].mxu1 }
 0x119   :  { %1760 = vmatmul.mubr.bf16.gmra.mrb[16].mxu0 %v5597_v4  ;;  %v5695_v4 = vld [vmem:[%s8689_s0 + $0x498] ss:$20 sps:$4 sm:$0xff]  }
 0x11a   :  { %1767 = vmatprep.mubr.bf16.mxu0 %v5600_v5  ;;  %5205 = vmatmul.mubr.msk.bf16.gmra.mrb[92].mxu1 %vm1309_vm0, %v5695_v4  ;;  %v5669_v4 = vld [vmem:[%s8689_s0 + $0x378] ss:$20 sps:$4 sm:$0xff]  }
 0x11c   :  { %v6456_v18 = vpop.f32.mrb[4].mxu1 }
 0x11d   :  { %v1634_v19 = vpop.f32.mrb[5].mxu1 }
 0x11e   :  { %v6461_v21 = vpop.f32.mrb[6].mxu1 }
 0x11f   :  { %v1637_v23 = vpop.f32.mrb[7].mxu1 }
 0x120   :  { %v5642_v23 = vld [vmem:[%s8689_s0 + $0x260] ss:$20 sps:$4 sm:$0xff]  }
 0x121   :  { %1768 = vmatmul.mubr.bf16.gmra.mrb[20].mxu0 %v5602_v8  ;;  %v5635_v8 = vld [vmem:[%s8689_s0 + $0x23c] ss:$20 sps:$4 sm:$0xff]  }
 0x122   :  { %1775 = vmatprep.mubr.bf16.mxu0 %v5603_v9 }
 0x124   :  { %v6466_v24 = vpop.f32.mrb[8].mxu1 }
 0x125   :  { %v1642_v25 = vpop.f32.mrb[9].mxu1 }
 0x126   :  { %v6468_v26 = vpop.f32.mrb[10].mxu1 }
 0x127   :  { %v1645_v27 = vpop.f32.mrb[11].mxu1 }
 0x128   :  { %v5643_v27 = vld [vmem:[%s8689_s0 + $0x28c] ss:$20 sps:$4 sm:$0xff]  }
 0x129   :  { %1776 = vmatmul.mubr.bf16.gmra.mrb[24].mxu0 %v5605_v12 }
 0x12a   :  { %1783 = vmatprep.mubr.bf16.mxu0 %v5608_v13  ;;  %v5637_v13 = vld [vmem:[%s8689_s0 + $0x238] ss:$20 sps:$4 sm:$0xff]  }
 0x12c   :  { %v6470_v28 = vpop.f32.mrb[12].mxu1 }
 0x12d   :  { %v1650_v29 = vpop.f32.mrb[13].mxu1 }
 0x12e   :  { %v6475_v31 = vpop.f32.mrb[14].mxu1 }
 0x12f   :  { %v1653_v33 = vpop.f32.mrb[15].mxu1 }
 0x130   :  { %v5645_v33 = vld [vmem:[%s8689_s0 + $0x288] ss:$20 sps:$4 sm:$0xff]  }
 0x131   :  { %1784 = vmatmul.mubr.bf16.gmra.mrb[28].mxu0 %v5610_v20  ;;  %v5702_v20 = vld [vmem:[%s8689_s0 + $0x4c0] ss:$20 sps:$4 sm:$0xff]  }
 0x132   :  { %1791 = vmatprep.mubr.bf16.mxu0 %v5611_v22  ;;  %v5703_v22 = vld [vmem:[%s8689_s0 + $0x4e8] ss:$20 sps:$4 sm:$0xff]   ;;  %5208 = vmatprep.mubr.msk.bf16.mxu1 %vm1309_vm0, %v5702_v20 }
 0x133   :  { %5209 = vmatmul.mubr.msk.bf16.gmra.mrb[96].mxu1 %vm1309_vm0, %v5703_v22 }
 0x134   :  { %v6480_v34 = vpop.f32.mrb[16].mxu1 }
 0x135   :  { %v1658_v36 = vpop.f32.mrb[17].mxu1 }
 0x136   :  { %v6489_v38 = vpop.f32.mrb[18].mxu1  ;;  %v5650_v36 = vld [vmem:[%s8689_s0 + $0x2b0] ss:$20 sps:$4 sm:$0xff]  }
 0x137   :  { %v1661_v39 = vpop.f32.mrb[19].mxu1 }
 0x138   :  { %v5651_v39 = vld [vmem:[%s8689_s0 + $0x2dc] ss:$20 sps:$4 sm:$0xff]  }
 0x139   :  { %1792 = vmatmul.mubr.bf16.gmra.mrb[32].mxu0 %v5613_v30 }
 0x13a   :  { %1799 = vmatprep.mubr.bf16.mxu0 %v5616_v32 }
 0x13c   :  { %v6492_v40 = vpop.f32.mrb[20].mxu1 }
 0x13d   :  { %v1666_v42 = vpop.f32.mrb[21].mxu1 }
 0x13e   :  { %v6500_v44 = vpop.f32.mrb[22].mxu1 }
 0x13f   :  { %v1669_v45 = vpop.f32.mrb[23].mxu1 }
 0x140   :  { %v5653_v45 = vld [vmem:[%s8689_s0 + $0x2d8] ss:$20 sps:$4 sm:$0xff]  }
 0x141   :  { %1800 = vmatmul.mubr.bf16.gmra.mrb[36].mxu0 %v5618_v41 }
 0x142   :  { %1807 = vmatprep.mubr.bf16.mxu0 %v5619_v43 }
 0x144   :  { %v6502_v46 = vpop.f32.mrb[24].mxu1 }
 0x145   :  { %v1674_v48 = vpop.f32.mrb[25].mxu1 }
 0x146   :  { %v6510_v50 = vpop.f32.mrb[26].mxu1  ;;  %v5658_v48 = vld [vmem:[%s8689_s0 + $0x300] ss:$20 sps:$4 sm:$0xff]  }
 0x147   :  { %v1677_v51 = vpop.f32.mrb[27].mxu1 }
 0x148   :  { %v5659_v51 = vld [vmem:[%s8689_s0 + $0x32c] ss:$20 sps:$4 sm:$0xff]  }
 0x149   :  { %1808 = vmatmul.mubr.bf16.gmra.mrb[40].mxu0 %v5621_v47  ;;  %v5656_v47 = vld [vmem:[%s8689_s0 + $0x304] ss:$20 sps:$4 sm:$0xff]  }
 0x14a   :  { %1815 = vmatprep.mubr.bf16.mxu0 %v5624_v49 }
 0x14c   :  { %v6520_v54 = vpop.f32.mrb[28].mxu1 }
 0x14d   :  { %v1682_v56 = vpop.f32.mrb[29].mxu1 }
 0x14e   :  { %v6528_v58 = vpop.f32.mrb[30].mxu1  ;;  %v5661_v56 = vld [vmem:[%s8689_s0 + $0x328] ss:$20 sps:$4 sm:$0xff]  }
 0x14f   :  { %v1685_v59 = vpop.f32.mrb[31].mxu1 }
 0x150   :  { %v5666_v59 = vld [vmem:[%s8689_s0 + $0x350] ss:$20 sps:$4 sm:$0xff]  }
 0x151   :  { %1816 = vmatmul.mubr.bf16.gmra.mrb[44].mxu0 %v5626_v55 }
 0x152   :  { %1823 = vmatprep.mubr.bf16.mxu0 %v5627_v57  ;;  %v5664_v57 = vld [vmem:[%s8689_s0 + $0x354] ss:$20 sps:$4 sm:$0xff]  }
 0x154   :  { %v6530_v60 = vpop.f32.mrb[32].mxu1 }
 0x155   :  { %v1690_v62 = vpop.f32.mrb[33].mxu1 }
 0x156   :  { %v6538_v0 = vpop.f32.mrb[34].mxu1  ;;  %v5667_v62 = vld [vmem:[%s8689_s0 + $0x37c] ss:$20 sps:$4 sm:$0xff]  }
 0x157   :  { %v1693_v2 = vpop.f32.mrb[35].mxu1 }
 0x159   :  { %1824 = vmatmul.mubr.bf16.gmra.mrb[48].mxu0 %v5629_v61 }
 0x15a   :  { %1831 = vmatprep.mubr.bf16.mxu0 %v5632_v63 }
 0x15c   :  { %v6548_v5 = vpop.f32.mrb[36].mxu1 }
 0x15d   :  { %v6553_v7 = vpop.f32.mrb[37].mxu1 }
 0x15e   :  { %v6558_v9 = vpop.f32.mrb[38].mxu1 }
 0x15f   :  { %v6560_v11 = vpop.f32.mrb[39].mxu1 }
 0x161   :  { %1832 = vmatmul.mubr.bf16.gmra.mrb[52].mxu0 %v5634_v6  ;;  %v5672_v6 = vld [vmem:[%s8689_s0 + $0x3a4] ss:$20 sps:$4 sm:$0xff]  }
 0x162   :  { %1839 = vmatprep.mubr.bf16.mxu0 %v5635_v8  ;;  %v5674_v8 = vld [vmem:[%s8689_s0 + $0x3a0] ss:$20 sps:$4 sm:$0xff]  }
 0x164   :  { %v6562_v12 = vpop.f32.mrb[40].mxu1 }
 0x165   :  { %v6567_v14 = vpop.f32.mrb[41].mxu1 }
 0x166   :  { %v6572_v17 = vpop.f32.mrb[42].mxu1 }
 0x167   :  { %v6574_v19 = vpop.f32.mrb[43].mxu1 }
 0x169   :  { %1840 = vmatmul.mubr.bf16.gmra.mrb[56].mxu0 %v5637_v13 }
 0x16a   :  { %1847 = vmatprep.mubr.bf16.mxu0 %v5640_v15  ;;  %v5675_v15 = vld [vmem:[%s8689_s0 + $0x3cc] ss:$20 sps:$4 sm:$0xff]  }
 0x16c   :  { %v6587_v25 = vpop.f32.mrb[44].mxu1 }
 0x16d   :  { %v6592_v29 = vpop.f32.mrb[45].mxu1 }
 0x16e   :  { %v6594_v30 = vpop.f32.mrb[46].mxu1 }
 0x16f   :  { %v6596_v32 = vpop.f32.mrb[47].mxu1 }
 0x171   :  { %1848 = vmatmul.mubr.bf16.gmra.mrb[60].mxu0 %v5642_v23 }
 0x172   :  { %1855 = vmatprep.mubr.bf16.mxu0 %v5643_v27  ;;  %v5677_v27 = vld [vmem:[%s8689_s0 + $0x3c8] ss:$20 sps:$4 sm:$0xff]  }
 0x174   :  { %v6607_v37 = vpop.f32.mrb[48].mxu1 }
 0x175   :  { %v6612_v41 = vpop.f32.mrb[49].mxu1 }
 0x176   :  { %v6614_v42 = vpop.f32.mrb[50].mxu1 }
 0x177   :  { %v6616_v43 = vpop.f32.mrb[51].mxu1 }
 0x179   :  { %1856 = vmatmul.mubr.bf16.gmra.mrb[64].mxu0 %v5645_v33  ;;  %v5680_v33 = vld [vmem:[%s8689_s0 + $0x3f4] ss:$20 sps:$4 sm:$0xff]  }
 0x17a   :  { %1863 = vmatprep.mubr.bf16.mxu0 %v5648_v35  ;;  %v5682_v35 = vld [vmem:[%s8689_s0 + $0x3f0] ss:$20 sps:$4 sm:$0xff]  }
 0x181   :  { %1864 = vmatmul.mubr.bf16.gmra.mrb[68].mxu0 %v5650_v36  ;;  %v6627_v49 = vpop.f32.mrb[52].mxu1 }
 0x182   :  { %1871 = vmatprep.mubr.bf16.mxu0 %v5651_v39  ;;  %v6632_v52 = vpop.f32.mrb[53].mxu1  ;;  %v5683_v39 = vld [vmem:[%s8689_s0 + $0x41c] ss:$20 sps:$4 sm:$0xff]  }
 0x183   :  { %v6634_v53 = vpop.f32.mrb[54].mxu1 }
 0x184   :  { %v6636_v55 = vpop.f32.mrb[55].mxu1 }
 0x189   :  { %1872 = vmatmul.mubr.bf16.gmra.mrb[72].mxu0 %v5653_v45  ;;  %v6647_v61 = vpop.f32.mrb[56].mxu1 }
 0x18a   :  { %1879 = vmatprep.mubr.bf16.mxu0 %v5656_v47  ;;  %v6652_v63 = vpop.f32.mrb[57].mxu1 }
 0x18b   :  { %v6654_v2 = vpop.f32.mrb[58].mxu1 }
 0x18c   :  { %v6656_v3 = vpop.f32.mrb[59].mxu1 }
 0x191   :  { %1880 = vmatmul.mubr.bf16.gmra.mrb[76].mxu0 %v5658_v48  ;;  %v6667_v13 = vpop.f32.mrb[60].mxu1 }
 0x192   :  { %1887 = vmatprep.mubr.bf16.mxu0 %v5659_v51  ;;  %v6672_v20 = vpop.f32.mrb[61].mxu1  ;;  %v5685_v51 = vld [vmem:[%s8689_s0 + $0x418] ss:$20 sps:$4 sm:$0xff]  }
 0x193   :  { %v6674_v22 = vpop.f32.mrb[62].mxu1 }
 0x194   :  { %v6676_v23 = vpop.f32.mrb[63].mxu1 }
 0x199   :  { %1888 = vmatmul.mubr.bf16.gmra.mrb[80].mxu0 %v5661_v56  ;;  %v6687_v36 = vpop.f32.mrb[64].mxu1  ;;  %v5688_v56 = vld [vmem:[%s8689_s0 + $0x444] ss:$20 sps:$4 sm:$0xff]  }
 0x19a   :  { %1895 = vmatprep.mubr.bf16.mxu0 %v5664_v57  ;;  %v6692_v45 = vpop.f32.mrb[65].mxu1  ;;  %v6707_v57 = vld [vmem:[%s8691_s2] ss:$0 sm:$0xff] }
 0x19b   :  { %v6694_v47 = vpop.f32.mrb[66].mxu1 }
 0x19c   :  { %v6696_v48 = vpop.f32.mrb[67].mxu1 }
 0x1a1   :  { %1896 = vmatmul.mubr.bf16.gmra.mrb[84].mxu0 %v5666_v59 }
 0x1a2   :  { %1903 = vmatprep.mubr.bf16.mxu0 %v5667_v62 }
 0x1a9   :  { %1904 = vmatmul.mubr.bf16.gmra.mrb[88].mxu0 %v5669_v4 }
 0x1aa   :  { %1911 = vmatprep.mubr.bf16.mxu0 %v5672_v6  ;;  %v5690_v6 = vld [vmem:[%s8689_s0 + $0x440] ss:$20 sps:$4 sm:$0xff]  }
 0x1b1   :  { %1912 = vmatmul.mubr.bf16.gmra.mrb[92].mxu0 %v5674_v8  ;;  %v6713_v8 = vpop.f32.mrb[68].mxu1 }
 0x1b2   :  { %1919 = vmatprep.mubr.bf16.mxu0 %v5675_v15  ;;  %8717 = vst [vmem:[#allocation6_spill] sm:$0xff] %v6713_v8  ;;  %v6729_v8 = vadd.f32 %v6707_v57, %v6438_v10  ;;  %v6749_v10 = vadd.f32 %v6707_v57, %v6468_v26 }
 0x1b4   :  { %8720 = vst [vmem:[#allocation9_spill] sm:$0xff] %v6729_v8  ;;  %8725 = vst [vmem:[#allocation14_spill] sm:$0xff] %v6749_v10 }
 0x1b9   :  { %1920 = vmatmul.mubr.bf16.gmra.mrb[96].mxu0 %v5677_v27  ;;  %v5691_v27 = vld [vmem:[%s8689_s0 + $0x46c] ss:$20 sps:$4 sm:$0xff]  }
 0x1ba   :  { %1927 = vmatprep.mubr.bf16.mxu0 %v5680_v33  ;;  %v6718_v33 = vpop.f32.mrb[69].mxu1 }
 0x1bb   :  { %8718 = vst [vmem:[#allocation7_spill] sm:$0xff] %v6718_v33  ;;  %v6733_v33 = vadd.f32 %v6707_v57, %v6453_v16  ;;  %v6753_v16 = vadd.f32 %v6707_v57, %v6470_v28  ;;  %v5693_v28 = vld [vmem:[%s8689_s0 + $0x468] ss:$20 sps:$4 sm:$0xff]  }
 0x1bd   :  { %8721 = vst [vmem:[#allocation10_spill] sm:$0xff] %v6733_v33  ;;  %8726 = vst [vmem:[#allocation15_spill] sm:$0xff] %v6753_v16 }
 0x1c1   :  { %1928 = vmatmul.mubr.bf16.gmra.mrb[100].mxu0 %v5682_v35 }
 0x1c2   :  { %1935 = vmatprep.mubr.bf16.mxu0 %v5683_v39 }
 0x1c9   :  { %1936 = vmatmul.mubr.bf16.gmra.mrb[104].mxu0 %v5685_v51 }
 0x1ca   :  { %1943 = vmatprep.mubr.bf16.mxu0 %v5688_v56  ;;  %v6722_v56 = vpop.f32.mrb[70].mxu1 }
 0x1cb   :  { %8719 = vst [vmem:[#allocation8_spill] sm:$0xff] %v6722_v56 }
 0x1cc   :  { %v1729_v59 = vpop.f32.mrb[0].mxu0 }
 0x1cd   :  { %v5244_v62 = vadd.f32 %v6707_v57, %v1729_v59  ;;  %v1731_v4 = vpop.f32.mrb[1].mxu0  ;;  %v6724_v59 = vpop.f32.mrb[71].mxu1 }
 0x1ce   :  { %v1732_v15 = vpop.f32.mrb[2].mxu0 }
 0x1cf   :  { %v5245_v35 = vadd.f32 %v6707_v57, %v1732_v15  ;;  %v2019_v39 = vadd.f32 %v5244_v62, %v6553_v7  ;;  %v1734_v51 = vpop.f32.mrb[3].mxu0  ;;  %v6737_v7 = vadd.f32 %v6707_v57, %v6456_v18  ;;  %v6741_v62 = vadd.f32 %v6707_v57, %v6461_v21 }
 0x1d0   :  { %v6757_v18 = vadd.f32 %v6707_v57, %v6475_v31  ;;  %v6765_v21 = vadd.f32 %v6707_v57, %v6489_v38  ;;  %v6775_v31 = vadd.f32 %v6707_v57, %v6492_v40  ;;  %v6783_v38 = vadd.f32 %v6707_v57, %v6502_v46  ;;  %v5696_v51 = vld [vmem:[%s8689_s0 + $0x494] ss:$20 sps:$4 sm:$0xff]  }
 0x1d1   :  { %v2273_v4 = vmax.f32 %v2019_v39, 0.0  ;;  %v2022_v1 = vadd.f32 %v5245_v35, %v6560_v11  ;;  %1944 = vmatmul.mubr.bf16.gmra.mrb[108].mxu0 %v5690_v6  ;;  %8722 = vst [vmem:[#allocation11_spill] sm:$0xff] %v6737_v7  ;;  %8723 = vst [vmem:[#allocation12_spill] sm:$0xff] %v6741_v62  ;;  %v6745_v11 = vadd.f32 %v6707_v57, %v6466_v24 }
 0x1d2   :  { %1951 = vmatprep.mubr.bf16.mxu0 %v5691_v27  ;;  %8727 = vst [vmem:[#allocation16_spill] sm:$0xff] %v6757_v18  ;;  %8729 = vst [vmem:[#allocation18_spill] sm:$0xff] %v6765_v21  ;;  %v6787_v35 = vadd.f32 %v6707_v57, %v6510_v50  ;;  %v6794_v40 = vadd.f32 %v6707_v57, %v6520_v54  ;;  %v6802_v50 = vadd.f32 %v6707_v57, %v6528_v58 }
 0x1d3   :  { %v2274_v15 = vmax.f32 %v2022_v1, 0.0  ;;  %8724 = vst [vmem:[#allocation13_spill] sm:$0xff] %v6745_v11  ;;  %v6761_v1 = vadd.f32 %v6707_v57, %v6480_v34  ;;  %v6767_v24 = vmin.f32 %v2273_v4, 6.0  ;;  %8730 = vst [vmem:[#allocation19_spill] sm:$0xff] %v6775_v31  ;;  %v6779_v34 = vadd.f32 %v6707_v57, %v6500_v44 }
 0x1d4   :  { %v1737_v6 = vpop.f32.mrb[4].mxu0  ;;  %8732 = vst [vmem:[#allocation21_spill] sm:$0xff] %v6783_v38  ;;  %8733 = vst [vmem:[#allocation22_spill] sm:$0xff] %v6787_v35  ;;  %v6810_v35 = vadd.f32 %v6707_v57, %v6538_v0 }
 0x1d5   :  { %8728 = vst [vmem:[#allocation17_spill] sm:$0xff] %v6761_v1  ;;  %v5246_v26 = vadd.f32 %v6707_v57, %v1737_v6  ;;  %v1739_v27 = vpop.f32.mrb[5].mxu0  ;;  %8731 = vst [vmem:[#allocation20_spill] sm:$0xff] %v6779_v34  ;;  %v6796_v4 = vmin.f32 %v2274_v15, 6.0  ;;  %v2577_v58 = vrot.slane %v6767_v24, 2  ;;  %v6835_v1 = vpop.f32.mrb[72].mxu1 }
 0x1d6   :  { %v1740_v39 = vpop.f32.mrb[6].mxu0  ;;  %8734 = vst [vmem:[#allocation23_spill] sm:$0xff] %v6794_v40  ;;  %8735 = vst [vmem:[#allocation24_spill] sm:$0xff] %v6802_v50  ;;  %v6806_v27 = vadd.f32 %v6707_v57, %v6530_v60  ;;  %v2777_v60 = vrot.slane %v6767_v24, 5  ;;  %v2713_v50 = vrot.slane %v6767_v24, 4 }
 0x1d7   :  { %v2027_v44 = vadd.f32 %v5246_v26, %v6548_v5  ;;  %v5247_v46 = vadd.f32 %v6707_v57, %v1740_v39  ;;  %v1742_v6 = vpop.f32.mrb[7].mxu0  ;;  %8737 = vst [vmem:[#allocation26_spill] sm:$0xff] %v6810_v35  ;;  %v2641_v5 = vrot.slane %v6767_v24, 3  ;;  %v2504_v26 = vrot.slane %v6767_v24, 1  ;;  %v5699_v34 = vld [vmem:[%s8689_s0 + $0x4bc] ss:$20 sps:$4 sm:$0xff]  }
 0x1d8   :  { %8736 = vst [vmem:[#allocation25_spill] sm:$0xff] %v6806_v27  ;;  %v2913_v39 = vrot.slane %v6767_v24, 7  ;;  %v2849_v6 = vrot.slane %v6767_v24, 6  ;;  %8738 = vst [vmem:[#allocation27_spill] sm:$0xff] %v6835_v1  ;;  %v6837_v27 = vpop.f32.mrb[73].mxu1 }
 0x1d9   :  { %v2275_v54 = vmax.f32 %v2027_v44, 0.0  ;;  %v2030_v15 = vadd.f32 %v5247_v46, %v6558_v9  ;;  %1952 = vmatmul.mubr.bf16.gmra.mrb[112].mxu0 %v5693_v28  ;;  %v5698_v9 = vld [vmem:[%s8689_s0 + $0x490] ss:$20 sps:$4 sm:$0xff]   ;;  %v3217_v28 = vrot.slane %v6796_v4, 3  ;;  %v3081_v44 = vrot.slane %v6796_v4, 1  ;;  %8739 = vst [vmem:[#allocation28_spill] sm:$0xff] %v6837_v27 }
 0x1da   :  { %1959 = vmatprep.mubr.bf16.mxu0 %v5696_v51  ;;  %v3489_v46 = vrot.slane %v6796_v4, 7  ;;  %v6842_v7 = vpop.f32.mrb[74].mxu1 }
 0x1db   :  { %v2339_v0 = vmin.f32 %v2275_v54, 6.0  ;;  %v2276_v35 = vmax.f32 %v2030_v15, 0.0  ;;  %8740 = vst [vmem:[#allocation29_spill] sm:$0xff] %v6842_v7  ;;  %v6845_v33 = vpop.f32.mrb[75].mxu1 }
 0x1dc   :  { %v1745_v51 = vpop.f32.mrb[8].mxu0  ;;  %8741 = vst [vmem:[#allocation30_spill] sm:$0xff] %v6845_v33 }
 0x1dd   :  { %v6828_v54 = vmin.f32 %v2276_v35, 6.0  ;;  %v5248_v15 = vadd.f32 %v6707_v57, %v1745_v51  ;;  %v1747_v38 = vpop.f32.mrb[9].mxu0  ;;  %v2642_v31 = vrot.slane %v2339_v0, 2  ;;  %v2505_v21 = vsel %vm2434_vm1, %v2339_v0, %v2504_v26 }
 0x1de   :  { %v1748_v18 = vpop.f32.mrb[10].mxu0  ;;  %v2578_v16 = vrot.slane %v2339_v0, 1  ;;  %v2433_v10 = vrot.slane %v2339_v0, 7  ;;  %v2914_v40 = vrot.slane %v2339_v0, 6  ;;  %v2778_v35 = vrot.slane %v2339_v0, 4 }
 0x1df   :  { %v5249_v11 = vadd.f32 %v6707_v57, %v1748_v18  ;;  %v2035_v38 = vadd.f32 %v5248_v15, %v6567_v14  ;;  %v1750_v51 = vpop.f32.mrb[11].mxu0  ;;  %v2643_v62 = vsel %vm2434_vm1, %v2642_v31, %v2641_v5  ;;  %v3218_v26 = vrot.slane %v6828_v54, 2 }
 0x1e0   :  { %v2579_v8 = vsel %vm2434_vm1, %v2578_v16, %v2577_v58  ;;  %v2435_v1 = vsel %vm2434_vm1, %v2433_v10, %v6767_v24  ;;  %v2915_v27 = vsel %vm2434_vm1, %v2914_v40, %v2913_v39  ;;  %v2779_v18 = vsel %vm2434_vm1, %v2778_v35, %v2777_v60 }
 0x1e1   :  { %v2277_v56 = vmax.f32 %v2035_v38, 0.0  ;;  %v2038_v14 = vadd.f32 %v5249_v11, %v6574_v19  ;;  %1960 = vmatmul.mubr.bf16.gmra.mrb[116].mxu0 %v5698_v9  ;;  %v3219_v31 = vsel %vm2434_vm1, %v3218_v26, %v3217_v28  ;;  %v3082_v16 = vsel %vm2434_vm1, %v6828_v54, %v3081_v44 }
 0x1e2   :  { %1967 = vmatprep.mubr.bf16.mxu0 %v5699_v34  ;;  %v3490_v58 = vrot.slane %v6828_v54, 6  ;;  %v2850_v10 = vrot.slane %v2339_v0, 5  ;;  %v2714_v24 = vrot.slane %v2339_v0, 3  ;;  %v3354_v60 = vrot.slane %v6828_v54, 4 }
 0x1e3   :  { %v2341_v40 = vmin.f32 %v2277_v56, 6.0  ;;  %v2278_v39 = vmax.f32 %v2038_v14, 0.0  ;;  %v5701_v56 = vld [vmem:[%s8689_s0 + $0x4b8] ss:$20 sps:$4 sm:$0xff]  }
 0x1e4   :  { %v1753_v11 = vpop.f32.mrb[12].mxu0  ;;  %v3491_v9 = vsel %vm2434_vm1, %v3490_v58, %v3489_v46  ;;  %v2851_v28 = vsel %vm2434_vm1, %v2850_v10, %v2849_v6  ;;  %v2715_v34 = vsel %vm2434_vm1, %v2714_v24, %v2713_v50  ;;  %v5704_v6 = vld [vmem:[%s8689_s0 + $0x4e4] ss:$20 sps:$4 sm:$0xff]  }
 0x1e5   :  { %v6864_v44 = vmin.f32 %v2278_v39, 6.0  ;;  %v5250_v35 = vadd.f32 %v6707_v57, %v1753_v11  ;;  %v1755_v0 = vpop.f32.mrb[13].mxu0  ;;  %v2644_v38 = vrot.slane %v2341_v40, 1  ;;  %v2506_v51 = vrot.slane %v2341_v40, 7 }
 0x1e6   :  { %v1756_v26 = vpop.f32.mrb[14].mxu0  ;;  %v2580_v50 = vsel %vm2437_vm2, %v2341_v40, %v2579_v8  ;;  %v2436_v46 = vrot.slane %v2341_v40, 6  ;;  %v2916_v14 = vrot.slane %v2341_v40, 5  ;;  %v2780_v58 = vrot.slane %v2341_v40, 3 }
 0x1e7   :  { %v2043_v10 = vadd.f32 %v5250_v35, %v6562_v12  ;;  %v5251_v24 = vadd.f32 %v6707_v57, %v1756_v26  ;;  %v1758_v39 = vpop.f32.mrb[15].mxu0  ;;  %v2645_v11 = vsel %vm2437_vm2, %v2644_v38, %v2643_v62  ;;  %v2507_v0 = vsel %vm2437_vm2, %v2506_v51, %v2505_v21 }
 0x1e8   :  { %v2438_v5 = vsel %vm2437_vm2, %v2436_v46, %v2435_v1  ;;  %v2917_v15 = vsel %vm2437_vm2, %v2916_v14, %v2915_v27  ;;  %v2781_v19 = vsel %vm2437_vm2, %v2780_v58, %v2779_v18  ;;  %v3220_v8 = vrot.slane %v6864_v44, 1 }
 0x1e9   :  { %v2279_v7 = vmax.f32 %v2043_v10, 0.0  ;;  %v2046_v33 = vadd.f32 %v5251_v24, %v6572_v17  ;;  %1968 = vmatmul.mubr.bf16.gmra.mrb[120].mxu0 %v5701_v56  ;;  %v3083_v12 = vrot.slane %v6864_v44, 7  ;;  %v3492_v35 = vrot.slane %v6864_v44, 5 }
 0x1ea   :  { %1975 = vmatprep.mubr.bf16.mxu0 %v5704_v6  ;;  %v8742_v62 = vrot.slane %v6796_v4, 5  ;;  %v3356_v1 = vrot.slane %v6864_v44, 3  ;;  %v2852_v27 = vrot.slane %v2341_v40, 4  ;;  %v2716_v38 = vrot.slane %v2341_v40, 2 }
 0x1eb   :  { %v2343_v18 = vmin.f32 %v2279_v7, 6.0  ;;  %v2280_v51 = vmax.f32 %v2046_v33, 0.0  ;;  %v3221_v26 = vsel %vm2437_vm2, %v3220_v8, %v3219_v31  ;;  %v3084_v17 = vsel %vm2437_vm2, %v3083_v12, %v3082_v16  ;;  %v5706_v33 = vld [vmem:[%s8689_s0 + $0x4e0] ss:$20 sps:$4 sm:$0xff]   ;;  %v6902_v16 = vpop.f32.mrb[76].mxu1 }
 0x1ec   :  { %v3355_v21 = vsel %vm2434_vm1, %v3354_v60, %v8742_v62  ;;  %v1761_v56 = vpop.f32.mrb[16].mxu0  ;;  %v3493_v46 = vsel %vm2437_vm2, %v3492_v35, %v3491_v9  ;;  %v2853_v6 = vsel %vm2437_vm2, %v2852_v27, %v2851_v28  ;;  %v2717_v58 = vsel %vm2437_vm2, %v2716_v38, %v2715_v34  ;;  %8743 = vst [vmem:[#allocation31_spill] sm:$0xff] %v6902_v16  ;;  %v6904_v24 = vpop.f32.mrb[77].mxu1 }
 0x1ed   :  { %v3357_v14 = vsel %vm2437_vm2, %v3356_v1, %v3355_v21  ;;  %v6895_v60 = vmin.f32 %v2280_v51, 6.0  ;;  %v5252_v10 = vadd.f32 %v6707_v57, %v1761_v56  ;;  %v1763_v40 = vpop.f32.mrb[17].mxu0  ;;  %v2646_v7 = vsel %vm2440_vm3, %v2343_v18, %v2645_v11  ;;  %v6909_v1 = vpop.f32.mrb[78].mxu1 }
 0x1ee   :  { %v2508_v31 = vrot.slane %v2343_v18, 6  ;;  %v1764_v9 = vpop.f32.mrb[18].mxu0  ;;  %v2581_v28 = vrot.slane %v2343_v18, 7  ;;  %v2439_v34 = vrot.slane %v2343_v18, 5  ;;  %v2918_v39 = vrot.slane %v2343_v18, 4  ;;  %8744 = vst [vmem:[#allocation32_spill] sm:$0xff] %v6909_v1 }
 0x1ef   :  { %v2782_v8 = vrot.slane %v2343_v18, 2  ;;  %v5253_v12 = vadd.f32 %v6707_v57, %v1764_v9  ;;  %v2051_v35 = vadd.f32 %v5252_v10, %v6592_v29  ;;  %v1766_v62 = vpop.f32.mrb[19].mxu0  ;;  %v8745_v11 = vrot.slane %v6796_v4, 2  ;;  %v6916_v51 = vpop.f32.mrb[79].mxu1 }
 0x1f0   :  { %v2509_v21 = vsel %vm2440_vm3, %v2508_v31, %v2507_v0  ;;  %v8746_v27 = vrot.slane %v6828_v54, 1  ;;  %v2582_v56 = vsel %vm2440_vm3, %v2581_v28, %v2580_v50  ;;  %v2441_v40 = vsel %vm2440_vm3, %v2439_v34, %v2438_v5 }
 0x1f1   :  { %v2919_v9 = vsel %vm2440_vm3, %v2918_v39, %v2917_v15  ;;  %v2783_v29 = vsel %vm2440_vm3, %v2782_v8, %v2781_v19  ;;  %v2281_v10 = vmax.f32 %v2051_v35, 0.0  ;;  %v2054_v0 = vadd.f32 %v5253_v12, %v6596_v32  ;;  %1976 = vmatmul.mubr.bf16.gmra.mrb[124].mxu0 %v5706_v33 }
 0x1f2   :  { %v3155_v38 = vsel %vm2434_vm1, %v8746_v27, %v8745_v11  ;;  %v3085_v31 = vrot.slane %v6895_v60, 6  ;;  %v3494_v62 = vrot.slane %v6895_v60, 4  ;;  %v3222_v11 = vsel %vm2440_vm3, %v6895_v60, %v3221_v26 }
 0x1f3   :  { %v3358_v27 = vrot.slane %v6895_v60, 2  ;;  %v2854_v50 = vrot.slane %v2343_v18, 3  ;;  %v2718_v28 = vrot.slane %v2343_v18, 1  ;;  %v2345_v5 = vmin.f32 %v2281_v10, 6.0 }
 0x1f4   :  { %v2282_v34 = vmax.f32 %v2054_v0, 0.0  ;;  %v3086_v19 = vsel %vm2440_vm3, %v3085_v31, %v3084_v17  ;;  %v6931_v32 = vsel %vm2437_vm2, %v6864_v44, %v3155_v38  ;;  %v1769_v15 = vpop.f32.mrb[20].mxu0  ;;  %v3495_v33 = vsel %vm2440_vm3, %v3494_v62, %v3493_v46 }
 0x1f5   :  { %v3359_v39 = vsel %vm2440_vm3, %v3358_v27, %v3357_v14  ;;  %v2855_v26 = vsel %vm2440_vm3, %v2854_v50, %v2853_v6  ;;  %v2719_v8 = vsel %vm2440_vm3, %v2718_v28, %v2717_v58  ;;  %v5254_v18 = vadd.f32 %v6707_v57, %v1769_v15  ;;  %v1771_v35 = vpop.f32.mrb[21].mxu0 }
 0x1f6   :  { %v6937_v12 = vmin.f32 %v2282_v34, 6.0  ;;  %v2647_v10 = vrot.slane %v2345_v5, 7  ;;  %v2510_v17 = vrot.slane %v2345_v5, 5  ;;  %v1772_v0 = vpop.f32.mrb[22].mxu0  ;;  %v2583_v31 = vrot.slane %v2345_v5, 6 }
 0x1f7   :  { %v2442_v38 = vrot.slane %v2345_v5, 4  ;;  %v2920_v1 = vrot.slane %v2345_v5, 3  ;;  %v2784_v16 = vrot.slane %v2345_v5, 1  ;;  %v2059_v46 = vadd.f32 %v5254_v18, %v6587_v25  ;;  %v1774_v62 = vpop.f32.mrb[23].mxu0 }
 0x1f8   :  { %v5255_v14 = vadd.f32 %v6707_v57, %v1772_v0  ;;  %v2648_v6 = vsel %vm2443_vm4, %v2647_v10, %v2646_v7  ;;  %v2511_v58 = vsel %vm2443_vm4, %v2510_v17, %v2509_v21  ;;  %v2584_v27 = vsel %vm2443_vm4, %v2583_v31, %v2582_v56 }
 0x1f9   :  { %v2444_v50 = vsel %vm2443_vm4, %v2442_v38, %v2441_v40  ;;  %v2921_v28 = vsel %vm2443_vm4, %v2920_v1, %v2919_v9  ;;  %v2785_v34 = vsel %vm2443_vm4, %v2784_v16, %v2783_v29  ;;  %v2283_v15 = vmax.f32 %v2059_v46, 0.0 }
 0x1fa   :  { %v2062_v35 = vadd.f32 %v5255_v14, %v6594_v30  ;;  %v3223_v25 = vrot.slane %v6937_v12, 7  ;;  %v3087_v18 = vrot.slane %v6937_v12, 5  ;;  %v3496_v0 = vrot.slane %v6937_v12, 3  ;;  %v6969_v14 = vpop.f32.mrb[80].mxu1 }
 0x1fb   :  { %v3360_v7 = vrot.slane %v6937_v12, 1  ;;  %v2856_v21 = vrot.slane %v2345_v5, 2  ;;  %v6954_v56 = vsel %vm2443_vm4, %v2345_v5, %v2719_v8  ;;  %v6956_v40 = vmin.f32 %v2283_v15, 6.0  ;;  %8747 = vst [vmem:[#allocation33_spill] sm:$0xff] %v6969_v14 }
 0x1fc   :  { %v2284_v1 = vmax.f32 %v2062_v35, 0.0  ;;  %v3224_v16 = vsel %vm2443_vm4, %v3223_v25, %v3222_v11  ;;  %v3157_v9 = vrot.slane %v6895_v60, 7  ;;  %v1777_v30 = vpop.f32.mrb[24].mxu0  ;;  %v3088_v29 = vsel %vm2443_vm4, %v3087_v18, %v3086_v19  ;;  %v6971_v19 = vpop.f32.mrb[81].mxu1 }
 0x1fd   :  { %v3497_v10 = vsel %vm2443_vm4, %v3496_v0, %v3495_v33  ;;  %v3361_v17 = vsel %vm2443_vm4, %v3360_v7, %v3359_v39  ;;  %v2857_v31 = vsel %vm2443_vm4, %v2856_v21, %v2855_v26  ;;  %v5256_v5 = vadd.f32 %v6707_v57, %v1777_v30  ;;  %v1779_v8 = vpop.f32.mrb[25].mxu0  ;;  %8748 = vst [vmem:[#allocation34_spill] sm:$0xff] %v6971_v19  ;;  %v6982_v21 = vpop.f32.mrb[82].mxu1 }
 0x1fe   :  { %v6964_v38 = vmin.f32 %v2284_v1, 6.0  ;;  %v2649_v46 = vrot.slane %v6956_v40, 6  ;;  %v2512_v11 = vrot.slane %v6956_v40, 4  ;;  %v1780_v62 = vpop.f32.mrb[26].mxu0  ;;  %v2585_v33 = vrot.slane %v6956_v40, 5  ;;  %8749 = vst [vmem:[#allocation35_spill] sm:$0xff] %v6982_v21 }
 0x1ff   :  { %v2445_v39 = vrot.slane %v6956_v40, 3  ;;  %v2922_v26 = vrot.slane %v6956_v40, 2  ;;  %v2786_v15 = vsel %vm2446_vm5, %v6956_v40, %v2785_v34  ;;  %v5257_v35 = vadd.f32 %v6707_v57, %v1780_v62  ;;  %v1782_v18 = vpop.f32.mrb[27].mxu0  ;;  %v6984_v1 = vpop.f32.mrb[83].mxu1 }
 0x200   :  { %v2067_v25 = vadd.f32 %v5256_v5, %v6612_v41  ;;  %v2650_v0 = vsel %vm2446_vm5, %v2649_v46, %v2648_v6  ;;  %v2513_v7 = vsel %vm2446_vm5, %v2512_v11, %v2511_v58  ;;  %8750 = vst [vmem:[#allocation36_spill] sm:$0xff] %v6984_v1  ;;  %v2586_v30 = vsel %vm2446_vm5, %v2585_v33, %v2584_v27 }
 0x201   :  { %v2447_v8 = vsel %vm2446_vm5, %v2445_v39, %v2444_v50  ;;  %v2923_v14 = vsel %vm2446_vm5, %v2922_v26, %v2921_v28  ;;  %v3225_v34 = vrot.slane %v6964_v38, 6  ;;  %v2070_v41 = vadd.f32 %v5257_v35, %v6616_v43 }
 0x202   :  { %v2285_v62 = vmax.f32 %v2067_v25, 0.0  ;;  %v3089_v5 = vrot.slane %v6964_v38, 4  ;;  %v3498_v6 = vrot.slane %v6964_v38, 2  ;;  %v3362_v46 = vsel %vm2446_vm5, %v6964_v38, %v3361_v17 }
 0x203   :  { %v3226_v58 = vsel %vm2446_vm5, %v3225_v34, %v3224_v16  ;;  %v2858_v27 = vrot.slane %v6956_v40, 1  ;;  %v3158_v50 = vsel %vm2440_vm3, %v3157_v9, %v6931_v32  ;;  %v2286_v11 = vmax.f32 %v2070_v41, 0.0 }
 0x204   :  { %v6999_v28 = vmin.f32 %v2285_v62, 6.0  ;;  %v3090_v43 = vsel %vm2446_vm5, %v3089_v5, %v3088_v29  ;;  %v3499_v33 = vsel %vm2446_vm5, %v3498_v6, %v3497_v10  ;;  %v1785_v39 = vpop.f32.mrb[28].mxu0  ;;  %v2721_v16 = vrot.slane %v6956_v40, 7 }
 0x205   :  { %v2859_v26 = vsel %vm2446_vm5, %v2858_v27, %v2857_v31  ;;  %v3159_v17 = vrot.slane %v6937_v12, 6  ;;  %v7007_v25 = vmin.f32 %v2286_v11, 6.0  ;;  %v5258_v32 = vadd.f32 %v6707_v57, %v1785_v39  ;;  %v1787_v9 = vpop.f32.mrb[29].mxu0 }
 0x206   :  { %v2651_v18 = vrot.slane %v6999_v28, 5  ;;  %v2514_v29 = vrot.slane %v6999_v28, 3  ;;  %v1788_v34 = vpop.f32.mrb[30].mxu0  ;;  %v2587_v10 = vrot.slane %v6999_v28, 4  ;;  %v2448_v31 = vrot.slane %v6999_v28, 2 }
 0x207   :  { %v2924_v40 = vrot.slane %v6999_v28, 1  ;;  %v2787_v62 = vrot.slane %v6999_v28, 7  ;;  %v2075_v41 = vadd.f32 %v5258_v32, %v6607_v37  ;;  %v5259_v5 = vadd.f32 %v6707_v57, %v1788_v34  ;;  %v1790_v6 = vpop.f32.mrb[31].mxu0 }
 0x208   :  { %v2652_v27 = vsel %vm2449_vm6, %v2651_v18, %v2650_v0  ;;  %v2515_v11 = vsel %vm2449_vm6, %v2514_v29, %v2513_v7  ;;  %v2588_v39 = vsel %vm2449_vm6, %v2587_v10, %v2586_v30  ;;  %v2450_v9 = vsel %vm2449_vm6, %v2448_v31, %v2447_v8 }
 0x209   :  { %v2925_v35 = vsel %vm2449_vm6, %v2924_v40, %v2923_v14  ;;  %v2788_v21 = vsel %vm2449_vm6, %v2787_v62, %v2786_v15  ;;  %v2287_v1 = vmax.f32 %v2075_v41, 0.0  ;;  %v2078_v19 = vadd.f32 %v5259_v5, %v6614_v42 }
 0x20a   :  { %v3227_v37 = vrot.slane %v7007_v25, 5  ;;  %v3091_v32 = vrot.slane %v7007_v25, 3  ;;  %v3500_v34 = vrot.slane %v7007_v25, 1  ;;  %v3363_v0 = vrot.slane %v7007_v25, 7 }
 0x20b   :  { %v2860_v7 = vsel %vm2449_vm6, %v6999_v28, %v2859_v26  ;;  %v2722_v30 = vsel %vm2446_vm5, %v2721_v16, %v6954_v56  ;;  %v7033_v14 = vmin.f32 %v2287_v1, 6.0  ;;  %v2288_v15 = vmax.f32 %v2078_v19, 0.0  ;;  %v7046_v16 = vpop.f32.mrb[84].mxu1 }
 0x20c   :  { %v3228_v8 = vsel %vm2449_vm6, %v3227_v37, %v3226_v58  ;;  %v3092_v42 = vsel %vm2449_vm6, %v3091_v32, %v3090_v43  ;;  %v1793_v18 = vpop.f32.mrb[32].mxu0  ;;  %v3501_v29 = vsel %vm2449_vm6, %v3500_v34, %v3499_v33  ;;  %v3364_v10 = vsel %vm2449_vm6, %v3363_v0, %v3362_v46  ;;  %v7062_v32 = vpop.f32.mrb[85].mxu1  ;;  %v5709_v34 = vld [vmem:[%s8692_s3 + $0x4] ss:$8 sps:$4 sm:$0xff]  }
 0x20d   :  { %v2723_v31 = vrot.slane %v6999_v28, 6  ;;  %v3160_v40 = vsel %vm2443_vm4, %v3159_v17, %v3158_v50  ;;  %v7041_v26 = vmin.f32 %v2288_v15, 6.0  ;;  %v5260_v56 = vadd.f32 %v6707_v57, %v1793_v18  ;;  %v1795_v1 = vpop.f32.mrb[33].mxu0  ;;  %v5707_v50 = vld [vmem:[%s8692_s3] ss:$8 sps:$4 sm:$0xff]   ;;  %v7071_v0 = vpop.f32.mrb[86].mxu1  ;;  %4377 = vmatprep.subr.bf16.mxu1 %v5709_v34 }
 0x20e   :  { %v2653_v19 = vrot.slane %v7033_v14, 4  ;;  %v2516_v58 = vrot.slane %v7033_v14, 2  ;;  %v1796_v43 = vpop.f32.mrb[34].mxu0  ;;  %v2589_v33 = vrot.slane %v7033_v14, 3  ;;  %v2451_v46 = vrot.slane %v7033_v14, 1  ;;  %4378 = vmatpush1.bf16.msra.mxu1 %v5707_v50 }
 0x20f   :  { %v7055_v28 = vsel %vm2452_vm7, %v7033_v14, %v2925_v35  ;;  %v2789_v17 = vrot.slane %v7033_v14, 6  ;;  %v5261_v62 = vadd.f32 %v6707_v57, %v1796_v43  ;;  %v2083_v41 = vadd.f32 %v5260_v56, %v6632_v52  ;;  %v1798_v5 = vpop.f32.mrb[35].mxu0  ;;  %v7080_v56 = vpop.f32.mrb[87].mxu1 }
 0x210   :  { %v2654_v6 = vsel %vm2452_vm7, %v2653_v19, %v2652_v27  ;;  %v2517_v37 = vsel %vm2452_vm7, %v2516_v58, %v2515_v11  ;;  %v2590_v35 = vsel %vm2452_vm7, %v2589_v33, %v2588_v39  ;;  %v2453_v52 = vsel %vm2452_vm7, %v2451_v46, %v2450_v9  ;;  %v5712_v39 = vld [vmem:[%s8692_s3 + $0x14] ss:$8 sps:$4 sm:$0xff]  }
 0x211   :  { %2697 = vrot.lane.b32.xlu0 %v2654_v6, %s5929_s30  ;;  %2560 = vrot.lane.b32.xlu1 %v2517_v37, %s5929_s30  ;;  %v7074_v27 = vsel %vm2452_vm7, %v2789_v17, %v2788_v21  ;;  %v3229_v11 = vrot.slane %v7041_v26, 4  ;;  %v2289_v15 = vmax.f32 %v2083_v41, 0.0  ;;  %v2086_v18 = vadd.f32 %v5261_v62, %v6636_v55  ;;  %2637 = vst.msk [vmem:[#allocation2 + $0x8] sm:$0xff] %vm1309_vm0, %v2590_v35  ;;  %v5710_v55 = vld [vmem:[%s8692_s3 + $0x10] ss:$8 sps:$4 sm:$0xff]  }
 0x212   :  { %2500 = vst.msk [vmem:[#allocation2] sm:$0xff] %vm1309_vm0, %v2453_v52  ;;  %v3093_v9 = vrot.slane %v7041_v26, 2  ;;  %v7088_v21 = vsel %vm2452_vm7, %v7041_v26, %v3501_v29  ;;  %v3365_v19 = vrot.slane %v7041_v26, 6  ;;  %v2861_v58 = vrot.slane %v7033_v14, 7  ;;  %4379 = vmatprep.subr.bf16.mxu1 %v5712_v39 }
 0x213   :  { %8751 = vst [vmem:[#allocation37_spill] sm:$0xff] %v7088_v21  ;;  %v7094_v1 = vsel %vm2452_vm7, %v3229_v11, %v3228_v8  ;;  %v2724_v43 = vsel %vm2449_vm6, %v2723_v31, %v2722_v30  ;;  %v7099_v33 = vmin.f32 %v2289_v15, 6.0  ;;  %v2290_v46 = vmax.f32 %v2086_v18, 0.0  ;;  %4380 = vmatpush1.bf16.msra.mxu1 %v5710_v55 }
 0x214   :  { %8752 = vst [vmem:[#allocation38_spill] sm:$0xff] %v7094_v1  ;;  %v7102_v29 = vsel %vm2452_vm7, %v3093_v9, %v3092_v42  ;;  %v2725_v50 = vrot.slane %v7033_v14, 5  ;;  %v1801_v17 = vpop.f32.mrb[36].mxu0  ;;  %v7106_v62 = vsel %vm2452_vm7, %v3365_v19, %v3364_v10  ;;  %v2862_v8 = vsel %vm2452_vm7, %v2861_v58, %v2860_v7  ;;  %v5715_v10 = vld [vmem:[%s8692_s3 + $0x24] ss:$8 sps:$4 sm:$0xff]  }
 0x215   :  { %8753 = vst [vmem:[#allocation39_spill] sm:$0xff] %v7102_v29  ;;  %8754 = vst [vmem:[#allocation40_spill] sm:$0xff] %v7106_v62  ;;  %v8755_v41 = vrot.slane %v6964_v38, 5  ;;  %v3163_v30 = vrot.slane %v7007_v25, 4  ;;  %v7113_v31 = vmin.f32 %v2290_v46, 6.0  ;;  %v5262_v6 = vadd.f32 %v6707_v57, %v1801_v17  ;;  %v1803_v42 = vpop.f32.mrb[37].mxu0  ;;  %4381 = vmatprep.subr.bf16.mxu1 %v5715_v10 }
 0x216   :  { %v2655_v37 = vrot.slane %v7099_v33, 3  ;;  %v2518_v14 = vrot.slane %v7099_v33, 1  ;;  %2909 = vst.msk [vmem:[#allocation2 + $0x18] sm:$0xff] %vm1309_vm0, %v2862_v8  ;;  %v1804_v7 = vpop.f32.mrb[38].mxu0  ;;  %v2591_v34 = vrot.slane %v7099_v33, 2  ;;  %v2927_v35 = vrot.slane %v7099_v33, 7 }
 0x217   :  { %v3162_v5 = vsel %vm2446_vm5, %v8755_v41, %v3160_v40  ;;  %8756 = vst [vmem:[#allocation41_spill] sm:$0xff] %v7113_v31  ;;  %v5713_v40 = vld [vmem:[%s8692_s3 + $0x20] ss:$8 sps:$4 sm:$0xff]   ;;  %v2726_v11 = vsel %vm2452_vm7, %v2725_v50, %v2724_v43  ;;  %v2091_v15 = vadd.f32 %v5262_v6, %v6627_v49  ;;  %v5263_v18 = vadd.f32 %v6707_v57, %v1804_v7  ;;  %v1806_v39 = vpop.f32.mrb[39].mxu0  ;;  %v5718_v17 = vld [vmem:[%s8692_s3 + $0x34] ss:$8 sps:$4 sm:$0xff]  }
 0x218   :  { %v3095_v55 = vrot.slane %v7113_v31, 1  ;;  %2773 = vst.msk [vmem:[#allocation2 + $0x10] sm:$0xff] %vm1309_vm0, %v2726_v11  ;;  %v3164_v46 = vsel %vm2449_vm6, %v3163_v30, %v3162_v5  ;;  %v3165_v43 = vrot.slane %v7041_v26, 3  ;;  %v8757_v8 = vrot.slane %v6828_v54, 7  ;;  %4382 = vmatpush1.bf16.msra.mxu1 %v5713_v40  ;;  %v5716_v5 = vld [vmem:[%s8692_s3 + $0x30] ss:$8 sps:$4 sm:$0xff]  }
 0x219   :  { %v2291_v50 = vmax.f32 %v2091_v15, 0.0  ;;  %v2094_v49 = vadd.f32 %v5263_v18, %v6634_v53  ;;  %v3019_v6 = vrot.slane %v6864_v44, 6  ;;  %v3021_v53 = vrot.slane %v6895_v60, 5  ;;  %4383 = vmatprep.subr.bf16.mxu1 %v5718_v17 }
 0x21a   :  { %v3018_v41 = vsel %vm2434_vm1, %v8757_v8, %v6796_v4  ;;  %v3166_v30 = vsel %vm2452_vm7, %v3165_v43, %v3164_v46  ;;  %v3023_v42 = vrot.slane %v6937_v12, 4  ;;  %v3025_v10 = vrot.slane %v6964_v38, 3 }
 0x21b   :  { %v7154_v7 = vmin.f32 %v2291_v50, 6.0  ;;  %v2292_v11 = vmax.f32 %v2094_v49, 0.0  ;;  %3213 = vst.msk [vmem:[#allocation2 + $0x28] sm:$0xff] %vm1309_vm0, %v3166_v30  ;;  %v3020_v40 = vsel %vm2437_vm2, %v3019_v6, %v3018_v41  ;;  %v3027_v15 = vrot.slane %v7007_v25, 2  ;;  %v7171_v6 = vpop.f32.mrb[88].mxu1 }
 0x21c   :  { %v1809_v18 = vpop.f32.mrb[40].mxu0  ;;  %v3022_v39 = vsel %vm2440_vm3, %v3021_v53, %v3020_v40  ;;  %v3029_v46 = vrot.slane %v7041_v26, 1  ;;  %v3426_v43 = vrot.slane %v6828_v54, 5  ;;  %v3428_v8 = vrot.slane %v6864_v44, 4  ;;  %8759 = vst [vmem:[#allocation43_spill] sm:$0xff] %v7171_v6  ;;  %4384 = vmatpush1.bf16.msra.mxu1 %v5716_v5  ;;  %v7186_v5 = vpop.f32.mrb[89].mxu1 }
 0x21d   :  { %v7163_v58 = vmin.f32 %v2292_v11, 6.0  ;;  %v5264_v50 = vadd.f32 %v6707_v57, %v1809_v18  ;;  %v1811_v49 = vpop.f32.mrb[41].mxu0  ;;  %v2656_v17 = vrot.slane %v7154_v7, 2  ;;  %v7169_v41 = vsel %vm2434_vm1, %v7154_v7, %v2518_v14  ;;  %v5721_v30 = vld [vmem:[%s8692_s3 + $0x44] ss:$8 sps:$4 sm:$0xff]   ;;  %v7189_v29 = vpop.f32.mrb[90].mxu1 }
 0x21e   :  { %v1812_v53 = vpop.f32.mrb[42].mxu0  ;;  %v5719_v11 = vld [vmem:[%s8692_s3 + $0x40] ss:$8 sps:$4 sm:$0xff]   ;;  %v2592_v40 = vrot.slane %v7154_v7, 1  ;;  %v2454_v18 = vrot.slane %v7154_v7, 7  ;;  %v2928_v49 = vrot.slane %v7154_v7, 6  ;;  %v3024_v14 = vsel %vm2443_vm4, %v3023_v42, %v3022_v39  ;;  %4385 = vmatprep.subr.bf16.mxu1 %v5721_v30 }
 0x21f   :  { %8758 = vst [vmem:[#allocation42_spill] sm:$0xff] %v7163_v58  ;;  %v5265_v19 = vadd.f32 %v6707_v57, %v1812_v53  ;;  %v2099_v9 = vadd.f32 %v5264_v50, %v6652_v63  ;;  %v1814_v52 = vpop.f32.mrb[43].mxu0  ;;  %v2657_v62 = vsel %vm2434_vm1, %v2656_v17, %v2655_v37  ;;  %v2792_v21 = vrot.slane %v7154_v7, 4  ;;  %8760 = vst [vmem:[#allocation44_spill] sm:$0xff] %v7189_v29  ;;  %v7197_v37 = vpop.f32.mrb[91].mxu1 }
 0x220   :  { %v2593_v1 = vsel %vm2434_vm1, %v2592_v40, %v2591_v34  ;;  %v2455_v6 = vsel %vm2434_vm1, %v2454_v18, %v7099_v33  ;;  %v2929_v42 = vsel %vm2434_vm1, %v2928_v49, %v2927_v35  ;;  %v3232_v39 = vrot.slane %v7163_v58, 2  ;;  %8761 = vst [vmem:[#allocation45_spill] sm:$0xff] %v7197_v37  ;;  %v5724_v50 = vld [vmem:[%s8692_s3 + $0x54] ss:$8 sps:$4 sm:$0xff]   ;;  %4386 = vmatpush1.bf16.msra.mxu1 %v5719_v11  ;;  %v5722_v35 = vld [vmem:[%s8692_s3 + $0x50] ss:$8 sps:$4 sm:$0xff]  }
 0x221   :  { %v2293_v63 = vmax.f32 %v2099_v9, 0.0  ;;  %v2102_v52 = vadd.f32 %v5265_v19, %v6656_v3  ;;  %v8762_v17 = vrot.slane %v7099_v33, 5  ;;  %v3096_v30 = vsel %vm2434_vm1, %v7163_v58, %v3095_v55  ;;  %4387 = vmatprep.subr.bf16.mxu1 %v5724_v50 }
 0x222   :  { %v8763_v3 = vrot.slane %v7113_v31, 3  ;;  %v3504_v19 = vrot.slane %v7163_v58, 6  ;;  %v3368_v53 = vrot.slane %v7163_v58, 4  ;;  %v3026_v40 = vsel %vm2446_vm5, %v3025_v10, %v3024_v14 }
 0x223   :  { %v2793_v34 = vsel %vm2434_vm1, %v2792_v21, %v8762_v17  ;;  %v7216_v18 = vmin.f32 %v2293_v63, 6.0  ;;  %v2294_v21 = vmax.f32 %v2102_v52, 0.0  ;;  %v3028_v55 = vsel %vm2449_vm6, %v3027_v15, %v3026_v40 }
 0x224   :  { %v3233_v9 = vsel %vm2434_vm1, %v3232_v39, %v8763_v3  ;;  %v8765_v11 = vrot.slane %v6796_v4, 6  ;;  %v1817_v17 = vpop.f32.mrb[44].mxu0  ;;  %v8766_v29 = vrot.slane %v7113_v31, 7  ;;  %v8767_v3 = vrot.slane %v7113_v31, 5  ;;  %4388 = vmatpush1.bf16.msra.mxu1 %v5722_v35 }
 0x225   :  { %8764 = vst [vmem:[#allocation46_spill] sm:$0xff] %v7216_v18  ;;  %v3030_v10 = vsel %vm2452_vm7, %v3029_v46, %v3028_v55  ;;  %v7230_v63 = vmin.f32 %v2294_v21, 6.0  ;;  %v5266_v15 = vadd.f32 %v6707_v57, %v1817_v17  ;;  %v1819_v52 = vpop.f32.mrb[45].mxu0  ;;  %v2520_v50 = vrot.slane %v7216_v18, 7  ;;  %v5725_v46 = vld [vmem:[%s8692_s3 + $0x60] ss:$8 sps:$4 sm:$0xff]  }
 0x226   :  { %v3427_v49 = vsel %vm2434_vm1, %v3426_v43, %v8765_v11  ;;  %v3505_v39 = vsel %vm2434_vm1, %v3504_v19, %v8766_v29  ;;  %v3369_v58 = vsel %vm2434_vm1, %v3368_v53, %v8767_v3  ;;  %v2658_v43 = vrot.slane %v7216_v18, 1  ;;  %v5727_v29 = vld [vmem:[%s8692_s3 + $0x64] ss:$8 sps:$4 sm:$0xff]   ;;  %3077 = vst.msk [vmem:[#allocation2 + $0x20] sm:$0xff] %vm1309_vm0, %v3030_v10  ;;  %v1820_v19 = vpop.f32.mrb[46].mxu0 }
 0x227   :  { %v3429_v14 = vsel %vm2437_vm2, %v3428_v8, %v3427_v49  ;;  %8768 = vst [vmem:[#allocation47_spill] sm:$0xff] %v7230_v63  ;;  %v2594_v8 = vsel %vm2437_vm2, %v7216_v18, %v2593_v1  ;;  %v2456_v53 = vrot.slane %v7216_v18, 6  ;;  %v2930_v40 = vrot.slane %v7216_v18, 5  ;;  %v1822_v49 = vpop.f32.mrb[47].mxu0  ;;  %4389 = vmatprep.subr.bf16.mxu1 %v5727_v29 }
 0x228   :  { %v2794_v21 = vrot.slane %v7216_v18, 3  ;;  %v2107_v55 = vadd.f32 %v5266_v15, %v6647_v61  ;;  %v5267_v11 = vadd.f32 %v6707_v57, %v1820_v19  ;;  %v2659_v35 = vsel %vm2437_vm2, %v2658_v43, %v2657_v62  ;;  %4390 = vmatpush1.bf16.msra.mxu1 %v5725_v46  ;;  %v5730_v62 = vld [vmem:[%s8692_s3 + $0x74] ss:$8 sps:$4 sm:$0xff]  }
 0x229   :  { %v2521_v17 = vsel %vm2437_vm2, %v2520_v50, %v7169_v41  ;;  %v2457_v3 = vsel %vm2437_vm2, %v2456_v53, %v2455_v6  ;;  %v2931_v1 = vsel %vm2437_vm2, %v2930_v40, %v2929_v42  ;;  %v3234_v52 = vrot.slane %v7230_v63, 1  ;;  %v5728_v50 = vld [vmem:[%s8692_s3 + $0x70] ss:$8 sps:$4 sm:$0xff]   ;;  %4391 = vmatprep.subr.bf16.mxu1 %v5730_v62 }
 0x22a   :  { %v2795_v10 = vsel %vm2437_vm2, %v2794_v21, %v2793_v34  ;;  %v2295_v37 = vmax.f32 %v2107_v55, 0.0  ;;  %v2110_v61 = vadd.f32 %v5267_v11, %v6654_v2  ;;  %v3097_v15 = vrot.slane %v7230_v63, 7 }
 0x22b   :  { %v3506_v19 = vrot.slane %v7230_v63, 5  ;;  %v3235_v41 = vsel %vm2437_vm2, %v3234_v52, %v3233_v9  ;;  %v3370_v6 = vrot.slane %v7230_v63, 3  ;;  %v3430_v42 = vrot.slane %v6895_v60, 3  ;;  %v7285_v52 = vpop.f32.mrb[92].mxu1 }
 0x22c   :  { %v3432_v34 = vrot.slane %v6937_v12, 2  ;;  %v7266_v43 = vmin.f32 %v2295_v37, 6.0  ;;  %v2296_v2 = vmax.f32 %v2110_v61, 0.0  ;;  %v3098_v29 = vsel %vm2437_vm2, %v3097_v15, %v3096_v30  ;;  %v1825_v53 = vpop.f32.mrb[48].mxu0  ;;  %4392 = vmatpush1.bf16.msra.mxu1 %v5728_v50  ;;  %v7302_v50 = vpop.f32.mrb[93].mxu1 }
 0x22d   :  { %v3507_v46 = vsel %vm2437_vm2, %v3506_v19, %v3505_v39  ;;  %v3371_v9 = vsel %vm2437_vm2, %v3370_v6, %v3369_v58  ;;  %v3431_v40 = vsel %vm2440_vm3, %v3430_v42, %v3429_v14  ;;  %v3434_v21 = vrot.slane %v6964_v38, 1  ;;  %v1827_v49 = vpop.f32.mrb[49].mxu0  ;;  %v5733_v14 = vld [vmem:[%s8692_s3 + $0x84] ss:$8 sps:$4 sm:$0xff]  }
 0x22e   :  { %8769 = vst [vmem:[#allocation48_spill] sm:$0xff] %v7266_v43  ;;  %v3437_v37 = vrot.slane %v7041_v26, 7  ;;  %v7277_v55 = vmin.f32 %v2296_v2, 6.0  ;;  %v5268_v11 = vadd.f32 %v6707_v57, %v1825_v53  ;;  %v7282_v30 = vsel %vm2440_vm3, %v7266_v43, %v2659_v35  ;;  %v1828_v58 = vpop.f32.mrb[50].mxu0  ;;  %v7297_v35 = vld [vmem:[%s8691_s2] ss:$0 sm:$0xff]  ;;  %4393 = vmatprep.subr.bf16.mxu1 %v5733_v14 }
 0x22f   :  { %v2522_v39 = vrot.slane %v7266_v43, 6  ;;  %v2595_v61 = vrot.slane %v7266_v43, 7  ;;  %v2458_v15 = vrot.slane %v7266_v43, 5  ;;  %v2932_v57 = vrot.slane %v7266_v43, 4  ;;  %v1830_v42 = vpop.f32.mrb[51].mxu0 }
 0x230   :  { %8770 = vst [vmem:[#allocation49_spill] sm:$0xff] %v7277_v55  ;;  %v3433_v19 = vsel %vm2443_vm4, %v3432_v34, %v3431_v40  ;;  %v5269_v62 = vadd.f32 %v7297_v35, %v1828_v58  ;;  %v2115_v6 = vadd.f32 %v5268_v11, %v6672_v20  ;;  %v5731_v53 = vld [vmem:[%s8692_s3 + $0x80] ss:$8 sps:$4 sm:$0xff]   ;;  %v2796_v34 = vrot.slane %v7266_v43, 2 }
 0x231   :  { %v2523_v2 = vsel %vm2440_vm3, %v2522_v39, %v2521_v17  ;;  %v2596_v40 = vsel %vm2440_vm3, %v2595_v61, %v2594_v8  ;;  %v2459_v49 = vsel %vm2440_vm3, %v2458_v15, %v2457_v3  ;;  %v2933_v58 = vsel %vm2440_vm3, %v2932_v57, %v2931_v1  ;;  %v7314_v39 = vpop.f32.mrb[94].mxu1  ;;  %4394 = vmatpush1.bf16.msra.mxu1 %v5731_v53  ;;  %v5736_v8 = vld [vmem:[%s8692_s3 + $0x94] ss:$8 sps:$4 sm:$0xff]   ;;  %v5734_v15 = vld [vmem:[%s8692_s3 + $0x90] ss:$8 sps:$4 sm:$0xff]  }
 0x232   :  { %v3236_v20 = vsel %vm2440_vm3, %v7277_v55, %v3235_v41  ;;  %v2297_v11 = vmax.f32 %v2115_v6, 0.0  ;;  %v2118_v17 = vadd.f32 %v5269_v62, %v6676_v23  ;;  %v2797_v42 = vsel %vm2440_vm3, %v2796_v34, %v2795_v10  ;;  %v7318_v14 = vpop.f32.mrb[95].mxu1  ;;  %4395 = vmatprep.subr.bf16.mxu1 %v5736_v8 }
 0x233   :  { %v3099_v63 = vrot.slane %v7277_v55, 6  ;;  %v3508_v3 = vrot.slane %v7277_v55, 4  ;;  %v3372_v1 = vrot.slane %v7277_v55, 2  ;;  %v3435_v41 = vsel %vm2446_vm5, %v3434_v21, %v3433_v19  ;;  %v8791_v55 = vld [vmem:[#allocation29_spill] sm:$0xff] }
 0x234   :  { %v3290_v23 = vrot.slane %v6828_v54, 3  ;;  %v7327_v61 = vmin.f32 %v2297_v11, 6.0  ;;  %v2298_v10 = vmax.f32 %v2118_v17, 0.0  ;;  %v3436_v62 = vsel %vm2449_vm6, %v7007_v25, %v3435_v41  ;;  %v1833_v6 = vpop.f32.mrb[52].mxu0 }
 0x235   :  { %v3100_v57 = vsel %vm2440_vm3, %v3099_v63, %v3098_v29  ;;  %v3509_v53 = vsel %vm2440_vm3, %v3508_v3, %v3507_v46  ;;  %v3373_v21 = vsel %vm2440_vm3, %v3372_v1, %v3371_v9  ;;  %v3438_v54 = vsel %vm2452_vm7, %v3437_v37, %v3436_v62  ;;  %v1835_v17 = vpop.f32.mrb[53].mxu0  ;;  %4396 = vmatpush1.bf16.msra.mxu1 %v5734_v15  ;;  %v5739_v46 = vld [vmem:[%s8692_s3 + $0xa4] ss:$8 sps:$4 sm:$0xff]  }
 0x236   :  { %8771 = vst [vmem:[#allocation50_spill] sm:$0xff] %v7327_v61  ;;  %v3289_v19 = vrot.slane %v6796_v4, 4  ;;  %v7339_v34 = vmin.f32 %v2298_v10, 6.0  ;;  %v5270_v11 = vadd.f32 %v7297_v35, %v1833_v6  ;;  %v2661_v63 = vrot.slane %v7327_v61, 7  ;;  %3485 = vst.msk [vmem:[#allocation2 + $0x38] sm:$0xff] %vm1309_vm0, %v3438_v54  ;;  %v1836_v8 = vpop.f32.mrb[54].mxu0  ;;  %4397 = vmatprep.subr.bf16.mxu1 %v5739_v46 }
 0x237   :  { %v2524_v29 = vrot.slane %v7327_v61, 5  ;;  %v2597_v9 = vrot.slane %v7327_v61, 6  ;;  %v2460_v4 = vrot.slane %v7327_v61, 4  ;;  %v2934_v37 = vrot.slane %v7327_v61, 3  ;;  %v1838_v10 = vpop.f32.mrb[55].mxu0 }
 0x238   :  { %8772 = vst [vmem:[#allocation51_spill] sm:$0xff] %v7339_v34  ;;  %v3291_v3 = vsel %vm2434_vm1, %v3290_v23, %v3289_v19  ;;  %v2123_v1 = vadd.f32 %v5270_v11, %v6667_v13  ;;  %v5271_v41 = vadd.f32 %v7297_v35, %v1836_v8  ;;  %v2662_v15 = vsel %vm2443_vm4, %v2661_v63, %v7282_v30  ;;  %v5737_v6 = vld [vmem:[%s8692_s3 + $0xa0] ss:$8 sps:$4 sm:$0xff]  }
 0x239   :  { %v2525_v62 = vsel %vm2443_vm4, %v2524_v29, %v2523_v2  ;;  %v2598_v54 = vsel %vm2443_vm4, %v2597_v9, %v2596_v40  ;;  %v2461_v17 = vsel %vm2443_vm4, %v2460_v4, %v2459_v49  ;;  %v2935_v23 = vsel %vm2443_vm4, %v2934_v37, %v2933_v58  ;;  %4398 = vmatpush1.bf16.msra.mxu1 %v5737_v6 }
 0x23a   :  { %v2798_v13 = vrot.slane %v7327_v61, 1  ;;  %v2299_v19 = vmax.f32 %v2123_v1, 0.0  ;;  %v2126_v11 = vadd.f32 %v5271_v41, %v6674_v22  ;;  %v3237_v30 = vrot.slane %v7339_v34, 7  ;;  %v5742_v22 = vld [vmem:[%s8692_s3 + $0xb4] ss:$8 sps:$4 sm:$0xff]  }
 0x23b   :  { %v3101_v2 = vrot.slane %v7339_v34, 5  ;;  %v3510_v29 = vrot.slane %v7339_v34, 3  ;;  %v3374_v40 = vrot.slane %v7339_v34, 1  ;;  %v3292_v49 = vrot.slane %v6864_v44, 2  ;;  %4399 = vmatprep.subr.bf16.mxu1 %v5742_v22  ;;  %v5745_v22 = vld [vmem:[%s8692_s3 + $0xc4] ss:$8 sps:$4 sm:$0xff]  }
 0x23c   :  { %v2799_v63 = vsel %vm2443_vm4, %v2798_v13, %v2797_v42  ;;  %v7371_v8 = vmin.f32 %v2299_v19, 6.0  ;;  %v2300_v58 = vmax.f32 %v2126_v11, 0.0  ;;  %v3238_v46 = vsel %vm2443_vm4, %v3237_v30, %v3236_v20  ;;  %v1841_v4 = vpop.f32.mrb[56].mxu0  ;;  %v5740_v42 = vld [vmem:[%s8692_s3 + $0xb0] ss:$8 sps:$4 sm:$0xff]   ;;  %v7390_v19 = vpop.f32.mrb[96].mxu1 }
 0x23d   :  { %v3102_v9 = vsel %vm2443_vm4, %v3101_v2, %v3100_v57  ;;  %v3511_v37 = vsel %vm2443_vm4, %v3510_v29, %v3509_v53  ;;  %v3375_v44 = vsel %vm2443_vm4, %v3374_v40, %v3373_v21  ;;  %v3293_v1 = vsel %vm2437_vm2, %v3292_v49, %v3291_v3  ;;  %v1843_v20 = vpop.f32.mrb[57].mxu0  ;;  %4400 = vmatpush1.bf16.msra.mxu1 %v5740_v42 }
 0x23e   :  { %8773 = vst [vmem:[#allocation52_spill] sm:$0xff] %v7371_v8  ;;  %v3294_v41 = vrot.slane %v6895_v60, 1  ;;  %v7385_v10 = vmin.f32 %v2300_v58, 6.0  ;;  %v5272_v6 = vadd.f32 %v7297_v35, %v1841_v4  ;;  %v2663_v57 = vrot.slane %v7371_v8, 6  ;;  %v1844_v11 = vpop.f32.mrb[58].mxu0  ;;  %v7401_v58 = vpop.f32.mrb[97].mxu1  ;;  %4401 = vmatprep.subr.bf16.mxu1 %v5745_v22 }
 0x23f   :  { %v2526_v13 = vrot.slane %v7371_v8, 4  ;;  %v2599_v53 = vrot.slane %v7371_v8, 5  ;;  %v2462_v21 = vrot.slane %v7371_v8, 3  ;;  %v2936_v60 = vrot.slane %v7371_v8, 2  ;;  %v1846_v29 = vpop.f32.mrb[59].mxu0 }
 0x240   :  { %8774 = vst [vmem:[#allocation53_spill] sm:$0xff] %v7385_v10  ;;  %v2800_v3 = vsel %vm2446_vm5, %v7371_v8, %v2799_v63  ;;  %v5273_v30 = vadd.f32 %v7297_v35, %v1844_v11  ;;  %v2131_v2 = vadd.f32 %v5272_v6, %v6692_v45  ;;  %v2664_v40 = vsel %vm2446_vm5, %v2663_v57, %v2662_v15  ;;  %v5743_v4 = vld [vmem:[%s8692_s3 + $0xc0] ss:$8 sps:$4 sm:$0xff]  }
 0x241   :  { %v2527_v49 = vsel %vm2446_vm5, %v2526_v13, %v2525_v62  ;;  %v2600_v63 = vsel %vm2446_vm5, %v2599_v53, %v2598_v54  ;;  %v2463_v42 = vsel %vm2446_vm5, %v2462_v21, %v2461_v17  ;;  %v2937_v45 = vsel %vm2446_vm5, %v2936_v60, %v2935_v23  ;;  %v7416_v13 = vpop.f32.mrb[98].mxu1  ;;  %4402 = vmatpush1.bf16.msra.mxu1 %v5743_v4  ;;  %v5748_v60 = vld [vmem:[%s8692_s3 + $0xd4] ss:$8 sps:$4 sm:$0xff]  }
 0x242   :  { %v3239_v15 = vrot.slane %v7385_v10, 6  ;;  %v2301_v6 = vmax.f32 %v2131_v2, 0.0  ;;  %v2134_v62 = vadd.f32 %v5273_v30, %v6696_v48  ;;  %v3103_v20 = vrot.slane %v7385_v10, 4  ;;  %v7425_v21 = vpop.f32.mrb[99].mxu1  ;;  %4403 = vmatprep.subr.bf16.mxu1 %v5748_v60  ;;  %v5751_v60 = vld [vmem:[%s8692_s3 + $0xe4] ss:$8 sps:$4 sm:$0xff]  }
 0x243   :  { %v3512_v57 = vrot.slane %v7385_v10, 2  ;;  %v3376_v54 = vsel %vm2446_vm5, %v7385_v10, %v3375_v44  ;;  %v3295_v17 = vsel %vm2440_vm3, %v3294_v41, %v3293_v1  ;;  %v3297_v23 = vrot.slane %v6964_v38, 7  ;;  %v5746_v44 = vld [vmem:[%s8692_s3 + $0xd0] ss:$8 sps:$4 sm:$0xff]   ;;  %v5749_v10 = vld [vmem:[%s8692_s3 + $0xe0] ss:$8 sps:$4 sm:$0xff]  }
 0x244   :  { %v3240_v11 = vsel %vm2446_vm5, %v3239_v15, %v3238_v46  ;;  %v7423_v53 = vmin.f32 %v2301_v6, 6.0  ;;  %v2302_v48 = vmax.f32 %v2134_v62, 0.0  ;;  %v3104_v30 = vsel %vm2446_vm5, %v3103_v20, %v3102_v9  ;;  %v1849_v2 = vpop.f32.mrb[60].mxu0 }
 0x245   :  { %v3513_v46 = vsel %vm2446_vm5, %v3512_v57, %v3511_v37  ;;  %v3296_v38 = vsel %vm2443_vm4, %v6937_v12, %v3295_v17  ;;  %v3299_v1 = vrot.slane %v7007_v25, 6  ;;  %v2863_v29 = vrot.slane %v7099_v33, 6  ;;  %v1851_v4 = vpop.f32.mrb[61].mxu0  ;;  %4404 = vmatpush1.bf16.msra.mxu1 %v5746_v44 }
 0x246   :  { %v7440_v22 = vmin.f32 %v2302_v48, 6.0  ;;  %v5274_v9 = vadd.f32 %v7297_v35, %v1849_v2  ;;  %v2665_v37 = vrot.slane %v7423_v53, 5  ;;  %v2528_v15 = vrot.slane %v7423_v53, 3  ;;  %v1852_v6 = vpop.f32.mrb[62].mxu0  ;;  %4405 = vmatprep.subr.bf16.mxu1 %v5751_v60 }
 0x247   :  { %v2601_v62 = vrot.slane %v7423_v53, 4  ;;  %v2464_v12 = vrot.slane %v7423_v53, 2  ;;  %v2938_v25 = vrot.slane %v7423_v53, 1  ;;  %v2801_v20 = vrot.slane %v7423_v53, 7  ;;  %v1854_v48 = vpop.f32.mrb[63].mxu0 }
 0x248   :  { %8775 = vst [vmem:[#allocation54_spill] sm:$0xff] %v7440_v22  ;;  %v2139_v57 = vadd.f32 %v5274_v9, %v6687_v36  ;;  %v5275_v17 = vadd.f32 %v7297_v35, %v1852_v6  ;;  %v2666_v2 = vsel %vm2449_vm6, %v2665_v37, %v2664_v40  ;;  %v2529_v4 = vsel %vm2449_vm6, %v2528_v15, %v2527_v49 }
 0x249   :  { %v2602_v41 = vsel %vm2449_vm6, %v2601_v62, %v2600_v63  ;;  %v2465_v44 = vsel %vm2449_vm6, %v2464_v12, %v2463_v42  ;;  %v2939_v36 = vsel %vm2449_vm6, %v2938_v25, %v2937_v45  ;;  %v2802_v9 = vsel %vm2449_vm6, %v2801_v20, %v2800_v3  ;;  %4406 = vmatpush1.bf16.msra.mxu1 %v5749_v10  ;;  %v5752_v20 = vld [vmem:[%s8692_s3 + $0xf0] ss:$8 sps:$4 sm:$0xff]  }
 0x24a   :  { %v2303_v6 = vmax.f32 %v2139_v57, 0.0  ;;  %v2142_v40 = vadd.f32 %v5275_v17, %v6694_v47  ;;  %v3241_v49 = vrot.slane %v7440_v22, 5  ;;  %v3105_v37 = vrot.slane %v7440_v22, 3  ;;  %v5754_v47 = vld [vmem:[%s8692_s3 + $0xf4] ss:$8 sps:$4 sm:$0xff]  }
 0x24b   :  { %v3514_v63 = vrot.slane %v7440_v22, 1  ;;  %v3377_v42 = vrot.slane %v7440_v22, 7  ;;  %v3298_v15 = vsel %vm2446_vm5, %v3297_v23, %v3296_v38  ;;  %v2864_v62 = vrot.slane %v7154_v7, 5  ;;  %4407 = vmatprep.subr.bf16.mxu1 %v5754_v47 }
 0x24c   :  { %v7470_v45 = vmin.f32 %v2303_v6, 6.0  ;;  %v2304_v3 = vmax.f32 %v2142_v40, 0.0  ;;  %v3242_v12 = vsel %vm2449_vm6, %v3241_v49, %v3240_v11  ;;  %v3106_v25 = vsel %vm2449_vm6, %v3105_v37, %v3104_v30  ;;  %v1857_v10 = vpop.f32.mrb[64].mxu0  ;;  %v8778_v37 = vld [vmem:[#allocation7_spill] sm:$0xff] }
 0x24d   :  { %v3515_v23 = vsel %vm2449_vm6, %v3514_v63, %v3513_v46  ;;  %v3378_v38 = vsel %vm2449_vm6, %v3377_v42, %v3376_v54  ;;  %v3300_v57 = vsel %vm2449_vm6, %v3299_v1, %v3298_v15  ;;  %v2865_v17 = vsel %vm2434_vm1, %v2864_v62, %v2863_v29  ;;  %v1859_v11 = vpop.f32.mrb[65].mxu0  ;;  %4408 = vmatpush1.bf16.msra.mxu1 %v5752_v20 }
 0x24e   :  { %v7484_v48 = vmin.f32 %v2304_v3, 6.0  ;;  %v5276_v60 = vadd.f32 %v7297_v35, %v1857_v10  ;;  %v2667_v30 = vrot.slane %v7470_v45, 4  ;;  %v2530_v6 = vrot.slane %v7470_v45, 2  ;;  %v1860_v40 = vpop.f32.mrb[66].mxu0 }
 0x24f   :  { %v2603_v49 = vrot.slane %v7470_v45, 3  ;;  %v2466_v46 = vrot.slane %v7470_v45, 1  ;;  %v7493_v54 = vsel %vm2452_vm7, %v7470_v45, %v2939_v36  ;;  %v2803_v1 = vrot.slane %v7470_v45, 6  ;;  %v1862_v42 = vpop.f32.mrb[67].mxu0 }
 0x250   :  { %8776 = vst [vmem:[#allocation55_spill] sm:$0xff] %v7484_v48  ;;  %8777 = vst [vmem:[#allocation56_spill] sm:$0xff] %v7493_v54  ;;  %v5277_v29 = vadd.f32 %v7297_v35, %v1860_v40  ;;  %v2147_v63 = vadd.f32 %v5276_v60, %v8778_v37  ;;  %v2668_v15 = vsel %vm2452_vm7, %v2667_v30, %v2666_v2  ;;  %v3243_v10 = vrot.slane %v7484_v48, 4 }
 0x251   :  { %v2531_v62 = vsel %vm2452_vm7, %v2530_v6, %v2529_v4  ;;  %2699 = vrot.lane.b32.xlu0 %v2668_v15, %s5929_s30  ;;  %v2604_v3 = vsel %vm2452_vm7, %v2603_v49, %v2602_v41  ;;  %v2467_v36 = vsel %vm2452_vm7, %v2466_v46, %v2465_v44  ;;  %v7505_v47 = vsel %vm2452_vm7, %v2803_v1, %v2802_v9 }
 0x252   :  { %2562 = vrot.lane.b32.xlu1 %v2531_v62, %s5929_s30  ;;  %8779 = vst [vmem:[#allocation7_spill] sm:$0xff] %v7505_v47  ;;  %v2305_v20 = vmax.f32 %v2147_v63, 0.0  ;;  %v2150_v60 = vadd.f32 %v5277_v29, %v6724_v59  ;;  %2638 = vst.msk [vmem:[#allocation2 + $0x48] sm:$0xff] %vm1309_vm0, %v2604_v3  ;;  %v3107_v2 = vrot.slane %v7484_v48, 2  ;;  %v7514_v4 = vsel %vm2452_vm7, %v7484_v48, %v3515_v23  ;;  %v8785_v3 = vld [vmem:[#allocation6_spill] sm:$0xff] }
 0x253   :  { %2501 = vst.msk [vmem:[#allocation2 + $0x40] sm:$0xff] %vm1309_vm0, %v2467_v36  ;;  %8780 = vst [vmem:[#allocation57_spill] sm:$0xff] %v7514_v4  ;;  %v7517_v41 = vsel %vm2452_vm7, %v3243_v10, %v3242_v12  ;;  %v3379_v44 = vrot.slane %v7484_v48, 6  ;;  %v8782_v9 = vrot.slane %v7041_v26, 5  ;;  %v2866_v59 = vrot.slane %v7216_v18, 4  ;;  %v8789_v47 = vld [vmem:[#allocation30_spill] sm:$0xff] }
 0x254   :  { %8781 = vst [vmem:[#allocation58_spill] sm:$0xff] %v7517_v41  ;;  %v7524_v30 = vmin.f32 %v2305_v20, 6.0  ;;  %v2306_v6 = vmax.f32 %v2150_v60, 0.0  ;;  %v7527_v40 = vsel %vm2452_vm7, %v3107_v2, %v3106_v25  ;;  %v2868_v23 = vrot.slane %v7266_v43, 3  ;;  %v1865_v12 = vpop.f32.mrb[68].mxu0  ;;  %v8801_v18 = vld [vmem:[#allocation35_spill] sm:$0xff] }
 0x255   :  { %v3302_v11 = vsel %vm2452_vm7, %v8782_v9, %v3300_v57  ;;  %8783 = vst [vmem:[#allocation59_spill] sm:$0xff] %v7527_v40  ;;  %v7532_v49 = vsel %vm2452_vm7, %v3379_v44, %v3378_v38  ;;  %v2867_v26 = vsel %vm2437_vm2, %v2866_v59, %v2865_v17  ;;  %v2870_v57 = vrot.slane %v7327_v61, 2  ;;  %v1867_v25 = vpop.f32.mrb[69].mxu0 }
 0x256   :  { %3349 = vst.msk [vmem:[#allocation2 + $0x30] sm:$0xff] %vm1309_vm0, %v3302_v11  ;;  %8784 = vst [vmem:[#allocation60_spill] sm:$0xff] %v7532_v49  ;;  %v2872_v46 = vrot.slane %v7371_v8, 1  ;;  %v7537_v1 = vmin.f32 %v2306_v6, 6.0  ;;  %v5278_v29 = vadd.f32 %v7297_v35, %v1865_v12  ;;  %v2669_v37 = vrot.slane %v7524_v30, 3  ;;  %v1868_v42 = vpop.f32.mrb[70].mxu0 }
 0x257   :  { %v2532_v63 = vrot.slane %v7524_v30, 1  ;;  %v2941_v15 = vrot.slane %v7524_v30, 7  ;;  %v2805_v38 = vrot.slane %v7524_v30, 5  ;;  %v2605_v17 = vrot.slane %v7524_v30, 2  ;;  %v1870_v20 = vpop.f32.mrb[71].mxu0  ;;  %v8786_v12 = vld [vmem:[#allocation8_spill] sm:$0xff] }
 0x258   :  { %v2877_v62 = vrot.slane %v7524_v30, 6  ;;  %v2155_v36 = vadd.f32 %v5278_v29, %v8785_v3  ;;  %v5279_v10 = vadd.f32 %v7297_v35, %v1868_v42  ;;  %v3245_v60 = vrot.slane %v7537_v1, 3  ;;  %v8795_v8 = vld [vmem:[#allocation32_spill] sm:$0xff] }
 0x259   :  { %v3109_v2 = vrot.slane %v7537_v1, 1  ;;  %v3517_v44 = vrot.slane %v7537_v1, 7  ;;  %v3381_v9 = vrot.slane %v7537_v1, 5  ;;  %v2869_v3 = vsel %vm2440_vm3, %v2868_v23, %v2867_v26 }
 0x25a   :  { %v2307_v6 = vmax.f32 %v2155_v36, 0.0  ;;  %v2158_v25 = vadd.f32 %v5279_v10, %v8786_v12  ;;  %v2727_v49 = vrot.slane %v7099_v33, 4  ;;  %v2728_v4 = vrot.slane %v7154_v7, 3  ;;  %v8788_v33 = vld [vmem:[#allocation28_spill] sm:$0xff] }
 0x25b   :  { %v2871_v59 = vsel %vm2443_vm4, %v2870_v57, %v2869_v3 }
 0x25c   :  { %v7561_v40 = vmin.f32 %v2307_v6, 6.0  ;;  %v2308_v11 = vmax.f32 %v2158_v25, 0.0  ;;  %v1873_v10 = vpop.f32.mrb[72].mxu0  ;;  %v7566_v12 = vsel %vm2446_vm5, %v2872_v46, %v2871_v59  ;;  %v7569_v42 = vsel %vm2434_vm1, %v2728_v4, %v2727_v49 }
 0x25d   :  { %8787 = vst [vmem:[#allocation6_spill] sm:$0xff] %v7569_v42  ;;  %v5280_v7 = vadd.f32 %v7297_v35, %v1873_v10  ;;  %v1875_v6 = vpop.f32.mrb[73].mxu0 }
 0x25e   :  { %v7573_v26 = vmin.f32 %v2308_v11, 6.0  ;;  %v2670_v57 = vrot.slane %v7561_v40, 2  ;;  %v2533_v25 = vsel %vm2434_vm1, %v7561_v40, %v2532_v63  ;;  %v1876_v3 = vpop.f32.mrb[74].mxu0  ;;  %v2942_v46 = vrot.slane %v7561_v40, 6 }
 0x25f   :  { %v2806_v4 = vrot.slane %v7561_v40, 4  ;;  %v2606_v49 = vrot.slane %v7561_v40, 1  ;;  %v2468_v59 = vrot.slane %v7561_v40, 7  ;;  %v5281_v11 = vadd.f32 %v7297_v35, %v1876_v3  ;;  %v1878_v10 = vpop.f32.mrb[75].mxu0 }
 0x260   :  { %v2163_v23 = vadd.f32 %v5280_v7, %v8788_v33  ;;  %v2671_v6 = vsel %vm2434_vm1, %v2670_v57, %v2669_v37  ;;  %v3246_v36 = vrot.slane %v7573_v26, 2  ;;  %v2943_v63 = vsel %vm2434_vm1, %v2942_v46, %v2941_v15  ;;  %v8790_v10 = vld [vmem:[#allocation27_spill] sm:$0xff] }
 0x261   :  { %v2807_v20 = vsel %vm2434_vm1, %v2806_v4, %v2805_v38  ;;  %v3110_v29 = vsel %vm2434_vm1, %v7573_v26, %v3109_v2  ;;  %v3518_v41 = vrot.slane %v7573_v26, 6  ;;  %v2166_v22 = vadd.f32 %v5281_v11, %v8789_v47 }
 0x262   :  { %v2309_v48 = vmax.f32 %v2163_v23, 0.0  ;;  %v3247_v3 = vsel %vm2434_vm1, %v3246_v36, %v3245_v60  ;;  %v3382_v33 = vrot.slane %v7573_v26, 4  ;;  %v2607_v7 = vsel %vm2434_vm1, %v2606_v49, %v2605_v17 }
 0x263   :  { %v3519_v37 = vsel %vm2434_vm1, %v3518_v41, %v3517_v44  ;;  %v2469_v15 = vsel %vm2434_vm1, %v2468_v59, %v7524_v30  ;;  %v2878_v38 = vrot.slane %v7561_v40, 5  ;;  %v2310_v2 = vmax.f32 %v2166_v22, 0.0 }
 0x264   :  { %v7600_v57 = vmin.f32 %v2309_v48, 6.0  ;;  %v3383_v23 = vsel %vm2434_vm1, %v3382_v33, %v3381_v9  ;;  %v2742_v47 = vrot.slane %v7561_v40, 3  ;;  %v1881_v46 = vpop.f32.mrb[76].mxu0  ;;  %v3182_v36 = vrot.slane %v7573_v26, 1 }
 0x265   :  { %v2879_v60 = vsel %vm2434_vm1, %v2878_v38, %v2877_v62  ;;  %v7608_v44 = vmin.f32 %v2310_v2, 6.0  ;;  %v5282_v4 = vadd.f32 %v7297_v35, %v1881_v46  ;;  %v1883_v48 = vpop.f32.mrb[77].mxu0 }
 0x266   :  { %v2672_v22 = vrot.slane %v7600_v57, 1  ;;  %v2534_v9 = vrot.slane %v7600_v57, 7  ;;  %v1884_v49 = vpop.f32.mrb[78].mxu0  ;;  %v2944_v40 = vrot.slane %v7600_v57, 5  ;;  %v2808_v62 = vrot.slane %v7600_v57, 3 }
 0x267   :  { %v2608_v59 = vsel %vm2437_vm2, %v7600_v57, %v2607_v7  ;;  %v2470_v11 = vrot.slane %v7600_v57, 6  ;;  %v2171_v33 = vadd.f32 %v5282_v4, %v8790_v10  ;;  %v5283_v38 = vadd.f32 %v7297_v35, %v1884_v49  ;;  %v1886_v2 = vpop.f32.mrb[79].mxu0 }
 0x268   :  { %v2673_v46 = vsel %vm2437_vm2, %v2672_v22, %v2671_v6  ;;  %v2535_v48 = vsel %vm2437_vm2, %v2534_v9, %v2533_v25  ;;  %v2945_v17 = vsel %vm2437_vm2, %v2944_v40, %v2943_v63  ;;  %v2809_v41 = vsel %vm2437_vm2, %v2808_v62, %v2807_v20 }
 0x269   :  { %v3248_v31 = vrot.slane %v7608_v44, 1  ;;  %v3111_v34 = vrot.slane %v7608_v44, 7  ;;  %v2311_v7 = vmax.f32 %v2171_v33, 0.0  ;;  %v2174_v54 = vadd.f32 %v5283_v38, %v8791_v55 }
 0x26a   :  { %v3520_v4 = vrot.slane %v7608_v44, 5  ;;  %v3384_v49 = vrot.slane %v7608_v44, 3  ;;  %v2471_v25 = vsel %vm2437_vm2, %v2470_v11, %v2469_v15  ;;  %v2880_v63 = vrot.slane %v7600_v57, 4 }
 0x26b   :  { %v3249_v10 = vsel %vm2437_vm2, %v3248_v31, %v3247_v3  ;;  %v3112_v6 = vsel %vm2437_vm2, %v3111_v34, %v3110_v29  ;;  %v7633_v20 = vmin.f32 %v2311_v7, 6.0  ;;  %v2312_v22 = vmax.f32 %v2174_v54, 0.0 }
 0x26c   :  { %v3521_v9 = vsel %vm2437_vm2, %v3520_v4, %v3519_v37  ;;  %v3385_v40 = vsel %vm2437_vm2, %v3384_v49, %v3383_v23  ;;  %v1889_v55 = vpop.f32.mrb[80].mxu0  ;;  %v2881_v62 = vsel %vm2437_vm2, %v2880_v63, %v2879_v60  ;;  %v8792_v33 = vrot.slane %v7524_v30, 4 }
 0x26d   :  { %v2744_v34 = vrot.slane %v7600_v57, 2  ;;  %v8793_v29 = vrot.slane %v7537_v1, 2  ;;  %v7645_v15 = vmin.f32 %v2312_v22, 6.0  ;;  %v5284_v54 = vadd.f32 %v7297_v35, %v1889_v55  ;;  %v1891_v37 = vpop.f32.mrb[81].mxu0 }
 0x26e   :  { %v2743_v31 = vsel %vm2434_vm1, %v2742_v47, %v8792_v33  ;;  %v2674_v23 = vsel %vm2440_vm3, %v7633_v20, %v2673_v46  ;;  %v2536_v60 = vrot.slane %v7633_v20, 6  ;;  %v1892_v11 = vpop.f32.mrb[82].mxu0  ;;  %v2946_v30 = vrot.slane %v7633_v20, 4 }
 0x26f   :  { %v3183_v3 = vsel %vm2434_vm1, %v3182_v36, %v8793_v29  ;;  %v2810_v47 = vrot.slane %v7633_v20, 2  ;;  %v2609_v57 = vrot.slane %v7633_v20, 7  ;;  %v2472_v38 = vrot.slane %v7633_v20, 5  ;;  %v1894_v7 = vpop.f32.mrb[83].mxu0 }
 0x270   :  { %v5285_v36 = vadd.f32 %v7297_v35, %v1892_v11  ;;  %v2179_v2 = vadd.f32 %v5284_v54, %v6904_v24  ;;  %v2537_v4 = vsel %vm2440_vm3, %v2536_v60, %v2535_v48  ;;  %v3250_v46 = vsel %vm2440_vm3, %v7645_v15, %v3249_v10 }
 0x271   :  { %v2947_v49 = vsel %vm2440_vm3, %v2946_v30, %v2945_v17  ;;  %v2811_v63 = vsel %vm2440_vm3, %v2810_v47, %v2809_v41  ;;  %v3113_v22 = vrot.slane %v7645_v15, 6  ;;  %v3522_v55 = vrot.slane %v7645_v15, 4 }
 0x272   :  { %v2313_v33 = vmax.f32 %v2179_v2, 0.0  ;;  %v2182_v29 = vadd.f32 %v5285_v36, %v6916_v51  ;;  %v3386_v37 = vrot.slane %v7645_v15, 2  ;;  %v2610_v24 = vsel %vm2440_vm3, %v2609_v57, %v2608_v59  ;;  %v8794_v2 = vld [vmem:[#allocation31_spill] sm:$0xff] }
 0x273   :  { %v3114_v48 = vsel %vm2440_vm3, %v3113_v22, %v3112_v6  ;;  %v3523_v54 = vsel %vm2440_vm3, %v3522_v55, %v3521_v9  ;;  %v2473_v10 = vsel %vm2440_vm3, %v2472_v38, %v2471_v25  ;;  %v2882_v17 = vrot.slane %v7633_v20, 3 }
 0x274   :  { %v7671_v41 = vmin.f32 %v2313_v33, 6.0  ;;  %v2314_v60 = vmax.f32 %v2182_v29, 0.0  ;;  %v3387_v11 = vsel %vm2440_vm3, %v3386_v37, %v3385_v40  ;;  %v2745_v30 = vsel %vm2437_vm2, %v2744_v34, %v2743_v31  ;;  %v1897_v51 = vpop.f32.mrb[84].mxu0 }
 0x275   :  { %v7676_v47 = vsel %vm2440_vm3, %v2882_v17, %v2881_v62  ;;  %v2746_v59 = vrot.slane %v7633_v20, 1  ;;  %v3184_v6 = vsel %vm2437_vm2, %v7608_v44, %v3183_v3  ;;  %v3185_v25 = vrot.slane %v7645_v15, 7  ;;  %v1899_v38 = vpop.f32.mrb[85].mxu0 }
 0x276   :  { %v7682_v9 = vmin.f32 %v2314_v60, 6.0  ;;  %v5286_v57 = vadd.f32 %v7297_v35, %v1897_v51  ;;  %v2675_v40 = vrot.slane %v7671_v41, 7  ;;  %v2538_v31 = vrot.slane %v7671_v41, 5  ;;  %v1900_v34 = vpop.f32.mrb[86].mxu0 }
 0x277   :  { %v2948_v62 = vrot.slane %v7671_v41, 3  ;;  %v2812_v36 = vrot.slane %v7671_v41, 1  ;;  %v2611_v20 = vrot.slane %v7671_v41, 6  ;;  %v2474_v3 = vrot.slane %v7671_v41, 4  ;;  %v1902_v55 = vpop.f32.mrb[87].mxu0 }
 0x278   :  { %v2187_v7 = vadd.f32 %v5286_v57, %v8794_v2  ;;  %v5287_v22 = vadd.f32 %v7297_v35, %v1900_v34  ;;  %v2676_v33 = vsel %vm2443_vm4, %v2675_v40, %v2674_v23  ;;  %v2539_v29 = vsel %vm2443_vm4, %v2538_v31, %v2537_v4 }
 0x279   :  { %v2949_v37 = vsel %vm2443_vm4, %v2948_v62, %v2947_v49  ;;  %v2813_v17 = vsel %vm2443_vm4, %v2812_v36, %v2811_v63  ;;  %v3251_v60 = vrot.slane %v7682_v9, 7  ;;  %v3115_v51 = vrot.slane %v7682_v9, 5 }
 0x27a   :  { %v2315_v38 = vmax.f32 %v2187_v7, 0.0  ;;  %v2190_v61 = vadd.f32 %v5287_v22, %v8795_v8  ;;  %v3524_v57 = vrot.slane %v7682_v9, 3  ;;  %v3388_v34 = vrot.slane %v7682_v9, 1 }
 0x27b   :  { %v3252_v23 = vsel %vm2443_vm4, %v3251_v60, %v3250_v46  ;;  %v3116_v4 = vsel %vm2443_vm4, %v3115_v51, %v3114_v48  ;;  %v2612_v40 = vsel %vm2443_vm4, %v2611_v20, %v2610_v24  ;;  %v2475_v49 = vsel %vm2443_vm4, %v2474_v3, %v2473_v10 }
 0x27c   :  { %v7706_v63 = vmin.f32 %v2315_v38, 6.0  ;;  %v2316_v31 = vmax.f32 %v2190_v61, 0.0  ;;  %v3525_v62 = vsel %vm2443_vm4, %v3524_v57, %v3523_v54  ;;  %v3389_v36 = vsel %vm2443_vm4, %v3388_v34, %v3387_v11  ;;  %v1905_v8 = vpop.f32.mrb[88].mxu0 }
 0x27d   :  { %v2884_v2 = vrot.slane %v7671_v41, 2  ;;  %v2747_v7 = vsel %vm2440_vm3, %v2746_v59, %v2745_v30  ;;  %v3186_v46 = vsel %vm2440_vm3, %v3185_v25, %v3184_v6  ;;  %v3187_v48 = vrot.slane %v7682_v9, 6  ;;  %v1907_v10 = vpop.f32.mrb[89].mxu0  ;;  %v8796_v25 = vld [vmem:[#allocation34_spill] sm:$0xff] }
 0x27e   :  { %v7714_v22 = vmin.f32 %v2316_v31, 6.0  ;;  %v5288_v24 = vadd.f32 %v7297_v35, %v1905_v8  ;;  %v2677_v61 = vrot.slane %v7706_v63, 6  ;;  %v2540_v54 = vrot.slane %v7706_v63, 4  ;;  %v1908_v20 = vpop.f32.mrb[90].mxu0  ;;  %v8797_v10 = vld [vmem:[#allocation36_spill] sm:$0xff] }
 0x27f   :  { %v2950_v11 = vrot.slane %v7706_v63, 2  ;;  %v2814_v3 = vsel %vm2446_vm5, %v7706_v63, %v2813_v17  ;;  %v2613_v30 = vrot.slane %v7706_v63, 5  ;;  %v2476_v59 = vrot.slane %v7706_v63, 3  ;;  %v1910_v60 = vpop.f32.mrb[91].mxu0 }
 0x280   :  { %v5289_v6 = vadd.f32 %v7297_v35, %v1908_v20  ;;  %v2195_v55 = vadd.f32 %v5288_v24, %v8796_v25  ;;  %v2678_v51 = vsel %vm2446_vm5, %v2677_v61, %v2676_v33  ;;  %v2541_v38 = vsel %vm2446_vm5, %v2540_v54, %v2539_v29 }
 0x281   :  { %v2951_v57 = vsel %vm2446_vm5, %v2950_v11, %v2949_v37  ;;  %v3253_v34 = vrot.slane %v7714_v22, 6  ;;  %v3117_v31 = vrot.slane %v7714_v22, 4  ;;  %v3526_v17 = vrot.slane %v7714_v22, 2 }
 0x282   :  { %v2317_v8 = vmax.f32 %v2195_v55, 0.0  ;;  %v2198_v43 = vadd.f32 %v5289_v6, %v8797_v10  ;;  %v3390_v35 = vsel %vm2446_vm5, %v7714_v22, %v3389_v36  ;;  %v2614_v24 = vsel %vm2446_vm5, %v2613_v30, %v2612_v40 }
 0x283   :  { %v2698_v20 = vpop.permute.xlu0 %2697  ;;  %v2561_v33 = vpop.permute.xlu1 %2560  ;;  %v3254_v29 = vsel %vm2446_vm5, %v3253_v34, %v3252_v23  ;;  %v3118_v37 = vsel %vm2446_vm5, %v3117_v31, %v3116_v4  ;;  %v3527_v61 = vsel %vm2446_vm5, %v3526_v17, %v3525_v62  ;;  %v2477_v54 = vsel %vm2446_vm5, %v2476_v59, %v2475_v49  ;;  %v8798_v59 = vld [vmem:[#allocation9_spill] sm:$0xff]  ;;  %v8800_v31 = vld [vmem:[#allocation10_spill] sm:$0xff] }
 0x284   :  { %v7740_v11 = vmin.f32 %v2317_v8, 6.0  ;;  %v2318_v25 = vmax.f32 %v2198_v43, 0.0  ;;  %2709 = vst.msk [vmem:[#allocation2 + $0x8] sm:$0xff] %vm2572_vm8, %v2698_v20  ;;  %2573 = vst.msk [vmem:[#allocation2] sm:$0xff] %vm2572_vm8, %v2561_v33  ;;  %v2885_v40 = vsel %vm2443_vm4, %v2884_v2, %v7676_v47  ;;  %v2886_v36 = vrot.slane %v7706_v63, 1  ;;  %v1913_v30 = vpop.f32.mrb[92].mxu0 }
 0x285   :  { %v2748_v23 = vsel %vm2443_vm4, %v7671_v41, %v2747_v7  ;;  %v2749_v4 = vrot.slane %v7706_v63, 7  ;;  %v3188_v49 = vsel %vm2443_vm4, %v3187_v48, %v3186_v46  ;;  %v3189_v62 = vrot.slane %v7714_v22, 5  ;;  %v1915_v55 = vpop.f32.mrb[93].mxu0  ;;  %v8799_v46 = vld [vmem:[#allocation33_spill] sm:$0xff] }
 0x286   :  { %v7752_v43 = vmin.f32 %v2318_v25, 6.0  ;;  %v1914_v6 = vadd.f32 %v1913_v30, %v8798_v59  ;;  %v2679_v60 = vrot.slane %v7740_v11, 5  ;;  %v2542_v47 = vrot.slane %v7740_v11, 3  ;;  %v1916_v2 = vpop.f32.mrb[94].mxu0 }
 0x287   :  { %v2952_v34 = vrot.slane %v7740_v11, 1  ;;  %v2815_v41 = vrot.slane %v7740_v11, 7  ;;  %v2615_v63 = vrot.slane %v7740_v11, 4  ;;  %v2478_v7 = vrot.slane %v7740_v11, 2  ;;  %v1918_v8 = vpop.f32.mrb[95].mxu0 }
 0x288   :  { %v2203_v48 = vadd.f32 %v8799_v46, %v1914_v6  ;;  %v1917_v17 = vadd.f32 %v1916_v2, %v8800_v31  ;;  %v2680_v10 = vsel %vm2449_vm6, %v2679_v60, %v2678_v51  ;;  %v2543_v20 = vsel %vm2449_vm6, %v2542_v47, %v2541_v38 }
 0x289   :  { %v2953_v33 = vsel %vm2449_vm6, %v2952_v34, %v2951_v57  ;;  %v2816_v25 = vsel %vm2449_vm6, %v2815_v41, %v2814_v3  ;;  %v3255_v30 = vrot.slane %v7752_v43, 5  ;;  %v3119_v59 = vrot.slane %v7752_v43, 3 }
 0x28a   :  { %v2319_v55 = vmax.f32 %v2203_v48, 0.0  ;;  %v2206_v42 = vadd.f32 %v8801_v18, %v1917_v17  ;;  %v3528_v6 = vrot.slane %v7752_v43, 1  ;;  %v3391_v2 = vrot.slane %v7752_v43, 7 }
 0x28b   :  { %v3256_v46 = vsel %vm2449_vm6, %v3255_v30, %v3254_v29  ;;  %v3120_v51 = vsel %vm2449_vm6, %v3119_v59, %v3118_v37  ;;  %v2616_v38 = vsel %vm2449_vm6, %v2615_v63, %v2614_v24  ;;  %v2479_v57 = vsel %vm2449_vm6, %v2478_v7, %v2477_v54  ;;  %v8802_v24 = vld [vmem:[#allocation11_spill] sm:$0xff] }
 0x28c   :  { %v2383_v3 = vmin.f32 %v2319_v55, 6.0  ;;  %v2320_v60 = vmax.f32 %v2206_v42, 0.0  ;;  %v3529_v47 = vsel %vm2449_vm6, %v3528_v6, %v3527_v61  ;;  %v3392_v34 = vsel %vm2449_vm6, %v3391_v2, %v3390_v35  ;;  %v1921_v41 = vpop.f32.mrb[96].mxu0 }
 0x28d   :  { %v2887_v18 = vsel %vm2446_vm5, %v2886_v36, %v2885_v40  ;;  %v2750_v48 = vsel %vm2446_vm5, %v2749_v4, %v2748_v23  ;;  %v2751_v31 = vrot.slane %v7740_v11, 6  ;;  %v7782_v29 = vsel %vm2446_vm5, %v3189_v62, %v3188_v49  ;;  %v1923_v63 = vpop.f32.mrb[97].mxu0  ;;  %v8803_v23 = vld [vmem:[#allocation12_spill] sm:$0xff] }
 0x28e   :  { %v7784_v37 = vmin.f32 %v2320_v60, 6.0  ;;  %v1922_v54 = vadd.f32 %v1921_v41, %v8802_v24  ;;  %v2681_v42 = vrot.slane %v2383_v3, 4  ;;  %v2544_v7 = vrot.slane %v2383_v3, 2  ;;  %v1924_v61 = vpop.f32.mrb[98].mxu0 }
 0x28f   :  { %v7788_v35 = vsel %vm2452_vm7, %v2383_v3, %v2953_v33  ;;  %v2817_v17 = vrot.slane %v2383_v3, 6  ;;  %v2617_v40 = vrot.slane %v2383_v3, 3  ;;  %v2480_v36 = vrot.slane %v2383_v3, 1  ;;  %v1926_v49 = vpop.f32.mrb[99].mxu0 }
 0x290   :  { %v1925_v4 = vadd.f32 %v1924_v61, %v8803_v23  ;;  %v2211_v8 = vadd.f32 %v7062_v32, %v1922_v54  ;;  %v2682_v62 = vsel %vm2452_vm7, %v2681_v42, %v2680_v10  ;;  %v2545_v30 = vsel %vm2452_vm7, %v2544_v7, %v2543_v20 }
 0x291   :  { %2701 = vrot.lane.b32.xlu0 %v2682_v62, %s5929_s30  ;;  %v7796_v59 = vsel %vm2452_vm7, %v2817_v17, %v2816_v25  ;;  %v3257_v33 = vrot.slane %v7784_v37, 4  ;;  %v3121_v55 = vrot.slane %v7784_v37, 2  ;;  %v7802_v6 = vsel %vm2452_vm7, %v7784_v37, %v3529_v47 }
 0x292   :  { %v2321_v2 = vmax.f32 %v2211_v8, 0.0  ;;  %v2214_v32 = vadd.f32 %v7080_v56, %v1925_v4  ;;  %v3393_v10 = vrot.slane %v7784_v37, 6  ;;  %v2618_v20 = vsel %vm2452_vm7, %v2617_v40, %v2616_v38  ;;  %v8805_v4 = vld [vmem:[#allocation14_spill] sm:$0xff] }
 0x293   :  { %v7808_v60 = vsel %vm2452_vm7, %v3257_v33, %v3256_v46  ;;  %v7811_v25 = vsel %vm2452_vm7, %v3121_v55, %v3120_v51  ;;  %2639 = vst.msk [vmem:[#allocation2 + $0x88] sm:$0xff] %vm1309_vm0, %v2618_v20  ;;  %v2481_v41 = vsel %vm2452_vm7, %v2480_v36, %v2479_v57  ;;  %v2888_v47 = vsel %vm2449_vm6, %v7740_v11, %v2887_v18  ;;  %v8804_v18 = vld [vmem:[#allocation13_spill] sm:$0xff] }
 0x294   :  { %v7817_v24 = vmin.f32 %v2321_v2, 6.0  ;;  %v2322_v56 = vmax.f32 %v2214_v32, 0.0  ;;  %v7820_v54 = vsel %vm2452_vm7, %v3393_v10, %v3392_v34  ;;  %2502 = vst.msk [vmem:[#allocation2 + $0x80] sm:$0xff] %vm1309_vm0, %v2481_v41  ;;  %v2889_v46 = vrot.slane %v2383_v3, 7  ;;  %v1929_v38 = vpop.f32.mrb[100].mxu0 }
 0x295   :  { %2564 = vrot.lane.b32.xlu0 %v2545_v30, %s5929_s30  ;;  %v2752_v51 = vsel %vm2449_vm6, %v2751_v31, %v2750_v48  ;;  %v2753_v63 = vrot.slane %v2383_v3, 5  ;;  %v3191_v57 = vrot.slane %v7752_v43, 4  ;;  %v3193_v42 = vrot.slane %v7784_v37, 3  ;;  %v1931_v61 = vpop.f32.mrb[101].mxu0 }
 0x296   :  { %v7827_v11 = vmin.f32 %v2322_v56, 6.0  ;;  %v1930_v7 = vadd.f32 %v1929_v38, %v8804_v18  ;;  %v2683_v34 = vrot.slane %v7817_v24, 3  ;;  %v2546_v17 = vrot.slane %v7817_v24, 1  ;;  %v1932_v40 = vpop.f32.mrb[102].mxu0 }
 0x297   :  { %v2955_v36 = vrot.slane %v7817_v24, 7  ;;  %v2819_v23 = vrot.slane %v7817_v24, 5  ;;  %v2890_v3 = vsel %vm2452_vm7, %v2889_v46, %v2888_v47  ;;  %v2754_v48 = vsel %vm2452_vm7, %v2753_v63, %v2752_v51  ;;  %v1934_v49 = vpop.f32.mrb[103].mxu0 }
 0x298   :  { %v2219_v31 = vadd.f32 %v7046_v16, %v1930_v7  ;;  %v1933_v8 = vadd.f32 %v1932_v40, %v8805_v4  ;;  %v3259_v62 = vrot.slane %v7827_v11, 3  ;;  %v3123_v30 = vrot.slane %v7827_v11, 1  ;;  %2911 = vst.msk [vmem:[#allocation2 + $0x98] sm:$0xff] %vm1309_vm0, %v2890_v3  ;;  %2775 = vst.msk [vmem:[#allocation2 + $0x90] sm:$0xff] %vm1309_vm0, %v2754_v48  ;;  %v5757_v16 = vld [vmem:[%s8692_s3 + $0x104] ss:$8 sps:$4 sm:$0xff]  }
 0x299   :  { %2969 = vrot.lane.b32.xlu0 %v7055_v28, %s5929_s30  ;;  %v3531_v33 = vrot.slane %v7827_v11, 7  ;;  %v3395_v55 = vrot.slane %v7827_v11, 5  ;;  %v3192_v2 = vsel %vm2449_vm6, %v3191_v57, %v7782_v29  ;;  %v8806_v32 = vrot.slane %v7573_v26, 7  ;;  %4430 = vmatprep.subr.bf16.mxu1 %v5757_v16  ;;  %v8809_v4 = vld [vmem:[#allocation15_spill] sm:$0xff] }
 0x29a   :  { %v2323_v20 = vmax.f32 %v2219_v31, 0.0  ;;  %v2222_v41 = vadd.f32 %v7071_v0, %v1933_v8  ;;  %v3194_v28 = vsel %vm2452_vm7, %v3193_v42, %v3192_v2  ;;  %v3047_v47 = vrot.slane %v7608_v44, 6 }
 0x29b   :  { %v3046_v10 = vsel %vm2434_vm1, %v8806_v32, %v7537_v1  ;;  %3215 = vst.msk [vmem:[#allocation2 + $0xa8] sm:$0xff] %vm1309_vm0, %v3194_v28  ;;  %v3049_v56 = vrot.slane %v7645_v15, 5  ;;  %v3051_v46 = vrot.slane %v7682_v9, 4  ;;  %v3053_v29 = vrot.slane %v7714_v22, 3  ;;  %v8810_v28 = vld [vmem:[#allocation16_spill] sm:$0xff] }
 0x29c   :  { %v3055_v38 = vrot.slane %v7752_v43, 2  ;;  %v7863_v51 = vmin.f32 %v2323_v20, 6.0  ;;  %v2324_v63 = vmax.f32 %v2222_v41, 0.0  ;;  %v3048_v0 = vsel %vm2437_vm2, %v3047_v47, %v3046_v10  ;;  %v1937_v7 = vpop.f32.mrb[104].mxu0 }
 0x29d   :  { %v8807_v57 = vrot.slane %v7537_v1, 6  ;;  %v8808_v42 = vrot.slane %v7573_v26, 5  ;;  %2833 = vrot.lane.b32.xlu0 %v7074_v27, %s5929_s30  ;;  %v3050_v61 = vsel %vm2440_vm3, %v3049_v56, %v3048_v0  ;;  %v3057_v40 = vrot.slane %v7784_v37, 1  ;;  %v1939_v49 = vpop.f32.mrb[105].mxu0 }
 0x29e   :  { %v3456_v3 = vrot.slane %v7608_v44, 4  ;;  %v3458_v48 = vrot.slane %v7645_v15, 3  ;;  %v7877_v31 = vmin.f32 %v2324_v63, 6.0  ;;  %v1938_v8 = vadd.f32 %v1937_v7, %v8809_v4  ;;  %v1940_v32 = vpop.f32.mrb[106].mxu0 }
 0x29f   :  { %v3455_v18 = vsel %vm2434_vm1, %v8808_v42, %v8807_v57  ;;  %v2684_v16 = vrot.slane %v7863_v51, 2  ;;  %v2547_v2 = vsel %vm2434_vm1, %v7863_v51, %v2546_v17  ;;  %v2956_v27 = vrot.slane %v7863_v51, 6  ;;  %v1942_v63 = vpop.f32.mrb[107].mxu0 }
 0x2a0   :  { %v2820_v10 = vrot.slane %v7863_v51, 4  ;;  %v3052_v20 = vsel %vm2443_vm4, %v3051_v46, %v3050_v61  ;;  %v3457_v41 = vsel %vm2437_vm2, %v3456_v3, %v3455_v18  ;;  %v1941_v47 = vadd.f32 %v1940_v32, %v8810_v28  ;;  %v8811_v61 = vld [vmem:[#allocation45_spill] sm:$0xff]  ;;  %v8813_v63 = vld [vmem:[#allocation43_spill] sm:$0xff] }
 0x2a1   :  { %v2227_v56 = vadd.f32 %v7186_v5, %v1938_v8  ;;  %v2685_v0 = vsel %vm2434_vm1, %v2684_v16, %v2683_v34  ;;  %v3260_v57 = vrot.slane %v7877_v31, 2  ;;  %2973 = vrot.lane.b32.xlu0 %v7788_v35, %s5929_s30  ;;  %v2957_v17 = vsel %vm2434_vm1, %v2956_v27, %v2955_v36 }
 0x2a2   :  { %v2821_v42 = vsel %vm2434_vm1, %v2820_v10, %v2819_v23  ;;  %v3124_v46 = vsel %vm2434_vm1, %v7877_v31, %v3123_v30  ;;  %v3532_v18 = vrot.slane %v7877_v31, 6  ;;  %v2230_v5 = vadd.f32 %v8811_v61, %v1941_v47  ;;  %v8812_v10 = vld [vmem:[#allocation17_spill] sm:$0xff] }
 0x2a3   :  { %v2325_v7 = vmax.f32 %v2227_v56, 0.0  ;;  %v3261_v3 = vsel %vm2434_vm1, %v3260_v57, %v3259_v62  ;;  %v3396_v34 = vrot.slane %v7877_v31, 4  ;;  %v3054_v35 = vsel %vm2446_vm5, %v3053_v29, %v3052_v20 }
 0x2a4   :  { %v3533_v4 = vsel %vm2434_vm1, %v3532_v18, %v3531_v33  ;;  %v3459_v36 = vsel %vm2440_vm3, %v3458_v48, %v3457_v41  ;;  %v3460_v23 = vrot.slane %v7682_v9, 2  ;;  %v2326_v30 = vmax.f32 %v2230_v5, 0.0  ;;  %v1945_v32 = vpop.f32.mrb[108].mxu0  ;;  %v8814_v18 = vld [vmem:[#allocation18_spill] sm:$0xff] }
 0x2a5   :  { %v7905_v8 = vmin.f32 %v2325_v7, 6.0  ;;  %v3397_v49 = vsel %vm2434_vm1, %v3396_v34, %v3395_v55  ;;  %v3056_v16 = vsel %vm2449_vm6, %v3055_v38, %v3054_v35  ;;  %2837 = vrot.lane.b32.xlu0 %v7796_v59, %s5929_s30  ;;  %v3462_v29 = vrot.slane %v7714_v22, 1  ;;  %v1947_v41 = vpop.f32.mrb[109].mxu0  ;;  %v8815_v35 = vld [vmem:[#allocation38_spill] sm:$0xff] }
 0x2a6   :  { %v3058_v62 = vsel %vm2452_vm7, %v3057_v40, %v3056_v16  ;;  %v3461_v33 = vsel %vm2443_vm4, %v3460_v23, %v3459_v36  ;;  %v3465_v48 = vrot.slane %v7784_v37, 7  ;;  %v7915_v27 = vmin.f32 %v2326_v30, 6.0  ;;  %v1948_v59 = vpop.f32.mrb[110].mxu0 }
 0x2a7   :  { %v1946_v20 = vadd.f32 %v1945_v32, %v8812_v10  ;;  %v2686_v55 = vrot.slane %v7905_v8, 1  ;;  %v2548_v38 = vrot.slane %v7905_v8, 7  ;;  %3079 = vst.msk [vmem:[#allocation2 + $0xa0] sm:$0xff] %vm1309_vm0, %v3058_v62  ;;  %v2958_v40 = vrot.slane %v7905_v8, 5  ;;  %v1950_v61 = vpop.f32.mrb[111].mxu0  ;;  %v8816_v32 = vld [vmem:[#allocation44_spill] sm:$0xff] }
 0x2a8   :  { %v2822_v28 = vrot.slane %v7905_v8, 3  ;;  %v3463_v47 = vsel %vm2446_vm5, %v3462_v29, %v3461_v33  ;;  %v3318_v56 = vrot.slane %v7573_v26, 3  ;;  %v1949_v7 = vadd.f32 %v1948_v59, %v8814_v18 }
 0x2a9   :  { %v2235_v57 = vadd.f32 %v8813_v63, %v1946_v20  ;;  %v2687_v5 = vsel %vm2437_vm2, %v2686_v55, %v2685_v0  ;;  %v2549_v34 = vsel %vm2437_vm2, %v2548_v38, %v2547_v2  ;;  %3273 = vrot.lane.b32.xlu0 %v8815_v35, %s5929_s30  ;;  %v2959_v36 = vsel %vm2437_vm2, %v2958_v40, %v2957_v17  ;;  %v8818_v40 = vld [vmem:[#allocation39_spill] sm:$0xff] }
 0x2aa   :  { %v2823_v23 = vsel %vm2437_vm2, %v2822_v28, %v2821_v42  ;;  %v3262_v30 = vrot.slane %v7915_v27, 1  ;;  %v3125_v26 = vrot.slane %v7915_v27, 7  ;;  %v2238_v62 = vadd.f32 %v8816_v32, %v1949_v7  ;;  %v8820_v7 = vld [vmem:[#allocation20_spill] sm:$0xff] }
 0x2ab   :  { %v2327_v16 = vmax.f32 %v2235_v57, 0.0  ;;  %v3534_v33 = vrot.slane %v7915_v27, 5  ;;  %v3398_v0 = vrot.slane %v7915_v27, 3  ;;  %v3464_v17 = vsel %vm2449_vm6, %v7752_v43, %v3463_v47 }
 0x2ac   :  { %v3263_v2 = vsel %vm2437_vm2, %v3262_v30, %v3261_v3  ;;  %v3126_v29 = vsel %vm2437_vm2, %v3125_v26, %v3124_v46  ;;  %v8817_v42 = vrot.slane %v7537_v1, 4  ;;  %v2328_v41 = vmax.f32 %v2238_v62, 0.0  ;;  %v1953_v59 = vpop.f32.mrb[112].mxu0 }
 0x2ad   :  { %v7945_v20 = vmin.f32 %v2327_v16, 6.0  ;;  %v3535_v55 = vsel %vm2437_vm2, %v3534_v33, %v3533_v4  ;;  %v3399_v38 = vsel %vm2437_vm2, %v3398_v0, %v3397_v49  ;;  %3137 = vrot.lane.b32.xlu0 %v8818_v40, %s5929_s30  ;;  %v3466_v46 = vsel %vm2452_vm7, %v3465_v48, %v3464_v17  ;;  %v1955_v57 = vpop.f32.mrb[113].mxu0  ;;  %v8821_v40 = vld [vmem:[#allocation21_spill] sm:$0xff] }
 0x2ae   :  { %v3319_v10 = vsel %vm2434_vm1, %v3318_v56, %v8817_v42  ;;  %v3320_v3 = vrot.slane %v7608_v44, 2  ;;  %v3322_v28 = vrot.slane %v7645_v15, 1  ;;  %v3325_v1 = vrot.slane %v7714_v22, 7  ;;  %v8819_v56 = vld [vmem:[#allocation19_spill] sm:$0xff]  ;;  %3487 = vst.msk [vmem:[#allocation2 + $0xb8] sm:$0xff] %vm1309_vm0, %v3466_v46  ;;  %v1956_v18 = vpop.f32.mrb[114].mxu0 }
 0x2af   :  { %v7955_v47 = vmin.f32 %v2328_v41, 6.0  ;;  %v1954_v63 = vadd.f32 %v1953_v59, %v8819_v56  ;;  %v2688_v4 = vsel %vm2440_vm3, %v7945_v20, %v2687_v5  ;;  %v2550_v49 = vrot.slane %v7945_v20, 6  ;;  %v1958_v30 = vpop.f32.mrb[115].mxu0 }
 0x2b0   :  { %v2960_v48 = vrot.slane %v7945_v20, 4  ;;  %v2824_v44 = vrot.slane %v7945_v20, 2  ;;  %v3321_v15 = vsel %vm2437_vm2, %v3320_v3, %v3319_v10  ;;  %v3327_v22 = vrot.slane %v7752_v43, 6 }
 0x2b1   :  { %v1957_v61 = vadd.f32 %v1956_v18, %v8820_v7  ;;  %v2243_v35 = vadd.f32 %v7302_v50, %v1954_v63  ;;  %v2551_v5 = vsel %vm2440_vm3, %v2550_v49, %v2549_v34  ;;  %v3264_v26 = vsel %vm2440_vm3, %v7955_v47, %v3263_v2  ;;  %3277 = vrot.lane.b32.xlu0 %v7808_v60, %s5929_s30  ;;  %v8822_v18 = vld [vmem:[#allocation22_spill] sm:$0xff]  ;;  %v8823_v7 = vld [vmem:[#allocation37_spill] sm:$0xff] }
 0x2b2   :  { %v2961_v16 = vsel %vm2440_vm3, %v2960_v48, %v2959_v36  ;;  %v2825_v32 = vsel %vm2440_vm3, %v2824_v44, %v2823_v23  ;;  %v3127_v62 = vrot.slane %v7955_v47, 6  ;;  %v3536_v43 = vrot.slane %v7955_v47, 4 }
 0x2b3   :  { %v2329_v33 = vmax.f32 %v2243_v35, 0.0  ;;  %v2246_v50 = vadd.f32 %v7318_v14, %v1957_v61  ;;  %v3400_v0 = vrot.slane %v7955_v47, 2  ;;  %v3323_v34 = vsel %vm2440_vm3, %v3322_v28, %v3321_v15 }
 0x2b4   :  { %v3128_v2 = vsel %vm2440_vm3, %v3127_v62, %v3126_v29  ;;  %v3537_v17 = vsel %vm2440_vm3, %v3536_v43, %v3535_v55  ;;  %v3324_v60 = vsel %vm2443_vm4, %v7682_v9, %v3323_v34  ;;  %v3329_v36 = vrot.slane %v7784_v37, 5  ;;  %v1961_v41 = vpop.f32.mrb[116].mxu0 }
 0x2b5   :  { %v7985_v23 = vmin.f32 %v2329_v33, 6.0  ;;  %v2330_v42 = vmax.f32 %v2246_v50, 0.0  ;;  %v3401_v10 = vsel %vm2440_vm3, %v3400_v0, %v3399_v38  ;;  %v3326_v14 = vsel %vm2446_vm5, %v3325_v1, %v3324_v60  ;;  %3141 = vrot.lane.b32.xlu0 %v7811_v25, %s5929_s30  ;;  %v1963_v3 = vpop.f32.mrb[117].mxu0 }
 0x2b6   :  { %v3328_v29 = vsel %vm2449_vm6, %v3327_v22, %v3326_v14  ;;  %v2619_v55 = vrot.slane %v7817_v24, 2  ;;  %v2620_v59 = vrot.slane %v7863_v51, 1  ;;  %v2623_v9 = vrot.slane %v7945_v20, 7  ;;  %v1964_v1 = vpop.f32.mrb[118].mxu0 }
 0x2b7   :  { %v7995_v37 = vmin.f32 %v2330_v42, 6.0  ;;  %v1962_v46 = vadd.f32 %v1961_v41, %v8821_v40  ;;  %v2689_v38 = vrot.slane %v7985_v23, 7  ;;  %v2552_v28 = vrot.slane %v7985_v23, 5  ;;  %v1966_v44 = vpop.f32.mrb[119].mxu0  ;;  %v8824_v42 = vld [vmem:[#allocation40_spill] sm:$0xff] }
 0x2b8   :  { %v2962_v25 = vrot.slane %v7985_v23, 3  ;;  %v2826_v56 = vrot.slane %v7985_v23, 1  ;;  %v3330_v63 = vsel %vm2452_vm7, %v3329_v36, %v3328_v29  ;;  %v2621_v57 = vsel %vm2434_vm1, %v2620_v59, %v2619_v55  ;;  %v8825_v55 = vld [vmem:[#allocation23_spill] sm:$0xff] }
 0x2b9   :  { %v2251_v49 = vadd.f32 %v7285_v52, %v1962_v46  ;;  %v1965_v48 = vadd.f32 %v1964_v1, %v8822_v18  ;;  %v2690_v15 = vsel %vm2443_vm4, %v2689_v38, %v2688_v4  ;;  %v2553_v22 = vsel %vm2443_vm4, %v2552_v28, %v2551_v5  ;;  %3351 = vst.msk [vmem:[#allocation2 + $0xb0] sm:$0xff] %vm1309_vm0, %v3330_v63  ;;  %v8826_v1 = vld [vmem:[#allocation24_spill] sm:$0xff] }
 0x2ba   :  { %3545 = vrot.lane.b32.xlu0 %v8823_v7, %s5929_s30  ;;  %v2963_v61 = vsel %vm2443_vm4, %v2962_v25, %v2961_v16  ;;  %v2827_v35 = vsel %vm2443_vm4, %v2826_v56, %v2825_v32  ;;  %v3265_v30 = vrot.slane %v7995_v37, 7  ;;  %v3129_v52 = vrot.slane %v7995_v37, 5 }
 0x2bb   :  { %v2331_v62 = vmax.f32 %v2251_v49, 0.0  ;;  %v2254_v43 = vadd.f32 %v7314_v39, %v1965_v48  ;;  %v3538_v4 = vrot.slane %v7995_v37, 3  ;;  %v3402_v5 = vrot.slane %v7995_v37, 1 }
 0x2bc   :  { %v3266_v33 = vsel %vm2443_vm4, %v3265_v30, %v3264_v26  ;;  %v3130_v50 = vsel %vm2443_vm4, %v3129_v52, %v3128_v2  ;;  %v2622_v16 = vsel %vm2437_vm2, %v7905_v8, %v2621_v57  ;;  %v2625_v32 = vrot.slane %v7985_v23, 6  ;;  %v1969_v36 = vpop.f32.mrb[120].mxu0 }
 0x2bd   :  { %v8023_v0 = vmin.f32 %v2331_v62, 6.0  ;;  %v2332_v34 = vmax.f32 %v2254_v43, 0.0  ;;  %v3539_v60 = vsel %vm2443_vm4, %v3538_v4, %v3537_v17  ;;  %v3403_v39 = vsel %vm2443_vm4, %v3402_v5, %v3401_v10  ;;  %v1971_v40 = vpop.f32.mrb[121].mxu0 }
 0x2be   :  { %3409 = vrot.lane.b32.xlu0 %v8824_v42, %s5929_s30  ;;  %v2624_v26 = vsel %vm2440_vm3, %v2623_v9, %v2622_v16  ;;  %v2482_v2 = vrot.slane %v7863_v51, 7  ;;  %v2484_v14 = vrot.slane %v7905_v8, 6  ;;  %v2486_v41 = vrot.slane %v7945_v20, 5  ;;  %v1972_v46 = vpop.f32.mrb[122].mxu0  ;;  %v8828_v42 = vld [vmem:[#allocation25_spill] sm:$0xff] }
 0x2bf   :  { %v8033_v29 = vmin.f32 %v2332_v34, 6.0  ;;  %v1970_v59 = vadd.f32 %v1969_v36, %v8825_v55  ;;  %v2691_v17 = vrot.slane %v8023_v0, 6  ;;  %v2554_v10 = vrot.slane %v8023_v0, 4  ;;  %v1974_v63 = vpop.f32.mrb[123].mxu0 }
 0x2c0   :  { %v2964_v3 = vrot.slane %v8023_v0, 2  ;;  %v2828_v9 = vsel %vm2446_vm5, %v8023_v0, %v2827_v35  ;;  %v2626_v38 = vsel %vm2443_vm4, %v2625_v32, %v2624_v26  ;;  %v2627_v28 = vrot.slane %v8023_v0, 5 }
 0x2c1   :  { %v1973_v25 = vadd.f32 %v1972_v46, %v8826_v1  ;;  %v2259_v56 = vadd.f32 %v7401_v58, %v1970_v59  ;;  %v2692_v57 = vsel %vm2446_vm5, %v2691_v17, %v2690_v15  ;;  %v2555_v49 = vsel %vm2446_vm5, %v2554_v10, %v2553_v22  ;;  %v8829_v10 = vld [vmem:[#allocation26_spill] sm:$0xff] }
 0x2c2   :  { %3549 = vrot.lane.b32.xlu0 %v7802_v6, %s5929_s30  ;;  %v2965_v18 = vsel %vm2446_vm5, %v2964_v3, %v2963_v61  ;;  %v3267_v48 = vrot.slane %v8033_v29, 6  ;;  %v3131_v44 = vrot.slane %v8033_v29, 4  ;;  %v3540_v7 = vrot.slane %v8033_v29, 2 }
 0x2c3   :  { %v2333_v35 = vmax.f32 %v2259_v56, 0.0  ;;  %v2262_v30 = vadd.f32 %v7425_v21, %v1973_v25  ;;  %v3404_v58 = vsel %vm2446_vm5, %v8033_v29, %v3403_v39  ;;  %v2628_v15 = vsel %vm2446_vm5, %v2627_v28, %v2626_v38  ;;  %v2700_v22 = vpop.permute.xlu0 %2699 }
 0x2c4   :  { %v2563_v52 = vpop.permute.xlu1 %2562  ;;  %v3268_v6 = vsel %vm2446_vm5, %v3267_v48, %v3266_v33  ;;  %v3132_v61 = vsel %vm2446_vm5, %v3131_v44, %v3130_v50  ;;  %v3541_v62 = vsel %vm2446_vm5, %v3540_v7, %v3539_v60  ;;  %v2483_v43 = vsel %vm2434_vm1, %v2482_v2, %v7817_v24  ;;  %2710 = vst.msk [vmem:[#allocation2 + $0x48] sm:$0xff] %vm2572_vm8, %v2700_v22  ;;  %v1977_v16 = vpop.f32.mrb[124].mxu0  ;;  %v3562_v7 = vld [vmem:[#allocation2 + $0x8] sm:$0xff] }
 0x2c5   :  { %v8062_v4 = vmin.f32 %v2333_v35, 6.0  ;;  %v2334_v5 = vmax.f32 %v2262_v30, 0.0  ;;  %2574 = vst.msk [vmem:[#allocation2 + $0x40] sm:$0xff] %vm2572_vm8, %v2563_v52  ;;  %v2485_v21 = vsel %vm2437_vm2, %v2484_v14, %v2483_v43  ;;  %v2874_v33 = vsel %vm2449_vm6, %v7423_v53, %v7566_v12  ;;  %v1979_v2 = vpop.f32.mrb[125].mxu0 }
 0x2c6   :  { %3413 = vrot.lane.b32.xlu0 %v7820_v54, %s5929_s30  ;;  %v2487_v50 = vsel %vm2440_vm3, %v2486_v41, %v2485_v21  ;;  %v2488_v32 = vrot.slane %v7985_v23, 4  ;;  %v2490_v34 = vrot.slane %v8023_v0, 3  ;;  %v8827_v60 = vrot.slane %v7470_v45, 7  ;;  %v1980_v54 = vpop.f32.mrb[126].mxu0 }
 0x2c7   :  { %v8078_v36 = vmin.f32 %v2334_v5, 6.0  ;;  %v1978_v26 = vadd.f32 %v1977_v16, %v8828_v42  ;;  %v2693_v12 = vrot.slane %v8062_v4, 5  ;;  %v2556_v14 = vrot.slane %v8062_v4, 3  ;;  %v1982_v3 = vpop.f32.mrb[127].mxu0 }
 0x2c8   :  { %v2876_v39 = vsel %vm2452_vm7, %v8827_v60, %v2874_v33  ;;  %v2966_v41 = vrot.slane %v8062_v4, 1  ;;  %v2829_v55 = vrot.slane %v8062_v4, 7  ;;  %v2629_v59 = vrot.slane %v8062_v4, 4  ;;  %v5755_v33 = vld [vmem:[%s8692_s3 + $0x100] ss:$8 sps:$4 sm:$0xff]  }
 0x2c9   :  { %2910 = vst.msk [vmem:[#allocation2 + $0x58] sm:$0xff] %vm1309_vm0, %v2876_v39  ;;  %v2489_v40 = vsel %vm2443_vm4, %v2488_v32, %v2487_v50  ;;  %v2267_v17 = vadd.f32 %v7390_v19, %v1978_v26  ;;  %v1981_v46 = vadd.f32 %v1980_v54, %v8829_v10  ;;  %v2694_v38 = vsel %vm2449_vm6, %v2693_v12, %v2692_v57  ;;  %v3561_v57 = vld [vmem:[#allocation2] sm:$0xff] }
 0x2ca   :  { %v2557_v28 = vsel %vm2449_vm6, %v2556_v14, %v2555_v49  ;;  %v2967_v1 = vsel %vm2449_vm6, %v2966_v41, %v2965_v18  ;;  %v2830_v25 = vsel %vm2449_vm6, %v2829_v55, %v2828_v9  ;;  %v3269_v56 = vrot.slane %v8078_v36, 5  ;;  %v8831_v32 = vld [vmem:[#allocation46_spill] sm:$0xff] }
 0x2cb   :  { %v3133_v63 = vrot.slane %v8078_v36, 3  ;;  %v2335_v48 = vmax.f32 %v2267_v17, 0.0  ;;  %v2270_v44 = vadd.f32 %v7416_v13, %v1981_v46  ;;  %v3542_v19 = vrot.slane %v8078_v36, 1  ;;  %v3570_v30 = vld [vmem:[#allocation2 + $0x48] sm:$0xff] }
 0x2cc   :  { %v3405_v35 = vrot.slane %v8078_v36, 7  ;;  %v3569_v22 = vld [vmem:[#allocation2 + $0x40] sm:$0xff]  ;;  %v3270_v49 = vsel %vm2449_vm6, %v3269_v56, %v3268_v6  ;;  %v2630_v9 = vsel %vm2449_vm6, %v2629_v59, %v2628_v15  ;;  %v2491_v52 = vsel %vm2446_vm5, %v2490_v34, %v2489_v40  ;;  %v5760_v6 = vld [vmem:[%s8692_s3 + $0x114] ss:$8 sps:$4 sm:$0xff]   ;;  %v5758_v40 = vld [vmem:[%s8692_s3 + $0x110] ss:$8 sps:$4 sm:$0xff]  }
 0x2cd   :  { %v3134_v18 = vsel %vm2449_vm6, %v3133_v63, %v3132_v61  ;;  %v8103_v43 = vmin.f32 %v2335_v48, 6.0  ;;  %v2336_v5 = vmax.f32 %v2270_v44, 0.0  ;;  %v3594_v13 = vpack.c.bf16 %v3570_v30, %v3562_v7  ;;  %v8830_v61 = vld [vmem:[#allocation6_spill] sm:$0xff]  ;;  %v8833_v56 = vld [vmem:[#allocation48_spill] sm:$0xff] }
 0x2ce   :  { %v3593_v21 = vpack.c.bf16 %v3569_v22, %v3561_v57  ;;  %v3543_v16 = vsel %vm2449_vm6, %v3542_v19, %v3541_v62  ;;  %v3406_v50 = vsel %vm2449_vm6, %v3405_v35, %v3404_v58  ;;  %v2492_v15 = vrot.slane %v8062_v4, 2  ;;  %v5763_v3 = vld [vmem:[%s8692_s3 + $0x124] ss:$8 sps:$4 sm:$0xff]   ;;  %v8836_v35 = vld [vmem:[#allocation52_spill] sm:$0xff]  ;;  %v5761_v22 = vld [vmem:[%s8692_s3 + $0x120] ss:$8 sps:$4 sm:$0xff]  }
 0x2cf   :  { %v8832_v34 = vrot.slane %v8831_v32, 2  ;;  %v8118_v39 = vmin.f32 %v2336_v5, 6.0  ;;  %4409 = vmatprep.mubr.bf16.mxu1 %v3594_v13  ;;  %v2695_v42 = vrot.slane %v8103_v43, 4  ;;  %v2558_v62 = vrot.slane %v8103_v43, 2  ;;  %v8835_v7 = vld [vmem:[#allocation50_spill] sm:$0xff] }
 0x2d0   :  { %v8124_v58 = vsel %vm2452_vm7, %v8103_v43, %v2967_v1  ;;  %4410 = vmatmul.mubr.bf16.vlgmr.msra.gmra.mrb[100].mxu1 %v3593_v21  ;;  %v2831_v26 = vrot.slane %v8103_v43, 6  ;;  %v2631_v2 = vrot.slane %v8103_v43, 3  ;;  %v2493_v12 = vsel %vm2449_vm6, %v2492_v15, %v2491_v52 }
 0x2d1   :  { %v2731_v60 = vsel %vm2437_vm2, %v8832_v34, %v8830_v61  ;;  %v2494_v14 = vrot.slane %v8103_v43, 1  ;;  %v2696_v54 = vsel %vm2452_vm7, %v2695_v42, %v2694_v38  ;;  %v2559_v41 = vsel %vm2452_vm7, %v2558_v62, %v2557_v28  ;;  %4431 = vmatpush1.bf16.msra.mxu1 %v5755_v33 }
 0x2d2   :  { %v3271_v55 = vrot.slane %v8118_v39, 4  ;;  %v3135_v59 = vrot.slane %v8118_v39, 2  ;;  %2703 = vrot.lane.b32.xlu1 %v2696_v54, %s5929_s30  ;;  %v8139_v17 = vsel %vm2452_vm7, %v2831_v26, %v2830_v25  ;;  %v8143_v10 = vsel %vm2452_vm7, %v8118_v39, %v3543_v16  ;;  %4432 = vmatprep.subr.bf16.mxu1 %v5760_v6  ;;  %v8838_v54 = vld [vmem:[#allocation42_spill] sm:$0xff] }
 0x2d3   :  { %v3407_v46 = vrot.slane %v8118_v39, 6  ;;  %v2632_v38 = vsel %vm2452_vm7, %v2631_v2, %v2630_v9  ;;  %v2495_v25 = vsel %vm2452_vm7, %v2494_v14, %v2493_v12  ;;  %v8834_v63 = vrot.slane %v8833_v56, 1  ;;  %v8837_v2 = vld [vmem:[#allocation56_spill] sm:$0xff] }
 0x2d4   :  { %v8151_v28 = vsel %vm2452_vm7, %v3271_v55, %v3270_v49  ;;  %v8154_v1 = vsel %vm2452_vm7, %v3135_v59, %v3134_v18  ;;  %2640 = vst.msk [vmem:[#allocation2 + $0xc8] sm:$0xff] %vm1309_vm0, %v2632_v38  ;;  %2503 = vst.msk [vmem:[#allocation2 + $0xc0] sm:$0xff] %vm1309_vm0, %v2495_v25  ;;  %v2735_v30 = vrot.slane %v8836_v35, 7  ;;  %v2737_v57 = vrot.slane %v7423_v53, 6  ;;  %v5766_v53 = vld [vmem:[%s8692_s3 + $0x134] ss:$8 sps:$4 sm:$0xff]  }
 0x2d5   :  { %v2733_v48 = vsel %vm2440_vm3, %v8834_v63, %v2731_v60  ;;  %v8162_v44 = vsel %vm2452_vm7, %v3407_v46, %v3406_v50  ;;  %4433 = vmatpush1.bf16.msra.mxu1 %v5758_v40  ;;  %v2739_v49 = vrot.slane %v7470_v45, 5  ;;  %v2891_v18 = vrot.slane %v7817_v24, 6  ;;  %v5764_v60 = vld [vmem:[%s8692_s3 + $0x130] ss:$8 sps:$4 sm:$0xff]   ;;  %v8840_v40 = vld [vmem:[#allocation51_spill] sm:$0xff] }
 0x2d6   :  { %v2734_v19 = vsel %vm2443_vm4, %v8835_v7, %v2733_v48  ;;  %v2892_v9 = vrot.slane %v7863_v51, 5  ;;  %v2894_v52 = vrot.slane %v7905_v8, 4  ;;  %2566 = vrot.lane.b32.xlu1 %v2559_v41, %s5929_s30  ;;  %4434 = vmatprep.subr.bf16.mxu1 %v5763_v3  ;;  %v2896_v13 = vrot.slane %v7945_v20, 3  ;;  %v8839_v55 = vld [vmem:[#allocation49_spill] sm:$0xff]  ;;  %v5767_v7 = vld [vmem:[%s8692_s3 + $0x140] ss:$8 sps:$4 sm:$0xff]  }
 0x2d7   :  { %v2736_v5 = vsel %vm2446_vm5, %v2735_v30, %v2734_v19  ;;  %v2898_v21 = vrot.slane %v7985_v23, 2  ;;  %v2900_v45 = vrot.slane %v8023_v0, 1  ;;  %v2903_v50 = vrot.slane %v8103_v43, 7  ;;  %v8841_v25 = vld [vmem:[#allocation41_spill] sm:$0xff]  ;;  %v8844_v30 = vld [vmem:[#allocation47_spill] sm:$0xff] }
 0x2d8   :  { %v2738_v33 = vsel %vm2449_vm6, %v2737_v57, %v2736_v5  ;;  %v2893_v16 = vsel %vm2434_vm1, %v2892_v9, %v2891_v18  ;;  %v2755_v6 = vrot.slane %v7817_v24, 4  ;;  %v2756_v32 = vrot.slane %v7863_v51, 3  ;;  %v5769_v51 = vld [vmem:[%s8692_s3 + $0x144] ss:$8 sps:$4 sm:$0xff]   ;;  %v5772_v18 = vld [vmem:[%s8692_s3 + $0x154] ss:$8 sps:$4 sm:$0xff]  }
 0x2d9   :  { %v2740_v15 = vsel %vm2452_vm7, %v2739_v49, %v2738_v33  ;;  %v2895_v61 = vsel %vm2437_vm2, %v2894_v52, %v2893_v16  ;;  %v2758_v34 = vrot.slane %v7905_v8, 2  ;;  %4435 = vmatpush1.bf16.msra.mxu1 %v5761_v22  ;;  %v2760_v62 = vrot.slane %v7945_v20, 1  ;;  %v8845_v57 = vld [vmem:[#allocation54_spill] sm:$0xff]  ;;  %v8846_v49 = vld [vmem:[#allocation7_spill] sm:$0xff] }
 0x2da   :  { %2774 = vst.msk [vmem:[#allocation2 + $0x50] sm:$0xff] %vm1309_vm0, %v2740_v15  ;;  %v2897_v42 = vsel %vm2440_vm3, %v2896_v13, %v2895_v61  ;;  %v2763_v24 = vrot.slane %v8023_v0, 7  ;;  %v2765_v26 = vrot.slane %v8062_v4, 6  ;;  %2971 = vrot.lane.b32.xlu1 %v8837_v2, %s5929_s30  ;;  %4436 = vmatprep.subr.bf16.mxu1 %v5766_v53  ;;  %v2757_v12 = vsel %vm2434_vm1, %v2756_v32, %v2755_v6  ;;  %v5770_v61 = vld [vmem:[%s8692_s3 + $0x150] ss:$8 sps:$4 sm:$0xff]  }
 0x2db   :  { %v2899_v8 = vsel %vm2443_vm4, %v2898_v21, %v2897_v42  ;;  %v2767_v14 = vrot.slane %v8103_v43, 5  ;;  %v3168_v20 = vrot.slane %v8838_v54, 1  ;;  %v2759_v41 = vsel %vm2437_vm2, %v2758_v34, %v2757_v12  ;;  %v8843_v43 = vld [vmem:[#allocation53_spill] sm:$0xff] }
 0x2dc   :  { %v2901_v0 = vsel %vm2446_vm5, %v2900_v45, %v2899_v8  ;;  %v3171_v59 = vrot.slane %v8839_v55, 7  ;;  %v3173_v46 = vrot.slane %v8840_v40, 6  ;;  %v2761_v38 = vsel %vm2440_vm3, %v2760_v62, %v2759_v41  ;;  %v5775_v62 = vld [vmem:[%s8692_s3 + $0x164] ss:$8 sps:$4 sm:$0xff]  }
 0x2dd   :  { %v2902_v3 = vsel %vm2449_vm6, %v8062_v4, %v2901_v0  ;;  %v8842_v56 = vrot.slane %v8841_v25, 2  ;;  %v3175_v48 = vrot.slane %v8843_v43, 5  ;;  %4437 = vmatpush1.bf16.msra.mxu1 %v5764_v60  ;;  %v2762_v35 = vsel %vm2443_vm4, %v7985_v23, %v2761_v38  ;;  %v8847_v23 = vld [vmem:[#allocation55_spill] sm:$0xff] }
 0x2de   :  { %v2904_v19 = vsel %vm2452_vm7, %v2903_v50, %v2902_v3  ;;  %v3177_v22 = vrot.slane %v8845_v57, 4  ;;  %2835 = vrot.lane.b32.xlu1 %v8846_v49, %s5929_s30  ;;  %4438 = vmatprep.subr.bf16.mxu1 %v5769_v51  ;;  %v2764_v9 = vsel %vm2446_vm5, %v2763_v24, %v2762_v35  ;;  %v3179_v53 = vrot.slane %v8847_v23, 3 }
 0x2df   :  { %v3169_v63 = vsel %vm2434_vm1, %v3168_v20, %v8842_v56  ;;  %2912 = vst.msk [vmem:[#allocation2 + $0xd8] sm:$0xff] %vm1309_vm0, %v2904_v19  ;;  %v3031_v5 = vrot.slane %v8838_v54, 7  ;;  %v2766_v13 = vsel %vm2449_vm6, %v2765_v26, %v2764_v9  ;;  %v3033_v45 = vrot.slane %v8844_v30, 6 }
 0x2e0   :  { %v3170_v4 = vsel %vm2437_vm2, %v8844_v30, %v3169_v63  ;;  %v3035_v33 = vrot.slane %v8839_v55, 5  ;;  %v2768_v16 = vsel %vm2452_vm7, %v2767_v14, %v2766_v13  ;;  %v3037_v15 = vrot.slane %v8840_v40, 4  ;;  %v5776_v13 = vld [vmem:[%s8692_s3 + $0x170] ss:$8 sps:$4 sm:$0xff]  }
 0x2e1   :  { %v3172_v52 = vsel %vm2440_vm3, %v3171_v59, %v3170_v4  ;;  %v3032_v6 = vsel %vm2434_vm1, %v3031_v5, %v8841_v25  ;;  %4439 = vmatpush1.bf16.msra.mxu1 %v5767_v7  ;;  %2776 = vst.msk [vmem:[#allocation2 + $0xd0] sm:$0xff] %vm1309_vm0, %v2768_v16  ;;  %v3039_v60 = vrot.slane %v8843_v43, 3  ;;  %v3041_v42 = vrot.slane %v8845_v57, 2 }
 0x2e2   :  { %v3174_v21 = vsel %vm2443_vm4, %v3173_v46, %v3172_v52  ;;  %v3034_v34 = vsel %vm2437_vm2, %v3033_v45, %v3032_v6  ;;  %2975 = vrot.lane.b32.xlu1 %v8124_v58, %s5929_s30  ;;  %4440 = vmatprep.subr.bf16.mxu1 %v5772_v18  ;;  %v3043_v2 = vrot.slane %v8847_v23, 1  ;;  %v3195_v51 = vrot.slane %v7827_v11, 2  ;;  %v5773_v46 = vld [vmem:[%s8692_s3 + $0x160] ss:$8 sps:$4 sm:$0xff]   ;;  %v5781_v6 = vld [vmem:[%s8692_s3 + $0x184] ss:$8 sps:$4 sm:$0xff]  }
 0x2e3   :  { %v3176_v50 = vsel %vm2446_vm5, %v3175_v48, %v3174_v21  ;;  %v3036_v26 = vsel %vm2440_vm3, %v3035_v33, %v3034_v34  ;;  %v3196_v12 = vrot.slane %v7877_v31, 1  ;;  %v3059_v58 = vrot.slane %v7877_v31, 7  ;;  %v5778_v48 = vld [vmem:[%s8692_s3 + $0x174] ss:$8 sps:$4 sm:$0xff]  }
 0x2e4   :  { %v3178_v32 = vsel %vm2449_vm6, %v3177_v22, %v3176_v50  ;;  %v3038_v8 = vsel %vm2443_vm4, %v3037_v15, %v3036_v26  ;;  %v3439_v14 = vrot.slane %v8841_v25, 6  ;;  %v3199_v0 = vrot.slane %v7955_v47, 7  ;;  %v8848_v50 = vld [vmem:[#allocation58_spill] sm:$0xff] }
 0x2e5   :  { %v3180_v24 = vsel %vm2452_vm7, %v3179_v53, %v3178_v32  ;;  %v3040_v20 = vsel %vm2446_vm5, %v3039_v60, %v3038_v8  ;;  %v3201_v41 = vrot.slane %v7995_v37, 6  ;;  %v3203_v59 = vrot.slane %v8033_v29, 5  ;;  %4441 = vmatpush1.bf16.msra.mxu1 %v5770_v61 }
 0x2e6   :  { %3214 = vst.msk [vmem:[#allocation2 + $0x68] sm:$0xff] %vm1309_vm0, %v3180_v24  ;;  %v3042_v3 = vsel %vm2449_vm6, %v3041_v42, %v3040_v20  ;;  %v3197_v38 = vsel %vm2434_vm1, %v3196_v12, %v3195_v51  ;;  %v3205_v56 = vrot.slane %v8078_v36, 4  ;;  %v3207_v63 = vrot.slane %v8118_v39, 3  ;;  %2839 = vrot.lane.b32.xlu1 %v8139_v17, %s5929_s30  ;;  %4442 = vmatprep.subr.bf16.mxu1 %v5775_v62  ;;  %v5779_v12 = vld [vmem:[%s8692_s3 + $0x180] ss:$8 sps:$4 sm:$0xff]  }
 0x2e7   :  { %v3044_v7 = vsel %vm2452_vm7, %v3043_v2, %v3042_v3  ;;  %v3198_v19 = vsel %vm2437_vm2, %v7915_v27, %v3197_v38  ;;  %v3060_v35 = vsel %vm2434_vm1, %v3059_v58, %v7827_v11  ;;  %v3061_v4 = vrot.slane %v7915_v27, 6 }
 0x2e8   :  { %3078 = vst.msk [vmem:[#allocation2 + $0x60] sm:$0xff] %vm1309_vm0, %v3044_v7  ;;  %v3200_v22 = vsel %vm2440_vm3, %v3199_v0, %v3198_v19  ;;  %v3440_v17 = vrot.slane %v8838_v54, 5  ;;  %v3442_v49 = vrot.slane %v8844_v30, 4  ;;  %v3444_v18 = vrot.slane %v8839_v55, 3 }
 0x2e9   :  { %v3202_v9 = vsel %vm2443_vm4, %v3201_v41, %v3200_v22  ;;  %v3062_v52 = vsel %vm2437_vm2, %v3061_v4, %v3060_v35  ;;  %v3063_v53 = vrot.slane %v7955_v47, 5  ;;  %v3065_v5 = vrot.slane %v7995_v37, 4  ;;  %4443 = vmatpush1.bf16.msra.mxu1 %v5773_v46  ;;  %v8849_v41 = vld [vmem:[#allocation59_spill] sm:$0xff] }
 0x2ea   :  { %v3204_v21 = vsel %vm2446_vm5, %v3203_v59, %v3202_v9  ;;  %v3067_v45 = vrot.slane %v8033_v29, 3  ;;  %v3069_v33 = vrot.slane %v8078_v36, 2  ;;  %v3071_v16 = vrot.slane %v8118_v39, 1  ;;  %3275 = vrot.lane.b32.xlu1 %v8848_v50, %s5929_s30  ;;  %4444 = vmatprep.subr.bf16.mxu1 %v5778_v48  ;;  %v5790_v9 = vld [vmem:[%s8692_s3 + $0x1b4] ss:$8 sps:$4 sm:$0xff]  }
 0x2eb   :  { %v3206_v15 = vsel %vm2449_vm6, %v3205_v56, %v3204_v21  ;;  %v3064_v61 = vsel %vm2440_vm3, %v3063_v53, %v3062_v52  ;;  %v3441_v32 = vsel %vm2434_vm1, %v3440_v17, %v3439_v14  ;;  %v3446_v34 = vrot.slane %v8840_v40, 2 }
 0x2ec   :  { %v3208_v60 = vsel %vm2452_vm7, %v3207_v63, %v3206_v15  ;;  %v3066_v42 = vsel %vm2443_vm4, %v3065_v5, %v3064_v61  ;;  %v3443_v62 = vsel %vm2437_vm2, %v3442_v49, %v3441_v32  ;;  %v3448_v24 = vrot.slane %v8843_v43, 1  ;;  %v5785_v49 = vld [vmem:[%s8692_s3 + $0x1a0] ss:$8 sps:$4 sm:$0xff]   ;;  %v8850_v15 = vld [vmem:[#allocation57_spill] sm:$0xff]  ;;  %v5793_v61 = vld [vmem:[%s8692_s3 + $0x1c4] ss:$8 sps:$4 sm:$0xff]  }
 0x2ed   :  { %3216 = vst.msk [vmem:[#allocation2 + $0xe8] sm:$0xff] %vm1309_vm0, %v3208_v60  ;;  %v3068_v26 = vsel %vm2446_vm5, %v3067_v45, %v3066_v42  ;;  %v3445_v2 = vsel %vm2440_vm3, %v3444_v18, %v3443_v62  ;;  %v3451_v51 = vrot.slane %v8847_v23, 7  ;;  %v3303_v8 = vrot.slane %v8841_v25, 4  ;;  %4445 = vmatpush1.bf16.msra.mxu1 %v5776_v13  ;;  %v5784_v25 = vld [vmem:[%s8692_s3 + $0x194] ss:$8 sps:$4 sm:$0xff]  }
 0x2ee   :  { %v3070_v58 = vsel %vm2449_vm6, %v3069_v33, %v3068_v26  ;;  %v3447_v14 = vsel %vm2443_vm4, %v3446_v34, %v3445_v2  ;;  %v3304_v20 = vrot.slane %v8838_v54, 3  ;;  %v3306_v0 = vrot.slane %v8844_v30, 2  ;;  %3139 = vrot.lane.b32.xlu1 %v8849_v41, %s5929_s30  ;;  %4446 = vmatprep.subr.bf16.mxu1 %v5781_v6  ;;  %v5788_v6 = vld [vmem:[%s8692_s3 + $0x1b0] ss:$8 sps:$4 sm:$0xff]  }
 0x2ef   :  { %v3072_v59 = vsel %vm2452_vm7, %v3071_v16, %v3070_v58  ;;  %v3449_v46 = vsel %vm2446_vm5, %v3448_v24, %v3447_v14  ;;  %v3308_v3 = vrot.slane %v8839_v55, 1  ;;  %v3311_v38 = vrot.slane %v8843_v43, 7  ;;  %v5782_v55 = vld [vmem:[%s8692_s3 + $0x190] ss:$8 sps:$4 sm:$0xff]   ;;  %v5787_v43 = vld [vmem:[%s8692_s3 + $0x1a4] ss:$8 sps:$4 sm:$0xff]  }
 0x2f0   :  { %3080 = vst.msk [vmem:[#allocation2 + $0xe0] sm:$0xff] %vm1309_vm0, %v3072_v59  ;;  %v3450_v54 = vsel %vm2449_vm6, %v8845_v57, %v3449_v46  ;;  %v3305_v30 = vsel %vm2434_vm1, %v3304_v20, %v3303_v8  ;;  %v3313_v48 = vrot.slane %v8845_v57, 6  ;;  %v3315_v19 = vrot.slane %v8847_v23, 5  ;;  %v5791_v24 = vld [vmem:[%s8692_s3 + $0x1c0] ss:$8 sps:$4 sm:$0xff]  }
 0x2f1   :  { %v3452_v56 = vsel %vm2452_vm7, %v3451_v51, %v3450_v54  ;;  %v3307_v63 = vsel %vm2437_vm2, %v3306_v0, %v3305_v30  ;;  %4447 = vmatpush1.bf16.msra.mxu1 %v5779_v12  ;;  %v3467_v4 = vrot.slane %v7827_v11, 6  ;;  %v3468_v17 = vrot.slane %v7877_v31, 5  ;;  %v5794_v51 = vld [vmem:[%s8692_s3 + $0x1d0] ss:$8 sps:$4 sm:$0xff]   ;;  %v5799_v8 = vld [vmem:[%s8692_s3 + $0x1e4] ss:$8 sps:$4 sm:$0xff]  }
 0x2f2   :  { %3486 = vst.msk [vmem:[#allocation2 + $0x78] sm:$0xff] %vm1309_vm0, %v3452_v56  ;;  %v3309_v7 = vsel %vm2440_vm3, %v3308_v3, %v3307_v63  ;;  %3279 = vrot.lane.b32.xlu1 %v8151_v28, %s5929_s30  ;;  %4448 = vmatprep.subr.bf16.mxu1 %v5784_v25  ;;  %v3470_v23 = vrot.slane %v7915_v27, 4  ;;  %v3472_v28 = vrot.slane %v7955_v47, 3  ;;  %v3476_v53 = vrot.slane %v8033_v29, 1  ;;  %v5797_v58 = vld [vmem:[%s8692_s3 + $0x1e0] ss:$8 sps:$4 sm:$0xff]  }
 0x2f3   :  { %v3310_v57 = vsel %vm2443_vm4, %v8840_v40, %v3309_v7  ;;  %v3474_v40 = vrot.slane %v7995_v37, 2  ;;  %v3469_v52 = vsel %vm2434_vm1, %v3468_v17, %v3467_v4  ;;  %v3331_v5 = vrot.slane %v7827_v11, 4  ;;  %v5800_v20 = vld [vmem:[%s8692_s3 + $0x1f0] ss:$8 sps:$4 sm:$0xff]   ;;  %v5805_v0 = vld [vmem:[%s8692_s3 + $0x204] ss:$8 sps:$4 sm:$0xff]  }
 0x2f4   :  { %v3312_v35 = vsel %vm2446_vm5, %v3311_v38, %v3310_v57  ;;  %v3332_v13 = vrot.slane %v7877_v31, 3  ;;  %v3471_v21 = vsel %vm2437_vm2, %v3470_v23, %v3469_v52  ;;  %v3479_v45 = vrot.slane %v8118_v39, 7  ;;  %v5803_v52 = vld [vmem:[%s8692_s3 + $0x200] ss:$8 sps:$4 sm:$0xff]  }
 0x2f5   :  { %v3314_v22 = vsel %vm2449_vm6, %v3313_v48, %v3312_v35  ;;  %4449 = vmatpush1.bf16.msra.mxu1 %v5782_v55  ;;  %v3334_v16 = vrot.slane %v7915_v27, 2  ;;  %v3336_v50 = vrot.slane %v7955_v47, 1  ;;  %v3339_v31 = vrot.slane %v8033_v29, 7 }
 0x2f6   :  { %v3316_v18 = vsel %vm2452_vm7, %v3315_v19, %v3314_v22  ;;  %3143 = vrot.lane.b32.xlu1 %v8154_v1, %s5929_s30  ;;  %4450 = vmatprep.subr.bf16.mxu1 %v5787_v43  ;;  %v3473_v1 = vsel %vm2440_vm3, %v3472_v28, %v3471_v21  ;;  %v3333_v33 = vsel %vm2434_vm1, %v3332_v13, %v3331_v5  ;;  %v3341_v32 = vrot.slane %v8078_v36, 6  ;;  %v5808_v21 = vld [vmem:[%s8692_s3 + $0x214] ss:$8 sps:$4 sm:$0xff]  }
 0x2f7   :  { %3350 = vst.msk [vmem:[#allocation2 + $0x70] sm:$0xff] %vm1309_vm0, %v3316_v18  ;;  %v3475_v11 = vsel %vm2443_vm4, %v3474_v40, %v3473_v1  ;;  %v3335_v47 = vsel %vm2437_vm2, %v3334_v16, %v3333_v33  ;;  %v3343_v29 = vrot.slane %v8118_v39, 5  ;;  %v5796_v39 = vld [vmem:[%s8692_s3 + $0x1d4] ss:$8 sps:$4 sm:$0xff]   ;;  %v5806_v1 = vld [vmem:[%s8692_s3 + $0x210] ss:$8 sps:$4 sm:$0xff]  }
 0x2f8   :  { %v3477_v27 = vsel %vm2446_vm5, %v3476_v53, %v3475_v11  ;;  %v3337_v60 = vsel %vm2440_vm3, %v3336_v50, %v3335_v47  ;;  %v5814_v47 = vld [vmem:[%s8692_s3 + $0x234] ss:$8 sps:$4 sm:$0xff]  }
 0x2f9   :  { %4451 = vmatpush1.bf16.msra.mxu1 %v5785_v49  ;;  %v3478_v34 = vsel %vm2449_vm6, %v8078_v36, %v3477_v27  ;;  %v3338_v62 = vsel %vm2443_vm4, %v7995_v37, %v3337_v60  ;;  %v8851_v36 = vld [vmem:[#allocation60_spill] sm:$0xff] }
 0x2fa   :  { %3547 = vrot.lane.b32.xlu1 %v8850_v15, %s5929_s30  ;;  %4452 = vmatprep.subr.bf16.mxu1 %v5790_v9  ;;  %v3480_v42 = vsel %vm2452_vm7, %v3479_v45, %v3478_v34  ;;  %v3340_v26 = vsel %vm2446_vm5, %v3339_v31, %v3338_v62  ;;  %v5809_v31 = vld [vmem:[%s8692_s3 + $0x220] ss:$8 sps:$4 sm:$0xff]   ;;  %v5812_v34 = vld [vmem:[%s8692_s3 + $0x230] ss:$8 sps:$4 sm:$0xff]   ;;  %v5817_v62 = vld [vmem:[%s8692_s3 + $0x244] ss:$8 sps:$4 sm:$0xff]  }
 0x2fb   :  { %3488 = vst.msk [vmem:[#allocation2 + $0xf8] sm:$0xff] %vm1309_vm0, %v3480_v42  ;;  %v3342_v2 = vsel %vm2449_vm6, %v3341_v32, %v3340_v26  ;;  %v5815_v26 = vld [vmem:[%s8692_s3 + $0x240] ss:$8 sps:$4 sm:$0xff]  }
 0x2fc   :  { %v3344_v37 = vsel %vm2452_vm7, %v3343_v29, %v3342_v2  ;;  %v5818_v2 = vld [vmem:[%s8692_s3 + $0x250] ss:$8 sps:$4 sm:$0xff]  }
 0x2fd   :  { %4453 = vmatpush1.bf16.msra.mxu1 %v5788_v6  ;;  %3352 = vst.msk [vmem:[#allocation2 + $0xf0] sm:$0xff] %vm1309_vm0, %v3344_v37  ;;  %v5811_v6 = vld [vmem:[%s8692_s3 + $0x224] ss:$8 sps:$4 sm:$0xff]  }
 0x2fe   :  { %3411 = vrot.lane.b32.xlu1 %v8851_v36, %s5929_s30  ;;  %4454 = vmatprep.subr.bf16.mxu1 %v5793_v61  ;;  %v5820_v36 = vld [vmem:[%s8692_s3 + $0x254] ss:$8 sps:$4 sm:$0xff]   ;;  %v5823_v37 = vld [vmem:[%s8692_s3 + $0x264] ss:$8 sps:$4 sm:$0xff]  }
 0x301   :  { %4455 = vmatpush1.bf16.msra.mxu1 %v5791_v24 }
 0x302   :  { %3551 = vrot.lane.b32.xlu1 %v8143_v10, %s5929_s30  ;;  %4456 = vmatprep.subr.bf16.mxu1 %v5796_v39  ;;  %v5802_v10 = vld [vmem:[%s8692_s3 + $0x1f4] ss:$8 sps:$4 sm:$0xff]  }
 0x303   :  { %v2702_v12 = vpop.permute.xlu0 %2701 }
 0x304   :  { %2711 = vst.msk [vmem:[#allocation2 + $0x88] sm:$0xff] %vm2572_vm8, %v2702_v12  ;;  %v5826_v12 = vld [vmem:[%s8692_s3 + $0x274] ss:$8 sps:$4 sm:$0xff]  }
 0x305   :  { %4457 = vmatpush1.bf16.msra.mxu1 %v5794_v51 }
 0x306   :  { %3415 = vrot.lane.b32.xlu1 %v8162_v44, %s5929_s30  ;;  %4458 = vmatprep.subr.bf16.mxu1 %v5799_v8  ;;  %v5821_v8 = vld [vmem:[%s8692_s3 + $0x260] ss:$8 sps:$4 sm:$0xff]  }
 0x307   :  { %v2565_v14 = vpop.permute.xlu0 %2564 }
 0x308   :  { %2575 = vst.msk [vmem:[#allocation2 + $0x80] sm:$0xff] %vm2572_vm8, %v2565_v14  ;;  %v5829_v14 = vld [vmem:[%s8692_s3 + $0x284] ss:$8 sps:$4 sm:$0xff]  }
 0x309   :  { %4459 = vmatpush1.bf16.msra.mxu1 %v5797_v58 }
 0x30a   :  { %4460 = vmatprep.subr.bf16.mxu1 %v5802_v10  ;;  %v5824_v10 = vld [vmem:[%s8692_s3 + $0x270] ss:$8 sps:$4 sm:$0xff]  }
 0x30b   :  { %v2970_v41 = vpop.permute.xlu0 %2969  ;;  %v3578_v43 = vld [vmem:[#allocation2 + $0x88] sm:$0xff] }
 0x30c   :  { %2981 = vst.msk [vmem:[#allocation2 + $0x18] sm:$0xff] %vm2572_vm8, %v2970_v41  ;;  %v5832_v41 = vld [vmem:[%s8692_s3 + $0x294] ss:$8 sps:$4 sm:$0xff]  }
 0x30d   :  { %4461 = vmatpush1.bf16.msra.mxu1 %v5800_v20 }
 0x30e   :  { %4483 = vmatprep.subr.bf16.mxu1 %v5805_v0  ;;  %v5827_v0 = vld [vmem:[%s8692_s3 + $0x280] ss:$8 sps:$4 sm:$0xff]  }
 0x30f   :  { %v2834_v44 = vpop.permute.xlu0 %2833  ;;  %v3577_v22 = vld [vmem:[#allocation2 + $0x80] sm:$0xff] }
 0x310   :  { %2845 = vst.msk [vmem:[#allocation2 + $0x10] sm:$0xff] %vm2572_vm8, %v2834_v44  ;;  %v5830_v44 = vld [vmem:[%s8692_s3 + $0x290] ss:$8 sps:$4 sm:$0xff]  }
 0x313   :  { %v2974_v25 = vpop.permute.xlu0 %2973  ;;  %v3564_v49 = vld [vmem:[#allocation2 + $0x18] sm:$0xff] }
 0x314   :  { %2983 = vst.msk [vmem:[#allocation2 + $0x98] sm:$0xff] %vm2572_vm8, %v2974_v25  ;;  %v5835_v25 = vld [vmem:[%s8692_s3 + $0x2a4] ss:$8 sps:$4 sm:$0xff]  }
 0x317   :  { %v2838_v59 = vpop.permute.xlu0 %2837  ;;  %v3563_v53 = vld [vmem:[#allocation2 + $0x10] sm:$0xff] }
 0x318   :  { %2847 = vst.msk [vmem:[#allocation2 + $0x90] sm:$0xff] %vm2572_vm8, %v2838_v59  ;;  %v5833_v59 = vld [vmem:[%s8692_s3 + $0x2a0] ss:$8 sps:$4 sm:$0xff]  }
 0x31b   :  { %v3274_v46 = vpop.permute.xlu0 %3273  ;;  %v3580_v33 = vld [vmem:[#allocation2 + $0x98] sm:$0xff] }
 0x31c   :  { %3285 = vst.msk [vmem:[#allocation2 + $0x28] sm:$0xff] %vm2572_vm8, %v3274_v46  ;;  %v5838_v46 = vld [vmem:[%s8692_s3 + $0x2b4] ss:$8 sps:$4 sm:$0xff]  }
 0x31f   :  { %v3138_v3 = vpop.permute.xlu0 %3137  ;;  %v3579_v15 = vld [vmem:[#allocation2 + $0x90] sm:$0xff] }
 0x320   :  { %3149 = vst.msk [vmem:[#allocation2 + $0x20] sm:$0xff] %vm2572_vm8, %v3138_v3  ;;  %v5836_v3 = vld [vmem:[%s8692_s3 + $0x2b0] ss:$8 sps:$4 sm:$0xff]  }
 0x323   :  { %v3278_v54 = vpop.permute.xlu0 %3277  ;;  %v3566_v60 = vld [vmem:[#allocation2 + $0x28] sm:$0xff] }
 0x324   :  { %3287 = vst.msk [vmem:[#allocation2 + $0xa8] sm:$0xff] %vm2572_vm8, %v3278_v54  ;;  %v5841_v54 = vld [vmem:[%s8692_s3 + $0x2c4] ss:$8 sps:$4 sm:$0xff]  }
 0x327   :  { %v3142_v30 = vpop.permute.xlu0 %3141 }
 0x328   :  { %3151 = vst.msk [vmem:[#allocation2 + $0xa0] sm:$0xff] %vm2572_vm8, %v3142_v30  ;;  %v5839_v30 = vld [vmem:[%s8692_s3 + $0x2c0] ss:$8 sps:$4 sm:$0xff]  }
 0x32c   :  { %v3546_v38 = vpop.permute.xlu0 %3545 }
 0x32d   :  { %3557 = vst.msk [vmem:[#allocation2 + $0x38] sm:$0xff] %vm2572_vm8, %v3546_v38  ;;  %v5844_v38 = vld [vmem:[%s8692_s3 + $0x2d4] ss:$8 sps:$4 sm:$0xff]  }
 0x330   :  { %v3410_v56 = vpop.permute.xlu0 %3409 }
 0x331   :  { %3421 = vst.msk [vmem:[#allocation2 + $0x30] sm:$0xff] %vm2572_vm8, %v3410_v56  ;;  %v5842_v56 = vld [vmem:[%s8692_s3 + $0x2d0] ss:$8 sps:$4 sm:$0xff]  }
 0x334   :  { %v3550_v63 = vpop.permute.xlu0 %3549 }
 0x335   :  { %3559 = vst.msk [vmem:[#allocation2 + $0xb8] sm:$0xff] %vm2572_vm8, %v3550_v63  ;;  %v5847_v63 = vld [vmem:[%s8692_s3 + $0x2e4] ss:$8 sps:$4 sm:$0xff]  }
 0x338   :  { %v3414_v48 = vpop.permute.xlu0 %3413 }
 0x339   :  { %3423 = vst.msk [vmem:[#allocation2 + $0xb0] sm:$0xff] %vm2572_vm8, %v3414_v48  ;;  %v5845_v48 = vld [vmem:[%s8692_s3 + $0x2e0] ss:$8 sps:$4 sm:$0xff]  }
 0x344   :  { %v2704_v55 = vpop.permute.xlu1 %2703 }
 0x345   :  { %2712 = vst.msk [vmem:[#allocation2 + $0xc8] sm:$0xff] %vm2572_vm8, %v2704_v55  ;;  %v5850_v55 = vld [vmem:[%s8692_s3 + $0x2f4] ss:$8 sps:$4 sm:$0xff]  }
 0x348   :  { %v2567_v7 = vpop.permute.xlu1 %2566 }
 0x349   :  { %2576 = vst.msk [vmem:[#allocation2 + $0xc0] sm:$0xff] %vm2572_vm8, %v2567_v7  ;;  %v5848_v7 = vld [vmem:[%s8692_s3 + $0x2f0] ss:$8 sps:$4 sm:$0xff]  }
 0x34c   :  { %v2972_v19 = vpop.permute.xlu1 %2971  ;;  %v3586_v57 = vld [vmem:[#allocation2 + $0xc8] sm:$0xff] }
 0x34d   :  { %2982 = vst.msk [vmem:[#allocation2 + $0x58] sm:$0xff] %vm2572_vm8, %v2972_v19  ;;  %v3602_v35 = vpack.c.bf16 %v3586_v57, %v3578_v43  ;;  %v5853_v19 = vld [vmem:[%s8692_s3 + $0x304] ss:$8 sps:$4 sm:$0xff]  }
 0x34f   :  { %4419 = vmatprep.mubr.bf16.mxu1 %v3602_v35  ;;  %v3565_v35 = vld [vmem:[#allocation2 + $0x20] sm:$0xff] }
 0x350   :  { %v2836_v4 = vpop.permute.xlu1 %2835  ;;  %v3585_v17 = vld [vmem:[#allocation2 + $0xc0] sm:$0xff] }
 0x351   :  { %2846 = vst.msk [vmem:[#allocation2 + $0x50] sm:$0xff] %vm2572_vm8, %v2836_v4  ;;  %v3601_v23 = vpack.c.bf16 %v3585_v17, %v3577_v22  ;;  %v5851_v4 = vld [vmem:[%s8692_s3 + $0x300] ss:$8 sps:$4 sm:$0xff]  }
 0x352   :  { %v3582_v17 = vld [vmem:[#allocation2 + $0xa8] sm:$0xff] }
 0x353   :  { %4420 = vmatmul.mubr.bf16.gmra.mrb[104].mxu1 %v3601_v23  ;;  %v5856_v23 = vld [vmem:[%s8692_s3 + $0x314] ss:$8 sps:$4 sm:$0xff]  }
 0x354   :  { %v2976_v28 = vpop.permute.xlu1 %2975  ;;  %v3572_v18 = vld [vmem:[#allocation2 + $0x58] sm:$0xff] }
 0x355   :  { %2984 = vst.msk [vmem:[#allocation2 + $0xd8] sm:$0xff] %vm2572_vm8, %v2976_v28  ;;  %v3596_v40 = vpack.c.bf16 %v3572_v18, %v3564_v49  ;;  %v5854_v49 = vld [vmem:[%s8692_s3 + $0x310] ss:$8 sps:$4 sm:$0xff]   ;;  %v5859_v18 = vld [vmem:[%s8692_s3 + $0x324] ss:$8 sps:$4 sm:$0xff]  }
 0x357   :  { %4462 = vmatprep.mubr.bf16.mxu1 %v3596_v40 }
 0x358   :  { %v2840_v9 = vpop.permute.xlu1 %2839  ;;  %v3571_v5 = vld [vmem:[#allocation2 + $0x50] sm:$0xff] }
 0x359   :  { %2848 = vst.msk [vmem:[#allocation2 + $0xd0] sm:$0xff] %vm2572_vm8, %v2840_v9  ;;  %v3595_v13 = vpack.c.bf16 %v3571_v5, %v3563_v53  ;;  %v5857_v53 = vld [vmem:[%s8692_s3 + $0x320] ss:$8 sps:$4 sm:$0xff]  }
 0x35b   :  { %4463 = vmatmul.mubr.bf16.vlgmr.msra.gmra.mrb[100].mxu1 %v3595_v13  ;;  %v3568_v13 = vld [vmem:[#allocation2 + $0x38] sm:$0xff] }
 0x35c   :  { %4484 = vmatpush1.bf16.msra.mxu1 %v5803_v52  ;;  %v3276_v45 = vpop.permute.xlu1 %3275  ;;  %v3588_v16 = vld [vmem:[#allocation2 + $0xd8] sm:$0xff]  ;;  %v3581_v52 = vld [vmem:[#allocation2 + $0xa0] sm:$0xff] }
 0x35d   :  { %3286 = vst.msk [vmem:[#allocation2 + $0x68] sm:$0xff] %vm2572_vm8, %v3276_v45  ;;  %4485 = vmatprep.subr.bf16.mxu1 %v5808_v21  ;;  %v3604_v50 = vpack.c.bf16 %v3588_v16, %v3580_v33  ;;  %v5862_v21 = vld [vmem:[%s8692_s3 + $0x334] ss:$8 sps:$4 sm:$0xff]   ;;  %v5865_v33 = vld [vmem:[%s8692_s3 + $0x344] ss:$8 sps:$4 sm:$0xff]  }
 0x35e   :  { %v5863_v16 = vld [vmem:[%s8692_s3 + $0x340] ss:$8 sps:$4 sm:$0xff]  }
 0x35f   :  { %4472 = vmatprep.mubr.bf16.mxu1 %v3604_v50  ;;  %v5868_v50 = vld [vmem:[%s8692_s3 + $0x354] ss:$8 sps:$4 sm:$0xff]  }
 0x360   :  { %4486 = vmatpush1.bf16.msra.mxu1 %v5806_v1  ;;  %v3140_v11 = vpop.permute.xlu1 %3139  ;;  %v3587_v61 = vld [vmem:[#allocation2 + $0xd0] sm:$0xff] }
 0x361   :  { %3150 = vst.msk [vmem:[#allocation2 + $0x60] sm:$0xff] %vm2572_vm8, %v3140_v11  ;;  %4487 = vmatprep.subr.bf16.mxu1 %v5811_v6  ;;  %v3603_v27 = vpack.c.bf16 %v3587_v61, %v3579_v15  ;;  %v5860_v1 = vld [vmem:[%s8692_s3 + $0x330] ss:$8 sps:$4 sm:$0xff]   ;;  %v5871_v11 = vld [vmem:[%s8692_s3 + $0x364] ss:$8 sps:$4 sm:$0xff]  }
 0x362   :  { %v5866_v6 = vld [vmem:[%s8692_s3 + $0x350] ss:$8 sps:$4 sm:$0xff]   ;;  %v5874_v15 = vld [vmem:[%s8692_s3 + $0x374] ss:$8 sps:$4 sm:$0xff]  }
 0x363   :  { %4473 = vmatmul.mubr.bf16.gmra.mrb[104].mxu1 %v3603_v27  ;;  %v5872_v61 = vld [vmem:[%s8692_s3 + $0x370] ss:$8 sps:$4 sm:$0xff]   ;;  %v5877_v27 = vld [vmem:[%s8692_s3 + $0x384] ss:$8 sps:$4 sm:$0xff]  }
 0x364   :  { %4488 = vmatpush1.bf16.msra.mxu1 %v5809_v31  ;;  %v3280_v32 = vpop.permute.xlu1 %3279  ;;  %v3574_v29 = vld [vmem:[#allocation2 + $0x68] sm:$0xff] }
 0x365   :  { %3288 = vst.msk [vmem:[#allocation2 + $0xe8] sm:$0xff] %vm2572_vm8, %v3280_v32  ;;  %4489 = vmatprep.subr.bf16.mxu1 %v5814_v47  ;;  %v3598_v42 = vpack.c.bf16 %v3574_v29, %v3566_v60  ;;  %v5869_v31 = vld [vmem:[%s8692_s3 + $0x360] ss:$8 sps:$4 sm:$0xff]   ;;  %v5880_v32 = vld [vmem:[%s8692_s3 + $0x394] ss:$8 sps:$4 sm:$0xff]  }
 0x366   :  { %v5875_v47 = vld [vmem:[%s8692_s3 + $0x380] ss:$8 sps:$4 sm:$0xff]   ;;  %v5883_v60 = vld [vmem:[%s8692_s3 + $0x3a4] ss:$8 sps:$4 sm:$0xff]  }
 0x367   :  { %4515 = vmatprep.mubr.bf16.mxu1 %v3598_v42  ;;  %v5881_v29 = vld [vmem:[%s8692_s3 + $0x3a0] ss:$8 sps:$4 sm:$0xff]   ;;  %v5886_v42 = vld [vmem:[%s8692_s3 + $0x3b4] ss:$8 sps:$4 sm:$0xff]  }
 0x368   :  { %4490 = vmatpush1.bf16.msra.mxu1 %v5812_v34  ;;  %v3144_v24 = vpop.permute.xlu1 %3143  ;;  %v3573_v43 = vld [vmem:[#allocation2 + $0x60] sm:$0xff]  ;;  %v5878_v34 = vld [vmem:[%s8692_s3 + $0x390] ss:$8 sps:$4 sm:$0xff]  }
 0x369   :  { %3152 = vst.msk [vmem:[#allocation2 + $0xe0] sm:$0xff] %vm2572_vm8, %v3144_v24  ;;  %4491 = vmatprep.subr.bf16.mxu1 %v5817_v62  ;;  %v3597_v22 = vpack.c.bf16 %v3573_v43, %v3565_v35  ;;  %v5884_v62 = vld [vmem:[%s8692_s3 + $0x3b0] ss:$8 sps:$4 sm:$0xff]   ;;  %v5889_v24 = vld [vmem:[%s8692_s3 + $0x3c4] ss:$8 sps:$4 sm:$0xff]  }
 0x36a   :  { %v5900_v35 = vld [vmem:[%s8693_s4 + $0x8] sm:$0xff]  }
 0x36c   :  { %4492 = vmatpush1.bf16.msra.mxu1 %v5815_v26  ;;  %v3548_v39 = vpop.permute.xlu1 %3547  ;;  %v3590_v57 = vld [vmem:[#allocation2 + $0xe8] sm:$0xff] }
 0x36d   :  { %3558 = vst.msk [vmem:[#allocation2 + $0x78] sm:$0xff] %vm2572_vm8, %v3548_v39  ;;  %4493 = vmatprep.subr.bf16.mxu1 %v5820_v36  ;;  %v3606_v28 = vpack.c.bf16 %v3590_v57, %v3582_v17  ;;  %v5887_v26 = vld [vmem:[%s8692_s3 + $0x3c0] ss:$8 sps:$4 sm:$0xff]   ;;  %v5892_v36 = vld [vmem:[%s8692_s3 + $0x3d4] ss:$8 sps:$4 sm:$0xff]  }
 0x36e   :  { %v5890_v39 = vld [vmem:[%s8692_s3 + $0x3d0] ss:$8 sps:$4 sm:$0xff]   ;;  %v5899_v57 = vld [vmem:[%s8693_s4] sm:$0xff]  }
 0x370   :  { %4494 = vmatpush1.bf16.msra.mxu1 %v5818_v2  ;;  %v3412_v51 = vpop.permute.xlu1 %3411  ;;  %v3589_v40 = vld [vmem:[#allocation2 + $0xe0] sm:$0xff] }
 0x371   :  { %3422 = vst.msk [vmem:[#allocation2 + $0x70] sm:$0xff] %vm2572_vm8, %v3412_v51  ;;  %4495 = vmatprep.subr.bf16.mxu1 %v5823_v37  ;;  %v3605_v5 = vpack.c.bf16 %v3589_v40, %v3581_v52  ;;  %v5895_v2 = vld [vmem:[%s8692_s3 + $0x3e4] ss:$8 sps:$4 sm:$0xff]   ;;  %v5893_v37 = vld [vmem:[%s8692_s3 + $0x3e0] ss:$8 sps:$4 sm:$0xff]  }
 0x372   :  { %v5898_v51 = vld [vmem:[%s8692_s3 + $0x3f4] ss:$8 sps:$4 sm:$0xff]  }
 0x374   :  { %4496 = vmatpush1.bf16.msra.mxu1 %v5821_v8  ;;  %v3552_v58 = vpop.permute.xlu1 %3551  ;;  %v3576_v9 = vld [vmem:[#allocation2 + $0x78] sm:$0xff] }
 0x375   :  { %3560 = vst.msk [vmem:[#allocation2 + $0xf8] sm:$0xff] %vm2572_vm8, %v3552_v58  ;;  %4497 = vmatprep.subr.bf16.mxu1 %v5826_v12  ;;  %v3600_v45 = vpack.c.bf16 %v3576_v9, %v3568_v13  ;;  %v5896_v8 = vld [vmem:[%s8692_s3 + $0x3f0] ss:$8 sps:$4 sm:$0xff]  }
 0x378   :  { %4498 = vmatpush1.bf16.msra.mxu1 %v5824_v10  ;;  %v3416_v20 = vpop.permute.xlu1 %3415  ;;  %v3575_v12 = vld [vmem:[#allocation2 + $0x70] sm:$0xff] }
 0x379   :  { %3424 = vst.msk [vmem:[#allocation2 + $0xf0] sm:$0xff] %vm2572_vm8, %v3416_v20  ;;  %4499 = vmatprep.subr.bf16.mxu1 %v5829_v14  ;;  %v3567_v10 = vld [vmem:[#allocation2 + $0x30] sm:$0xff]  ;;  %v3584_v20 = vld [vmem:[#allocation2 + $0xb8] sm:$0xff] }
 0x37a   :  { %v3599_v14 = vpack.c.bf16 %v3575_v12, %v3567_v10 }
 0x37c   :  { %4500 = vmatpush1.bf16.msra.mxu1 %v5827_v0  ;;  %v3592_v58 = vld [vmem:[#allocation2 + $0xf8] sm:$0xff] }
 0x37d   :  { %4501 = vmatprep.subr.bf16.mxu1 %v5832_v41  ;;  %v3608_v0 = vpack.c.bf16 %v3592_v58, %v3584_v20 }
 0x380   :  { %4502 = vmatpush1.bf16.msra.mxu1 %v5830_v44  ;;  %v3591_v41 = vld [vmem:[#allocation2 + $0xf0] sm:$0xff] }
 0x381   :  { %4503 = vmatprep.subr.bf16.mxu1 %v5835_v25  ;;  %v3583_v44 = vld [vmem:[#allocation2 + $0xb0] sm:$0xff] }
 0x382   :  { %v3607_v25 = vpack.c.bf16 %v3591_v41, %v3583_v44 }
 0x384   :  { %4504 = vmatpush1.bf16.msra.mxu1 %v5833_v59  ;;  %v8852_v59 = vmov 0  }
 0x385   :  { %4505 = vmatprep.subr.bf16.mxu1 %v5838_v46 }
 0x388   :  { %4506 = vmatpush1.bf16.msra.mxu1 %v5836_v3 }
 0x389   :  { %4507 = vmatprep.subr.bf16.mxu1 %v5841_v54 }
 0x38c   :  { %4508 = vmatpush1.bf16.msra.mxu1 %v5839_v30 }
 0x38d   :  { %4509 = vmatprep.subr.bf16.mxu1 %v5844_v38 }
 0x390   :  { %4510 = vmatpush1.bf16.msra.mxu1 %v5842_v56 }
 0x391   :  { %4511 = vmatprep.subr.bf16.mxu1 %v5847_v63 }
 0x394   :  { %4512 = vmatpush1.bf16.msra.mxu1 %v5845_v48 }
 0x395   :  { %4513 = vmatprep.subr.bf16.mxu1 %v5850_v55 }
 0x398   :  { %4514 = vmatpush1.bf16.msra.mxu1 %v5848_v7 }
 0x399   :  { %4536 = vmatprep.subr.bf16.mxu1 %v5853_v19 }
 0x39b   :  { %4516 = vmatmul.mubr.bf16.vlgmr.msra.gmra.mrb[100].mxu1 %v3597_v22  ;;  %v5902_v22 = vld [vmem:[%s8693_s4 + $0x18] sm:$0xff]  }
 0x39c   :  { %4525 = vmatprep.mubr.bf16.mxu1 %v3606_v28  ;;  %4537 = vmatpush1.bf16.msra.mxu1 %v5851_v4  ;;  %v5901_v4 = vld [vmem:[%s8693_s4 + $0x10] sm:$0xff]   ;;  %s5930_s4 = smov [#allocation3]  }
 0x39d   :  { %4538 = vmatprep.subr.bf16.mxu1 %v5856_v23  ;;  %s4728_s18 = sshll.u32 %s5930_s4, 4  ;;  %s4729_s18 = int_to_ptr.vmem [resolvable:$true] %s4728_s18 }
 0x39e   :  { %s5904_s19 = scalar_lea.vmem %s4729_s18, 2048  ;;  %p5909_p1 = scmp.lt.s32.totalorder %s4729_s18, %s4729_s18 }
 0x39f   :  { %p5905_p0 = scmp.ne.s32.totalorder %s4729_s18, %s5904_s19  ;;  %p5910_p2 = scmp.lt.s32.totalorder %s5904_s19, %s5904_s19 }
 0x3a0   :  { %4539 = vmatpush1.bf16.msra.mxu1 %v5854_v49 }
 0x3a1   :  { %4540 = vmatprep.subr.bf16.mxu1 %v5859_v18  ;;  %p5911_p3 = por %p5910_p2, %p5909_p1 }
 0x3a3   :  { %4526 = vmatmul.mubr.bf16.gmra.mrb[104].mxu1 %v3605_v5  ;;  %p5912_p4 = pnand %p5911_p3, %p5905_p0 }
 0x3a4   :  { %4541 = vmatpush1.bf16.msra.mxu1 %v5857_v53  ;;  %4568 = vmatprep.mubr.bf16.mxu1 %v3600_v45 }
 0x3a5   :  { %4542 = vmatprep.subr.bf16.mxu1 %v5862_v21 }
 0x3a8   :  { %4543 = vmatpush1.bf16.msra.mxu1 %v5860_v1 }
 0x3a9   :  { %4544 = vmatprep.subr.bf16.mxu1 %v5865_v33 }
 0x3ac   :  { %4545 = vmatpush1.bf16.msra.mxu1 %v5863_v16 }
 0x3ad   :  { %4546 = vmatprep.subr.bf16.mxu1 %v5868_v50 }
 0x3b0   :  { %4547 = vmatpush1.bf16.msra.mxu1 %v5866_v6 }
 0x3b1   :  { %4548 = vmatprep.subr.bf16.mxu1 %v5871_v11 }
 0x3b4   :  { %4549 = vmatpush1.bf16.msra.mxu1 %v5869_v31 }
 0x3b5   :  { %4550 = vmatprep.subr.bf16.mxu1 %v5874_v15 }
 0x3b8   :  { %4551 = vmatpush1.bf16.msra.mxu1 %v5872_v61 }
 0x3b9   :  { %4552 = vmatprep.subr.bf16.mxu1 %v5877_v27 }
 0x3bc   :  { %4553 = vmatpush1.bf16.msra.mxu1 %v5875_v47 }
 0x3bd   :  { %4554 = vmatprep.subr.bf16.mxu1 %v5880_v32 }
 0x3c0   :  { %4555 = vmatpush1.bf16.msra.mxu1 %v5878_v34 }
 0x3c1   :  { %4556 = vmatprep.subr.bf16.mxu1 %v5883_v60 }
 0x3c4   :  { %4557 = vmatpush1.bf16.msra.mxu1 %v5881_v29 }
 0x3c5   :  { %4558 = vmatprep.subr.bf16.mxu1 %v5886_v42 }
 0x3c8   :  { %4559 = vmatpush1.bf16.msra.mxu1 %v5884_v62 }
 0x3c9   :  { %4560 = vmatprep.subr.bf16.mxu1 %v5889_v24 }
 0x3cc   :  { %4561 = vmatpush1.bf16.msra.mxu1 %v5887_v26 }
 0x3cd   :  { %4562 = vmatprep.subr.bf16.mxu1 %v5892_v36 }
 0x3d0   :  { %4563 = vmatpush1.bf16.msra.mxu1 %v5890_v39 }
 0x3d1   :  { %4564 = vmatprep.subr.bf16.mxu1 %v5895_v2 }
 0x3d4   :  { %4565 = vmatpush1.bf16.msra.mxu1 %v5893_v37 }
 0x3d5   :  { %4566 = vmatprep.subr.bf16.mxu1 %v5898_v51 }
 0x3d8   :  { %4567 = vmatpush1.bf16.msra.mxu1 %v5896_v8 }
 0x3db   :  { %4569 = vmatmul.mubr.bf16.vlgmr.msra.gmra.mrb[100].mxu1 %v3599_v14 }
 0x3dc   :  { %4578 = vmatprep.mubr.bf16.mxu1 %v3608_v0 }
 0x3e3   :  { %4579 = vmatmul.mubr.bf16.gmra.mrb[104].mxu1 %v3607_v25 }
 0x3e4   :  { %4666 = vmatprep.mubr.bf16.mxu1 %v8852_v59 }
 0x4ae   :  { %v4570_v46 = vpop.f32.mrb[100].mxu1 }
 0x4af   :  { %v4572_v3 = vpop.f32.mrb[101].mxu1 }
 0x4b0   :  { %v4574_v54 = vpop.f32.mrb[102].mxu1 }
 0x4b1   :  { %v4597_v30 = vpack.c.bf16 %v4574_v54, %v4570_v46  ;;  %v4576_v38 = vpop.f32.mrb[103].mxu1 }
 0x4b2   :  { %v4598_v56 = vpack.c.bf16 %v4576_v38, %v4572_v3 }
 0x4b4   :  { %4634 = vmatprep.subr.bf16.mxu1 %v4598_v56 }
 0x4b5   :  { %4635 = vmatpush1.bf16.msra.mxu1 %v4597_v30 }
 0x4b6   :  { %v4580_v63 = vpop.f32.mrb[104].mxu1 }
 0x4b7   :  { %v4582_v48 = vpop.f32.mrb[105].mxu1 }
 0x4b8   :  { %v4584_v55 = vpop.f32.mrb[106].mxu1 }
 0x4b9   :  { %v4599_v7 = vpack.c.bf16 %v4584_v55, %v4580_v63  ;;  %v4586_v19 = vpop.f32.mrb[107].mxu1 }
 0x4ba   :  { %v4600_v43 = vpack.c.bf16 %v4586_v19, %v4582_v48 }
 0x4bc   :  { %4636 = vmatprep.subr.bf16.mxu1 %v4600_v43 }
 0x4bd   :  { %4637 = vmatpush1.bf16.msra.mxu1 %v4599_v7 }
 0x4c0   :  { %5100 = vmatmul.mubr.msk.bf16.vlgmr.msra.gmra.mrb[108].mxu1 %vm4621_vm9, %v5899_v57 }
 0x4c1   :  { %4676 = vmatprep.mubr.bf16.mxu1 %v8852_v59 }
 0x4c8   :  { %5101 = vmatmul.mubr.msk.bf16.gmra.mrb[112].mxu1 %vm4621_vm9, %v5900_v35 }
 0x4c9   :  { %4686 = vmatprep.mubr.bf16.mxu1 %v8852_v59 }
 0x4d0   :  { %5102 = vmatmul.mubr.msk.bf16.gmra.mrb[116].mxu1 %vm4621_vm9, %v5901_v4 }
 0x4d1   :  { %4696 = vmatprep.mubr.bf16.mxu1 %v8852_v59 }
 0x4d8   :  { %5103 = vmatmul.mubr.msk.bf16.gmra.mrb[120].mxu1 %vm4621_vm9, %v5902_v22 }
 0x593   :  { %v4668_v17 = vpop.f32.mrb[108].mxu1 }
 0x594   :  { %4707 = vst [vmem:[#allocation3] sm:$0xff] %v4668_v17  ;;  %v4670_v23 = vpop.f32.mrb[109].mxu1 }
 0x595   :  { %4708 = vst [vmem:[#allocation3 + $0x8] sm:$0xff] %v4670_v23  ;;  %v4672_v28 = vpop.f32.mrb[110].mxu1 }
 0x596   :  { %4709 = vst [vmem:[#allocation3 + $0x10] sm:$0xff] %v4672_v28  ;;  %v4674_v49 = vpop.f32.mrb[111].mxu1 }
 0x597   :  { %4710 = vst [vmem:[#allocation3 + $0x18] sm:$0xff] %v4674_v49 }
 0x59b   :  { %v4678_v18 = vpop.f32.mrb[112].mxu1 }
 0x59c   :  { %4711 = vst [vmem:[#allocation3 + $0x20] sm:$0xff] %v4678_v18  ;;  %v4680_v40 = vpop.f32.mrb[113].mxu1 }
 0x59d   :  { %4712 = vst [vmem:[#allocation3 + $0x28] sm:$0xff] %v4680_v40  ;;  %v4682_v9 = vpop.f32.mrb[114].mxu1 }
 0x59e   :  { %4713 = vst [vmem:[#allocation3 + $0x30] sm:$0xff] %v4682_v9  ;;  %v4684_v52 = vpop.f32.mrb[115].mxu1 }
 0x59f   :  { %4714 = vst [vmem:[#allocation3 + $0x38] sm:$0xff] %v4684_v52 }
 0x5a3   :  { %v4688_v53 = vpop.f32.mrb[116].mxu1 }
 0x5a4   :  { %4715 = vst [vmem:[#allocation3 + $0x40] sm:$0xff] %v4688_v53  ;;  %v4690_v5 = vpop.f32.mrb[117].mxu1 }
 0x5a5   :  { %4716 = vst [vmem:[#allocation3 + $0x48] sm:$0xff] %v4690_v5  ;;  %v4692_v13 = vpop.f32.mrb[118].mxu1 }
 0x5a6   :  { %4717 = vst [vmem:[#allocation3 + $0x50] sm:$0xff] %v4692_v13  ;;  %v4694_v21 = vpop.f32.mrb[119].mxu1 }
 0x5a7   :  { %4718 = vst [vmem:[#allocation3 + $0x58] sm:$0xff] %v4694_v21 }
 0x5ab   :  { %v4698_v45 = vpop.f32.mrb[120].mxu1 }
 0x5ac   :  { %4719 = vst [vmem:[#allocation3 + $0x60] sm:$0xff] %v4698_v45  ;;  %v4700_v1 = vpop.f32.mrb[121].mxu1 }
 0x5ad   :  { %4720 = vst [vmem:[#allocation3 + $0x68] sm:$0xff] %v4700_v1  ;;  %v4702_v33 = vpop.f32.mrb[122].mxu1 }
 0x5ae   :  { %4721 = vst [vmem:[#allocation3 + $0x70] sm:$0xff] %v4702_v33  ;;  %v4704_v16 = vpop.f32.mrb[123].mxu1 }
 0x5af   :  { %4722 = vst [vmem:[#allocation3 + $0x78] sm:$0xff] %v4704_v16 }
 0x5b0   :  { %5915 = shalt.err (!%p5912_p4)
}
 0x5b1   :  { %s5916_s22 = scalar_lea.hbm %s8694_s5, 2048 }
 0x5b2   :  { %p5917_p5 = scmp.ne.s32.totalorder %s8694_s5, %s5916_s22  ;;  %p5920_p6 = scmp.lt.u32.totalorder %s5916_s22, %s8694_s5 }
 0x5b4   :  { %p5922_p7 = pnand %p5920_p6, %p5917_p5 }
 0x5b6   :  { %5925 = shalt.err (!%p5922_p7)
}
 0x5b7   :  { %s5931_s26 = smov 256   ;;  %s5932_s0 = smov 16  }
 0x5b8   :  { %4734 = dma.vmem_to_hbm [thread:$0]  %s4729_s18, 2048, %s8694_s5, [#allocation4], %s5931_s26, %s5931_s26, %s5932_s0  }
 0x5b9   :  { %5926 = dma.done.wait [#allocation4], 2048  }
 0x5ba   :  { %5927 = vsyncadd [#allocation4], 4294965248 }
 0x5bb   :  { %4738 = vsyncpa [#allocation4], 1 }

</bundles_post_ra>
